<compile_context>
chip_gen: v7x
topology: tpu7x:2x2x1
jax: 0.10.0
libtpu: 0.0.40
codegen_flags: <defaults>
</compile_context>

<pallas_src>
from functools import partial

import jax
import jax.numpy as jnp
from jax import lax
from jax.experimental import pallas as pl
from jax.experimental.pallas import tpu as pltpu


# ----------------------------- in-kernel math -------------------------------

def _erf(x):
    # Abramowitz & Stegun 7.1.26 rational approximation (max abs err ~1.5e-7).
    # Elementwise ops + exp only, so it lowers cleanly in Mosaic.
    # TODO(synk): switch to jax.lax.erf if/when erf has a Pallas-Mosaic lowering.
    a1, a2, a3, a4, a5 = 0.254829592, -0.284496736, 1.421413741, -1.453152027, 1.061405429
    p = 0.3275911
    sgn = jnp.where(x >= 0.0, 1.0, -1.0)
    ax = jnp.abs(x)
    t = 1.0 / (1.0 + p * ax)
    poly = ((((a5 * t + a4) * t + a3) * t + a2) * t + a1) * t
    return sgn * (1.0 - poly * jnp.exp(-ax * ax))


def _gelu_exact(x):
    # nn.GELU() default (erf-based, not tanh approximation).
    return 0.5 * x * (1.0 + _erf(x * 0.7071067811865476))


def _layernorm(x, w, b, eps=1e-5):
    mu = jnp.mean(x, axis=-1, keepdims=True)
    var = jnp.mean((x - mu) ** 2, axis=-1, keepdims=True)
    return (x - mu) * lax.rsqrt(var + eps) * w + b


# ------------------------------- the kernel ---------------------------------

def block_kernel(x_ref,
                 ln1w_ref, ln1b_ref,
                 wqkv_ref, wproj_ref, bproj_ref,
                 ln2w_ref, ln2b_ref,
                 w1_ref, b1_ref, w2_ref, b2_ref,
                 o_ref, head_slab_ref,
                 *, num_heads, bt, n_pad, n_tok, hchunk, compute_dtype):
    C = x_ref.shape[-1]
    Dh = C // num_heads
    hidden = w1_ref.shape[-1]
    rows = bt * n_pad
    exact_div = jnp.dtype(compute_dtype) == jnp.dtype(jnp.float32)

    x = x_ref[...].astype(jnp.float32)                        # (rows, C)

    # ---- attention branch: x + proj(softmax(q k^T) v) ----
    # (softmax scale already folded into the q-columns of wqkv by the wrapper)
    h = _layernorm(x, ln1w_ref[...], ln1b_ref[...]).astype(compute_dtype)
    qkv = jnp.dot(h, wqkv_ref[...], preferred_element_type=jnp.float32)   # (rows, 3C)
    qkv = qkv.astype(compute_dtype)

    # Additive key-padding mask, built ONCE (JAX does not CSE broadcasts).
    if n_tok != n_pad:
        key_idx = lax.broadcasted_iota(jnp.int32, (1, 1, n_pad), 2)
        kmask = jnp.where(key_idx < n_tok, 0.0, -1e30).astype(jnp.float32)
    else:
        kmask = None

    # Per-head attention; head outputs assembled into a lane-offset slab so the
    # output projection is a single full-K matmul afterwards.
    # NOTE: per-head lane slices at Dh offsets may cause relayouts when Dh<128;
    # acceptable while the branch stays MXU-bound.
    for hd in range(num_heads):
        c0 = hd * Dh
        qh = qkv[:, c0:c0 + Dh].reshape(bt, n_pad, Dh)
        kh = qkv[:, C + c0:C + c0 + Dh].reshape(bt, n_pad, Dh)
        vh = qkv[:, 2 * C + c0:2 * C + c0 + Dh].reshape(bt, n_pad, Dh)

        # q @ k^T, batched over bt, contracting last dims (no XLU transpose).
        s = jnp.einsum('bqd,bkd->bqk', qh, kh,
                       preferred_element_type=jnp.float32)     # (bt, Np, Np) f32
        if kmask is not None:
            s = s + kmask
        s = s - jnp.max(s, axis=-1, keepdims=True)
        p = jnp.exp(s)
        denom = jnp.sum(p, axis=-1, keepdims=True)
        if exact_div:
            p = p / denom
        else:
            p = p * pl.reciprocal(denom, approx=True)

        head_out = jnp.einsum('bqk,bkd->bqd', p.astype(compute_dtype), vh,
                              preferred_element_type=jnp.float32)          # (bt, Np, Dh)
        head_slab_ref[:, c0:c0 + Dh] = (
            head_out.reshape(rows, Dh).astype(compute_dtype))

    # Single full-contraction output projection + residual 1 (drop_path = id).
    attn = jnp.dot(head_slab_ref[...], wproj_ref[...],
                   preferred_element_type=jnp.float32)          # (rows, C) f32
    x = x + attn + bproj_ref[...]

    # ---- MLP branch: x + fc2(gelu(fc1(ln2(x)))) , tiled over hidden ----
    h2 = _layernorm(x, ln2w_ref[...], ln2b_ref[...]).astype(compute_dtype)
    acc = jnp.zeros((rows, C), jnp.float32)
    for j0 in range(0, hidden, hchunk):
        j1 = min(j0 + hchunk, hidden)
        a = jnp.dot(h2, w1_ref[:, j0:j1],
                    preferred_element_type=jnp.float32) + b1_ref[:, j0:j1]
        a = _gelu_exact(a)
        acc = acc + jnp.dot(a.astype(compute_dtype), w2_ref[j0:j1, :],
                            preferred_element_type=jnp.float32)

    o_ref[...] = (x + acc + b2_ref[...]).astype(o_ref.dtype)    # residual 2


# ------------------------------- the wrapper ---------------------------------

def _num_tensorcores():
    try:
        return max(1, int(getattr(jax.devices()[0], "num_cores", 1)))
    except Exception:
        return 1


def _choose_bt(batch, n_pad, target_rows, min_grid_steps):
    """Batch items per grid step: ~target_rows matmul rows per step; keep
    >= min_grid_steps grid steps (2 only on dual-TC parts); bt must divide batch."""
    bt = max(1, min(batch, max(1, target_rows // n_pad)))
    while bt > 1 and ((batch % bt) != 0 or (batch // bt) < min_grid_steps):
        bt -= 1
    return bt


def _choose_hidden_chunk(hidden, max_chunk=512):
    if hidden <= max_chunk:
        return hidden
    for cand in (512, 384, 256, 128):
        if cand <= max_chunk and hidden % cand == 0:
            return cand
    return max_chunk  # final shorter chunk handled by the kernel slice clamp


def _vmem_limit_bytes(rows, C, hidden, x_bytes, cdt_bytes, weight_bufs):
    """Budget what the kernel actually needs, capped at ~80% of physical VMEM."""
    weights = (3 * C * C + C * C + C * hidden + hidden * C) * cdt_bytes
    small = (6 * C + hidden) * 4                      # LN params + biases (f32)
    io = 2 * 2 * rows * C * x_bytes                   # double-buffered in + out rows
    scratch = rows * C * cdt_bytes                    # head-output slab
    live = rows * 3 * C * 4 + 4 * rows * C * 4        # qkv + a few (rows, C) f32 temps
    need = (weights + small) * weight_bufs + io + scratch + live
    try:
        cap = int(pltpu.get_tpu_info().vmem_capacity_bytes)
    except Exception:
        cap = 64 * 1024 * 1024
    return int(min(max(need + (8 << 20), 32 << 20), int(cap * 0.8)))


def vit_block(x, params, num_heads, *, compute_dtype=jnp.bfloat16, target_rows=1024):
    B, N, C = x.shape
    hidden = params["w1"].shape[1]
    scale = (C // num_heads) ** (-0.5)          # qk_scale=None -> head_dim**-0.5

    n_pad = ((N + 7) // 8) * 8                  # pad tokens to full sublanes
    min_steps = 2 if _num_tensorcores() >= 2 else 1
    bt = _choose_bt(B, n_pad, target_rows, min_steps)
    rows = bt * n_pad
    hchunk = _choose_hidden_chunk(hidden)

    x_p = x if n_pad == N else jnp.pad(x, ((0, 0), (0, n_pad - N), (0, 0)))
    x2d = x_p.reshape(B * n_pad, C)             # lane-dense 2-D slab in/out

    # Fold the softmax scale into the q-columns of wqkv (one-time, in f32),
    # then cast matmul weights to compute dtype (f32 accumulation kept via
    # preferred_element_type). LN params & biases stay f32.
    col_scale = jnp.concatenate([jnp.full((C,), scale, jnp.float32),
                                 jnp.ones((2 * C,), jnp.float32)])
    wqkv = (params["wqkv"] * col_scale).astype(compute_dtype)
    wproj = params["wproj"].astype(compute_dtype)
    w1 = params["w1"].astype(compute_dtype)
    w2 = params["w2"].astype(compute_dtype)

    kernel = partial(block_kernel, num_heads=num_heads, bt=bt, n_pad=n_pad,
                     n_tok=N, hchunk=hchunk, compute_dtype=compute_dtype)

    x_bytes = jnp.dtype(x.dtype).itemsize
    cdt_bytes = jnp.dtype(compute_dtype).itemsize

    def run(single_buffer_weights):
        weight_bufs = 1 if single_buffer_weights else 2

        def rep(shape):                          # replicated (weight) spec
            if single_buffer_weights:
                # Constant block index -> one resident buffer is enough.
                return pl.BlockSpec(shape, lambda i: (0,) * len(shape),
                                    pipeline_mode=pl.Buffered(1))
            return pl.BlockSpec(shape, lambda i: (0,) * len(shape))

        in_specs = [
            pl.BlockSpec((rows, C), lambda i: (i, 0)),     # x rows, bt items / step
            rep((1, C)), rep((1, C)),                      # ln1 w, b
            rep((C, 3 * C)),                               # qkv weight (qkv_bias=False)
            rep((C, C)), rep((1, C)),                      # proj w, b
            rep((1, C)), rep((1, C)),                      # ln2 w, b
            rep((C, hidden)), rep((1, hidden)),            # fc1 w, b
            rep((hidden, C)), rep((1, C)),                 # fc2 w, b
        ]
        out_spec = pl.BlockSpec((rows, C), lambda i: (i, 0))

        return pl.pallas_call(
            kernel,
            out_shape=jax.ShapeDtypeStruct((B * n_pad, C), x.dtype),
            grid_spec=pltpu.PrefetchScalarGridSpec(
                num_scalar_prefetch=0,
                grid=(B // bt,),
                in_specs=in_specs,
                out_specs=out_spec,
                scratch_shapes=[pltpu.VMEM((rows, C), compute_dtype)],  # head slab
            ),
            compiler_params=pltpu.CompilerParams(
                dimension_semantics=("parallel",),
                vmem_limit_bytes=_vmem_limit_bytes(rows, C, hidden, x_bytes,
                                                   cdt_bytes, weight_bufs),
            ),
        )(x2d,
          params["ln1_w"], params["ln1_b"],
          wqkv, wproj, params["bproj"],
          params["ln2_w"], params["ln2_b"],
          w1, params["b1"], w2, params["b2"])

    try:
        out2d = run(True)
    except Exception:
        # TODO(synk): pl.Buffered(1) single-buffering rejected by this jax build;
        # fall back to default double-buffered weight blocks.
        out2d = run(False)

    out = out2d.reshape(B, n_pad, C)
    return out[:, :N, :] if n_pad != N else out


# --------------------------- pure-JAX reference ------------------------------

def vit_block_ref(x, params, num_heads):
    B, N, C = x.shape
    Dh = C // num_heads
    scale = Dh ** (-0.5)

    def ln(v, w, b):
        mu = v.mean(-1, keepdims=True)
        var = ((v - mu) ** 2).mean(-1, keepdims=True)
        return (v - mu) / jnp.sqrt(var + 1e-5) * w + b

    h = ln(x, params["ln1_w"], params["ln1_b"])
    qkv = h @ params["wqkv"]
    q, k, v = jnp.split(qkv, 3, axis=-1)
    q = q.reshape(B, N, num_heads, Dh).transpose(0, 2, 1, 3)
    k = k.reshape(B, N, num_heads, Dh).transpose(0, 2, 1, 3)
    v = v.reshape(B, N, num_heads, Dh).transpose(0, 2, 1, 3)
    attn = jax.nn.softmax((q @ k.transpose(0, 1, 3, 2)) * scale, axis=-1)
    out = (attn @ v).transpose(0, 2, 1, 3).reshape(B, N, C)
    out = out @ params["wproj"] + params["bproj"]
    x = x + out
    h2 = ln(x, params["ln2_w"], params["ln2_b"])
    h2 = jax.nn.gelu(h2 @ params["w1"] + params["b1"], approximate=False)
    h2 = h2 @ params["w2"] + params["b2"]
    return x + h2


# ----------------------------------- main ------------------------------------

if __name__ == "__main__":
    # Small shapes that still exercise: multi-item blocks, a multi-step grid
    # (forced via target_rows in the second call), and token padding + key mask
    # (N=7 -> n_pad=8).
    B, N, C = 4, 7, 32
    num_heads = 4
    mlp_ratio = 4.0
    hidden = int(C * mlp_ratio)

    key = jax.random.PRNGKey(0)
    keys = jax.random.split(key, 8)

    params = {
        "ln1_w": jnp.ones((1, C), jnp.float32),
        "ln1_b": jnp.zeros((1, C), jnp.float32),
        "wqkv":  0.02 * jax.random.normal(keys[0], (C, 3 * C), jnp.float32),
        "wproj": 0.02 * jax.random.normal(keys[1], (C, C), jnp.float32),
        "bproj": 0.01 * jax.random.normal(keys[2], (1, C), jnp.float32),
        "ln2_w": jnp.ones((1, C), jnp.float32),
        "ln2_b": jnp.zeros((1, C), jnp.float32),
        "w1":    0.02 * jax.random.normal(keys[3], (C, hidden), jnp.float32),
        "b1":    0.01 * jax.random.normal(keys[4], (1, hidden), jnp.float32),
        "w2":    0.02 * jax.random.normal(keys[5], (hidden, C), jnp.float32),
        "b2":    0.01 * jax.random.normal(keys[6], (1, C), jnp.float32),
    }

    x = jax.random.normal(keys[7], (B, N, C), jnp.float32)
    ref = vit_block_ref(x, params, num_heads)

    # Default path: bf16 matmul operands, f32 accumulation / LN / softmax / GELU.
    out_bf16 = jax.block_until_ready(vit_block(x, params, num_heads))
    assert out_bf16.shape == (B, N, C)
    err_bf16 = float(jnp.max(jnp.abs(out_bf16 - ref)))
    assert jnp.allclose(out_bf16, ref, atol=2e-2, rtol=2e-2), (
        f"bf16 max abs err {err_bf16}")

    # f32 path (exact softmax division); small target_rows forces bt=2 and a
    # 2-step grid to exercise multi-step pipelining.
    out_f32 = jax.block_until_ready(
        vit_block(x, params, num_heads, compute_dtype=jnp.float32, target_rows=16))
    err_f32 = float(jnp.max(jnp.abs(out_f32 - ref)))
    assert jnp.allclose(out_f32, ref, atol=2e-4, rtol=2e-4), (
        f"f32 max abs err {err_f32}")

    print("KERNEL_OK")
</pallas_src>

<mosaic_0001>
module attributes {stable_mosaic.version = 11 : i64} {
  func.func @block_kernel(%arg0: i32, %arg1: memref<32x32xf32, #tpu.memory_space<vmem>>, %arg2: memref<1x32xf32, #tpu.memory_space<vmem>>, %arg3: memref<1x32xf32, #tpu.memory_space<vmem>>, %arg4: memref<32x96xbf16, #tpu.memory_space<vmem>>, %arg5: memref<32x32xbf16, #tpu.memory_space<vmem>>, %arg6: memref<1x32xf32, #tpu.memory_space<vmem>>, %arg7: memref<1x32xf32, #tpu.memory_space<vmem>>, %arg8: memref<1x32xf32, #tpu.memory_space<vmem>>, %arg9: memref<32x128xbf16, #tpu.memory_space<vmem>>, %arg10: memref<1x128xf32, #tpu.memory_space<vmem>>, %arg11: memref<128x32xbf16, #tpu.memory_space<vmem>>, %arg12: memref<1x32xf32, #tpu.memory_space<vmem>>, %arg13: memref<32x32xf32, #tpu.memory_space<vmem>>, %arg14: memref<32x32xbf16, #tpu.memory_space<vmem>>) attributes {dimension_semantics = [#tpu.dimension_semantics<parallel>], iteration_bounds = array<i64: 1>, scalar_prefetch = 0 : i64, scratch_operands = 1 : i64, tpu.core_type = #tpu.core_type<tc>, window_params = [{transform_indices = @transform_0, window_bounds = array<i64: 32, 32>}, {pipeline_mode = #tpu.pipeline_mode<synchronous>, transform_indices = @transform_1, window_bounds = array<i64: 1, 32>}, {pipeline_mode = #tpu.pipeline_mode<synchronous>, transform_indices = @transform_2, window_bounds = array<i64: 1, 32>}, {pipeline_mode = #tpu.pipeline_mode<synchronous>, transform_indices = @transform_3, window_bounds = array<i64: 32, 96>}, {pipeline_mode = #tpu.pipeline_mode<synchronous>, transform_indices = @transform_4, window_bounds = array<i64: 32, 32>}, {pipeline_mode = #tpu.pipeline_mode<synchronous>, transform_indices = @transform_5, window_bounds = array<i64: 1, 32>}, {pipeline_mode = #tpu.pipeline_mode<synchronous>, transform_indices = @transform_6, window_bounds = array<i64: 1, 32>}, {pipeline_mode = #tpu.pipeline_mode<synchronous>, transform_indices = @transform_7, window_bounds = array<i64: 1, 32>}, {pipeline_mode = #tpu.pipeline_mode<synchronous>, transform_indices = @transform_8, window_bounds = array<i64: 32, 128>}, {pipeline_mode = #tpu.pipeline_mode<synchronous>, transform_indices = @transform_9, window_bounds = array<i64: 1, 128>}, {pipeline_mode = #tpu.pipeline_mode<synchronous>, transform_indices = @transform_10, window_bounds = array<i64: 128, 32>}, {pipeline_mode = #tpu.pipeline_mode<synchronous>, transform_indices = @transform_11, window_bounds = array<i64: 1, 32>}, {transform_indices = @transform_12, window_bounds = array<i64: 32, 32>}]} {
    %c0 = arith.constant 0 : index
    %c0_0 = arith.constant 0 : index
    %0 = vector.load %arg1[%c0, %c0_0] : memref<32x32xf32, #tpu.memory_space<vmem>>, vector<32x32xf32>
    %c0_1 = arith.constant 0 : index
    %c0_2 = arith.constant 0 : index
    %1 = vector.load %arg2[%c0_1, %c0_2] : memref<1x32xf32, #tpu.memory_space<vmem>>, vector<1x32xf32>
    %c0_3 = arith.constant 0 : index
    %c0_4 = arith.constant 0 : index
    %2 = vector.load %arg3[%c0_3, %c0_4] : memref<1x32xf32, #tpu.memory_space<vmem>>, vector<1x32xf32>
    %cst = arith.constant dense<0.000000e+00> : vector<32xf32>
    %3 = vector.multi_reduction <add>, %0, %cst [1] : vector<32x32xf32> to vector<32xf32>
    %4 = vector.shape_cast %3 : vector<32xf32> to vector<32x1xf32>
    %cst_5 = arith.constant 3.200000e+01 : f32
    %5 = vector.broadcast %cst_5 : f32 to vector<32x1xf32>
    %6 = arith.divf %4, %5 : vector<32x1xf32>
    %7 = vector.broadcast %6 : vector<32x1xf32> to vector<32x32xf32>
    %8 = arith.subf %0, %7 : vector<32x32xf32>
    %9 = arith.mulf %8, %8 : vector<32x32xf32>
    %cst_6 = arith.constant dense<0.000000e+00> : vector<32xf32>
    %10 = vector.multi_reduction <add>, %9, %cst_6 [1] : vector<32x32xf32> to vector<32xf32>
    %11 = vector.shape_cast %10 : vector<32xf32> to vector<32x1xf32>
    %cst_7 = arith.constant 3.200000e+01 : f32
    %12 = vector.broadcast %cst_7 : f32 to vector<32x1xf32>
    %13 = arith.divf %11, %12 : vector<32x1xf32>
    %14 = vector.broadcast %6 : vector<32x1xf32> to vector<32x32xf32>
    %15 = arith.subf %0, %14 : vector<32x32xf32>
    %cst_8 = arith.constant 9.99999974E-6 : f32
    %16 = vector.broadcast %cst_8 : f32 to vector<32x1xf32>
    %17 = arith.addf %13, %16 : vector<32x1xf32>
    %18 = math.rsqrt %17 : vector<32x1xf32>
    %19 = vector.broadcast %18 : vector<32x1xf32> to vector<32x32xf32>
    %20 = arith.mulf %15, %19 : vector<32x32xf32>
    %21 = vector.broadcast %1 : vector<1x32xf32> to vector<32x32xf32>
    %22 = arith.mulf %20, %21 : vector<32x32xf32>
    %23 = vector.broadcast %2 : vector<1x32xf32> to vector<32x32xf32>
    %24 = arith.addf %22, %23 : vector<32x32xf32>
    %25 = arith.truncf %24 : vector<32x32xf32> to vector<32x32xbf16>
    %c0_9 = arith.constant 0 : index
    %c0_10 = arith.constant 0 : index
    %26 = vector.load %arg4[%c0_9, %c0_10] : memref<32x96xbf16, #tpu.memory_space<vmem>>, vector<32x96xbf16>
    %cst_11 = arith.constant dense<0.000000e+00> : vector<32x96xf32>
    %27 = tpu.matmul %25, %26, %cst_11 {dimension_numbers = #tpu.dot_dimension_numbers<[1], [0], [0], [1], [0, 0, 1, 1], [], []>} : vector<32x32xbf16>, vector<32x96xbf16>, vector<32x96xf32> -> vector<32x96xf32>
    %28 = arith.truncf %27 : vector<32x96xf32> to vector<32x96xbf16>
    %29 = tpu.iota {dimensions = array<i32: 2>} : vector<1x1x8xi32>
    %c7_i32 = arith.constant 7 : i32
    %30 = vector.broadcast %c7_i32 : i32 to vector<1x1x8xi32>
    %31 = arith.cmpi slt, %29, %30 : vector<1x1x8xi32>
    %cst_12 = arith.constant 0.000000e+00 : f32
    %cst_13 = arith.constant -1.000000e+30 : f32
    %32 = vector.broadcast %cst_12 : f32 to vector<1x1x8xf32>
    %33 = vector.broadcast %cst_13 : f32 to vector<1x1x8xf32>
    %34 = arith.select %31, %32, %33 : vector<1x1x8xi1>, vector<1x1x8xf32>
    %35 = vector.extract_strided_slice %28 {offsets = [0, 0], sizes = [32, 8], strides = [1, 1]} : vector<32x96xbf16> to vector<32x8xbf16>
    %36 = vector.shape_cast %35 : vector<32x8xbf16> to vector<4x8x8xbf16>
    %37 = vector.extract_strided_slice %28 {offsets = [0, 32], sizes = [32, 8], strides = [1, 1]} : vector<32x96xbf16> to vector<32x8xbf16>
    %38 = vector.shape_cast %37 : vector<32x8xbf16> to vector<4x8x8xbf16>
    %39 = vector.extract_strided_slice %28 {offsets = [0, 64], sizes = [32, 8], strides = [1, 1]} : vector<32x96xbf16> to vector<32x8xbf16>
    %40 = vector.shape_cast %39 : vector<32x8xbf16> to vector<4x8x8xbf16>
    "tpu.trace_start"() <{level = 10 : i32, message = "bqd,bkd->bqk"}> : () -> ()
    %cst_14 = arith.constant dense<0.000000e+00> : vector<4x8x8xf32>
    %41 = tpu.matmul %36, %38, %cst_14 {dimension_numbers = #tpu.dot_dimension_numbers<[2], [2], [1], [1], [0, 0, 0, 1, 1, 1], [0], [0]>} : vector<4x8x8xbf16>, vector<4x8x8xbf16>, vector<4x8x8xf32> -> vector<4x8x8xf32>
    "tpu.trace_stop"() : () -> ()
    %42 = vector.broadcast %34 : vector<1x1x8xf32> to vector<4x8x8xf32>
    %43 = arith.addf %41, %42 : vector<4x8x8xf32>
    %cst_15 = arith.constant dense<0xFF800000> : vector<4x8xf32>
    %44 = vector.multi_reduction <maximumf>, %43, %cst_15 [2] : vector<4x8x8xf32> to vector<4x8xf32>
    %45 = vector.shape_cast %44 : vector<4x8xf32> to vector<4x8x1xf32>
    %46 = vector.broadcast %45 : vector<4x8x1xf32> to vector<4x8x8xf32>
    %47 = arith.subf %43, %46 : vector<4x8x8xf32>
    %48 = math.exp %47 : vector<4x8x8xf32>
    %cst_16 = arith.constant dense<0.000000e+00> : vector<4x8xf32>
    %49 = vector.multi_reduction <add>, %48, %cst_16 [2] : vector<4x8x8xf32> to vector<4x8xf32>
    %50 = vector.shape_cast %49 : vector<4x8xf32> to vector<4x8x1xf32>
    %51 = tpu.reciprocal %50 {approx = true} : vector<4x8x1xf32> -> vector<4x8x1xf32>
    %52 = vector.broadcast %51 : vector<4x8x1xf32> to vector<4x8x8xf32>
    %53 = arith.mulf %48, %52 : vector<4x8x8xf32>
    %54 = arith.truncf %53 : vector<4x8x8xf32> to vector<4x8x8xbf16>
    "tpu.trace_start"() <{level = 10 : i32, message = "bqk,bkd->bqd"}> : () -> ()
    %cst_17 = arith.constant dense<0.000000e+00> : vector<4x8x8xf32>
    %55 = tpu.matmul %54, %40, %cst_17 {dimension_numbers = #tpu.dot_dimension_numbers<[2], [1], [1], [2], [0, 0, 0, 1, 1, 2], [0], [0]>} : vector<4x8x8xbf16>, vector<4x8x8xbf16>, vector<4x8x8xf32> -> vector<4x8x8xf32>
    "tpu.trace_stop"() : () -> ()
    %56 = vector.shape_cast %55 : vector<4x8x8xf32> to vector<32x8xf32>
    %57 = arith.truncf %56 : vector<32x8xf32> to vector<32x8xbf16>
    %c0_18 = arith.constant 0 : index
    %c0_19 = arith.constant 0 : index
    %58 = vector.load %arg14[%c0_18, %c0_19] : memref<32x32xbf16, #tpu.memory_space<vmem>>, vector<32x8xbf16>
    tpu.vector_store %arg14[%c0_18, %c0_19], %57 {strides = array<i32>} : memref<32x32xbf16, #tpu.memory_space<vmem>>, vector<32x8xbf16>,
    %59 = vector.extract_strided_slice %28 {offsets = [0, 8], sizes = [32, 8], strides = [1, 1]} : vector<32x96xbf16> to vector<32x8xbf16>
    %60 = vector.shape_cast %59 : vector<32x8xbf16> to vector<4x8x8xbf16>
    %61 = vector.extract_strided_slice %28 {offsets = [0, 40], sizes = [32, 8], strides = [1, 1]} : vector<32x96xbf16> to vector<32x8xbf16>
    %62 = vector.shape_cast %61 : vector<32x8xbf16> to vector<4x8x8xbf16>
    %63 = vector.extract_strided_slice %28 {offsets = [0, 72], sizes = [32, 8], strides = [1, 1]} : vector<32x96xbf16> to vector<32x8xbf16>
    %64 = vector.shape_cast %63 : vector<32x8xbf16> to vector<4x8x8xbf16>
    "tpu.trace_start"() <{level = 10 : i32, message = "bqd,bkd->bqk"}> : () -> ()
    %cst_20 = arith.constant dense<0.000000e+00> : vector<4x8x8xf32>
    %65 = tpu.matmul %60, %62, %cst_20 {dimension_numbers = #tpu.dot_dimension_numbers<[2], [2], [1], [1], [0, 0, 0, 1, 1, 1], [0], [0]>} : vector<4x8x8xbf16>, vector<4x8x8xbf16>, vector<4x8x8xf32> -> vector<4x8x8xf32>
    "tpu.trace_stop"() : () -> ()
    %66 = vector.broadcast %34 : vector<1x1x8xf32> to vector<4x8x8xf32>
    %67 = arith.addf %65, %66 : vector<4x8x8xf32>
    %cst_21 = arith.constant dense<0xFF800000> : vector<4x8xf32>
    %68 = vector.multi_reduction <maximumf>, %67, %cst_21 [2] : vector<4x8x8xf32> to vector<4x8xf32>
    %69 = vector.shape_cast %68 : vector<4x8xf32> to vector<4x8x1xf32>
    %70 = vector.broadcast %69 : vector<4x8x1xf32> to vector<4x8x8xf32>
    %71 = arith.subf %67, %70 : vector<4x8x8xf32>
    %72 = math.exp %71 : vector<4x8x8xf32>
    %cst_22 = arith.constant dense<0.000000e+00> : vector<4x8xf32>
    %73 = vector.multi_reduction <add>, %72, %cst_22 [2] : vector<4x8x8xf32> to vector<4x8xf32>
    %74 = vector.shape_cast %73 : vector<4x8xf32> to vector<4x8x1xf32>
    %75 = tpu.reciprocal %74 {approx = true} : vector<4x8x1xf32> -> vector<4x8x1xf32>
    %76 = vector.broadcast %75 : vector<4x8x1xf32> to vector<4x8x8xf32>
    %77 = arith.mulf %72, %76 : vector<4x8x8xf32>
    %78 = arith.truncf %77 : vector<4x8x8xf32> to vector<4x8x8xbf16>
    "tpu.trace_start"() <{level = 10 : i32, message = "bqk,bkd->bqd"}> : () -> ()
    %cst_23 = arith.constant dense<0.000000e+00> : vector<4x8x8xf32>
    %79 = tpu.matmul %78, %64, %cst_23 {dimension_numbers = #tpu.dot_dimension_numbers<[2], [1], [1], [2], [0, 0, 0, 1, 1, 2], [0], [0]>} : vector<4x8x8xbf16>, vector<4x8x8xbf16>, vector<4x8x8xf32> -> vector<4x8x8xf32>
    "tpu.trace_stop"() : () -> ()
    %80 = vector.shape_cast %79 : vector<4x8x8xf32> to vector<32x8xf32>
    %81 = arith.truncf %80 : vector<32x8xf32> to vector<32x8xbf16>
    %c0_24 = arith.constant 0 : index
    %c8 = arith.constant 8 : index
    %82 = vector.load %arg14[%c0_24, %c8] : memref<32x32xbf16, #tpu.memory_space<vmem>>, vector<32x8xbf16>
    tpu.vector_store %arg14[%c0_24, %c8], %81 {strides = array<i32>} : memref<32x32xbf16, #tpu.memory_space<vmem>>, vector<32x8xbf16>,
    %83 = vector.extract_strided_slice %28 {offsets = [0, 16], sizes = [32, 8], strides = [1, 1]} : vector<32x96xbf16> to vector<32x8xbf16>
    %84 = vector.shape_cast %83 : vector<32x8xbf16> to vector<4x8x8xbf16>
    %85 = vector.extract_strided_slice %28 {offsets = [0, 48], sizes = [32, 8], strides = [1, 1]} : vector<32x96xbf16> to vector<32x8xbf16>
    %86 = vector.shape_cast %85 : vector<32x8xbf16> to vector<4x8x8xbf16>
    %87 = vector.extract_strided_slice %28 {offsets = [0, 80], sizes = [32, 8], strides = [1, 1]} : vector<32x96xbf16> to vector<32x8xbf16>
    %88 = vector.shape_cast %87 : vector<32x8xbf16> to vector<4x8x8xbf16>
    "tpu.trace_start"() <{level = 10 : i32, message = "bqd,bkd->bqk"}> : () -> ()
    %cst_25 = arith.constant dense<0.000000e+00> : vector<4x8x8xf32>
    %89 = tpu.matmul %84, %86, %cst_25 {dimension_numbers = #tpu.dot_dimension_numbers<[2], [2], [1], [1], [0, 0, 0, 1, 1, 1], [0], [0]>} : vector<4x8x8xbf16>, vector<4x8x8xbf16>, vector<4x8x8xf32> -> vector<4x8x8xf32>
    "tpu.trace_stop"() : () -> ()
    %90 = vector.broadcast %34 : vector<1x1x8xf32> to vector<4x8x8xf32>
    %91 = arith.addf %89, %90 : vector<4x8x8xf32>
    %cst_26 = arith.constant dense<0xFF800000> : vector<4x8xf32>
    %92 = vector.multi_reduction <maximumf>, %91, %cst_26 [2] : vector<4x8x8xf32> to vector<4x8xf32>
    %93 = vector.shape_cast %92 : vector<4x8xf32> to vector<4x8x1xf32>
    %94 = vector.broadcast %93 : vector<4x8x1xf32> to vector<4x8x8xf32>
    %95 = arith.subf %91, %94 : vector<4x8x8xf32>
    %96 = math.exp %95 : vector<4x8x8xf32>
    %cst_27 = arith.constant dense<0.000000e+00> : vector<4x8xf32>
    %97 = vector.multi_reduction <add>, %96, %cst_27 [2] : vector<4x8x8xf32> to vector<4x8xf32>
    %98 = vector.shape_cast %97 : vector<4x8xf32> to vector<4x8x1xf32>
    %99 = tpu.reciprocal %98 {approx = true} : vector<4x8x1xf32> -> vector<4x8x1xf32>
    %100 = vector.broadcast %99 : vector<4x8x1xf32> to vector<4x8x8xf32>
    %101 = arith.mulf %96, %100 : vector<4x8x8xf32>
    %102 = arith.truncf %101 : vector<4x8x8xf32> to vector<4x8x8xbf16>
    "tpu.trace_start"() <{level = 10 : i32, message = "bqk,bkd->bqd"}> : () -> ()
    %cst_28 = arith.constant dense<0.000000e+00> : vector<4x8x8xf32>
    %103 = tpu.matmul %102, %88, %cst_28 {dimension_numbers = #tpu.dot_dimension_numbers<[2], [1], [1], [2], [0, 0, 0, 1, 1, 2], [0], [0]>} : vector<4x8x8xbf16>, vector<4x8x8xbf16>, vector<4x8x8xf32> -> vector<4x8x8xf32>
    "tpu.trace_stop"() : () -> ()
    %104 = vector.shape_cast %103 : vector<4x8x8xf32> to vector<32x8xf32>
    %105 = arith.truncf %104 : vector<32x8xf32> to vector<32x8xbf16>
    %c0_29 = arith.constant 0 : index
    %c16 = arith.constant 16 : index
    %106 = vector.load %arg14[%c0_29, %c16] : memref<32x32xbf16, #tpu.memory_space<vmem>>, vector<32x8xbf16>
    tpu.vector_store %arg14[%c0_29, %c16], %105 {strides = array<i32>} : memref<32x32xbf16, #tpu.memory_space<vmem>>, vector<32x8xbf16>,
    %107 = vector.extract_strided_slice %28 {offsets = [0, 24], sizes = [32, 8], strides = [1, 1]} : vector<32x96xbf16> to vector<32x8xbf16>
    %108 = vector.shape_cast %107 : vector<32x8xbf16> to vector<4x8x8xbf16>
    %109 = vector.extract_strided_slice %28 {offsets = [0, 56], sizes = [32, 8], strides = [1, 1]} : vector<32x96xbf16> to vector<32x8xbf16>
    %110 = vector.shape_cast %109 : vector<32x8xbf16> to vector<4x8x8xbf16>
    %111 = vector.extract_strided_slice %28 {offsets = [0, 88], sizes = [32, 8], strides = [1, 1]} : vector<32x96xbf16> to vector<32x8xbf16>
    %112 = vector.shape_cast %111 : vector<32x8xbf16> to vector<4x8x8xbf16>
    "tpu.trace_start"() <{level = 10 : i32, message = "bqd,bkd->bqk"}> : () -> ()
    %cst_30 = arith.constant dense<0.000000e+00> : vector<4x8x8xf32>
    %113 = tpu.matmul %108, %110, %cst_30 {dimension_numbers = #tpu.dot_dimension_numbers<[2], [2], [1], [1], [0, 0, 0, 1, 1, 1], [0], [0]>} : vector<4x8x8xbf16>, vector<4x8x8xbf16>, vector<4x8x8xf32> -> vector<4x8x8xf32>
    "tpu.trace_stop"() : () -> ()
    %114 = vector.broadcast %34 : vector<1x1x8xf32> to vector<4x8x8xf32>
    %115 = arith.addf %113, %114 : vector<4x8x8xf32>
    %cst_31 = arith.constant dense<0xFF800000> : vector<4x8xf32>
    %116 = vector.multi_reduction <maximumf>, %115, %cst_31 [2] : vector<4x8x8xf32> to vector<4x8xf32>
    %117 = vector.shape_cast %116 : vector<4x8xf32> to vector<4x8x1xf32>
    %118 = vector.broadcast %117 : vector<4x8x1xf32> to vector<4x8x8xf32>
    %119 = arith.subf %115, %118 : vector<4x8x8xf32>
    %120 = math.exp %119 : vector<4x8x8xf32>
    %cst_32 = arith.constant dense<0.000000e+00> : vector<4x8xf32>
    %121 = vector.multi_reduction <add>, %120, %cst_32 [2] : vector<4x8x8xf32> to vector<4x8xf32>
    %122 = vector.shape_cast %121 : vector<4x8xf32> to vector<4x8x1xf32>
    %123 = tpu.reciprocal %122 {approx = true} : vector<4x8x1xf32> -> vector<4x8x1xf32>
    %124 = vector.broadcast %123 : vector<4x8x1xf32> to vector<4x8x8xf32>
    %125 = arith.mulf %120, %124 : vector<4x8x8xf32>
    %126 = arith.truncf %125 : vector<4x8x8xf32> to vector<4x8x8xbf16>
    "tpu.trace_start"() <{level = 10 : i32, message = "bqk,bkd->bqd"}> : () -> ()
    %cst_33 = arith.constant dense<0.000000e+00> : vector<4x8x8xf32>
    %127 = tpu.matmul %126, %112, %cst_33 {dimension_numbers = #tpu.dot_dimension_numbers<[2], [1], [1], [2], [0, 0, 0, 1, 1, 2], [0], [0]>} : vector<4x8x8xbf16>, vector<4x8x8xbf16>, vector<4x8x8xf32> -> vector<4x8x8xf32>
    "tpu.trace_stop"() : () -> ()
    %128 = vector.shape_cast %127 : vector<4x8x8xf32> to vector<32x8xf32>
    %129 = arith.truncf %128 : vector<32x8xf32> to vector<32x8xbf16>
    %c0_34 = arith.constant 0 : index
    %c24 = arith.constant 24 : index
    %130 = vector.load %arg14[%c0_34, %c24] : memref<32x32xbf16, #tpu.memory_space<vmem>>, vector<32x8xbf16>
    tpu.vector_store %arg14[%c0_34, %c24], %129 {strides = array<i32>} : memref<32x32xbf16, #tpu.memory_space<vmem>>, vector<32x8xbf16>,
    %c0_35 = arith.constant 0 : index
    %c0_36 = arith.constant 0 : index
    %131 = vector.load %arg14[%c0_35, %c0_36] : memref<32x32xbf16, #tpu.memory_space<vmem>>, vector<32x32xbf16>
    %c0_37 = arith.constant 0 : index
    %c0_38 = arith.constant 0 : index
    %132 = vector.load %arg5[%c0_37, %c0_38] : memref<32x32xbf16, #tpu.memory_space<vmem>>, vector<32x32xbf16>
    %cst_39 = arith.constant dense<0.000000e+00> : vector<32x32xf32>
    %133 = tpu.matmul %131, %132, %cst_39 {dimension_numbers = #tpu.dot_dimension_numbers<[1], [0], [0], [1], [0, 0, 1, 1], [], []>} : vector<32x32xbf16>, vector<32x32xbf16>, vector<32x32xf32> -> vector<32x32xf32>
    %134 = arith.addf %0, %133 : vector<32x32xf32>
    %c0_40 = arith.constant 0 : index
    %c0_41 = arith.constant 0 : index
    %135 = vector.load %arg6[%c0_40, %c0_41] : memref<1x32xf32, #tpu.memory_space<vmem>>, vector<1x32xf32>
    %136 = vector.broadcast %135 : vector<1x32xf32> to vector<32x32xf32>
    %137 = arith.addf %134, %136 : vector<32x32xf32>
    %c0_42 = arith.constant 0 : index
    %c0_43 = arith.constant 0 : index
    %138 = vector.load %arg7[%c0_42, %c0_43] : memref<1x32xf32, #tpu.memory_space<vmem>>, vector<1x32xf32>
    %c0_44 = arith.constant 0 : index
    %c0_45 = arith.constant 0 : index
    %139 = vector.load %arg8[%c0_44, %c0_45] : memref<1x32xf32, #tpu.memory_space<vmem>>, vector<1x32xf32>
    %cst_46 = arith.constant dense<0.000000e+00> : vector<32xf32>
    %140 = vector.multi_reduction <add>, %137, %cst_46 [1] : vector<32x32xf32> to vector<32xf32>
    %141 = vector.shape_cast %140 : vector<32xf32> to vector<32x1xf32>
    %cst_47 = arith.constant 3.200000e+01 : f32
    %142 = vector.broadcast %cst_47 : f32 to vector<32x1xf32>
    %143 = arith.divf %141, %142 : vector<32x1xf32>
    %144 = vector.broadcast %143 : vector<32x1xf32> to vector<32x32xf32>
    %145 = arith.subf %137, %144 : vector<32x32xf32>
    %146 = arith.mulf %145, %145 : vector<32x32xf32>
    %cst_48 = arith.constant dense<0.000000e+00> : vector<32xf32>
    %147 = vector.multi_reduction <add>, %146, %cst_48 [1] : vector<32x32xf32> to vector<32xf32>
    %148 = vector.shape_cast %147 : vector<32xf32> to vector<32x1xf32>
    %cst_49 = arith.constant 3.200000e+01 : f32
    %149 = vector.broadcast %cst_49 : f32 to vector<32x1xf32>
    %150 = arith.divf %148, %149 : vector<32x1xf32>
    %151 = vector.broadcast %143 : vector<32x1xf32> to vector<32x32xf32>
    %152 = arith.subf %137, %151 : vector<32x32xf32>
    %cst_50 = arith.constant 9.99999974E-6 : f32
    %153 = vector.broadcast %cst_50 : f32 to vector<32x1xf32>
    %154 = arith.addf %150, %153 : vector<32x1xf32>
    %155 = math.rsqrt %154 : vector<32x1xf32>
    %156 = vector.broadcast %155 : vector<32x1xf32> to vector<32x32xf32>
    %157 = arith.mulf %152, %156 : vector<32x32xf32>
    %158 = vector.broadcast %138 : vector<1x32xf32> to vector<32x32xf32>
    %159 = arith.mulf %157, %158 : vector<32x32xf32>
    %160 = vector.broadcast %139 : vector<1x32xf32> to vector<32x32xf32>
    %161 = arith.addf %159, %160 : vector<32x32xf32>
    %162 = arith.truncf %161 : vector<32x32xf32> to vector<32x32xbf16>
    %cst_51 = arith.constant 0.000000e+00 : f32
    %163 = vector.broadcast %cst_51 : f32 to vector<32x32xf32>
    %c0_52 = arith.constant 0 : index
    %c0_53 = arith.constant 0 : index
    %164 = vector.load %arg9[%c0_52, %c0_53] : memref<32x128xbf16, #tpu.memory_space<vmem>>, vector<32x128xbf16>
    %cst_54 = arith.constant dense<0.000000e+00> : vector<32x128xf32>
    %165 = tpu.matmul %162, %164, %cst_54 {dimension_numbers = #tpu.dot_dimension_numbers<[1], [0], [0], [1], [0, 0, 1, 1], [], []>} : vector<32x32xbf16>, vector<32x128xbf16>, vector<32x128xf32> -> vector<32x128xf32>
    %c0_55 = arith.constant 0 : index
    %c0_56 = arith.constant 0 : index
    %166 = vector.load %arg10[%c0_55, %c0_56] : memref<1x128xf32, #tpu.memory_space<vmem>>, vector<1x128xf32>
    %167 = vector.broadcast %166 : vector<1x128xf32> to vector<32x128xf32>
    %168 = arith.addf %165, %167 : vector<32x128xf32>
    %cst_57 = arith.constant 5.000000e-01 : f32
    %169 = vector.broadcast %cst_57 : f32 to vector<32x128xf32>
    %170 = arith.mulf %169, %168 : vector<32x128xf32>
    %cst_58 = arith.constant 0.707106769 : f32
    %171 = vector.broadcast %cst_58 : f32 to vector<32x128xf32>
    %172 = arith.mulf %168, %171 : vector<32x128xf32>
    %cst_59 = arith.constant 0.000000e+00 : f32
    %173 = vector.broadcast %cst_59 : f32 to vector<32x128xf32>
    %174 = arith.cmpf oge, %172, %173 : vector<32x128xf32>
    %cst_60 = arith.constant 1.000000e+00 : f32
    %cst_61 = arith.constant -1.000000e+00 : f32
    %175 = vector.broadcast %cst_60 : f32 to vector<32x128xf32>
    %176 = vector.broadcast %cst_61 : f32 to vector<32x128xf32>
    %177 = arith.select %174, %175, %176 : vector<32x128xi1>, vector<32x128xf32>
    %178 = math.absf %172 : vector<32x128xf32>
    %cst_62 = arith.constant 0.327591091 : f32
    %179 = vector.broadcast %cst_62 : f32 to vector<32x128xf32>
    %180 = arith.mulf %179, %178 : vector<32x128xf32>
    %cst_63 = arith.constant 1.000000e+00 : f32
    %181 = vector.broadcast %cst_63 : f32 to vector<32x128xf32>
    %182 = arith.addf %181, %180 : vector<32x128xf32>
    %cst_64 = arith.constant 1.000000e+00 : f32
    %183 = vector.broadcast %cst_64 : f32 to vector<32x128xf32>
    %184 = arith.divf %183, %182 : vector<32x128xf32>
    %cst_65 = arith.constant 1.06140542 : f32
    %185 = vector.broadcast %cst_65 : f32 to vector<32x128xf32>
    %186 = arith.mulf %185, %184 : vector<32x128xf32>
    %cst_66 = arith.constant -1.45315206 : f32
    %187 = vector.broadcast %cst_66 : f32 to vector<32x128xf32>
    %188 = arith.addf %186, %187 : vector<32x128xf32>
    %189 = arith.mulf %188, %184 : vector<32x128xf32>
    %cst_67 = arith.constant 1.42141378 : f32
    %190 = vector.broadcast %cst_67 : f32 to vector<32x128xf32>
    %191 = arith.addf %189, %190 : vector<32x128xf32>
    %192 = arith.mulf %191, %184 : vector<32x128xf32>
    %cst_68 = arith.constant -0.284496725 : f32
    %193 = vector.broadcast %cst_68 : f32 to vector<32x128xf32>
    %194 = arith.addf %192, %193 : vector<32x128xf32>
    %195 = arith.mulf %194, %184 : vector<32x128xf32>
    %cst_69 = arith.constant 0.254829586 : f32
    %196 = vector.broadcast %cst_69 : f32 to vector<32x128xf32>
    %197 = arith.addf %195, %196 : vector<32x128xf32>
    %198 = arith.mulf %197, %184 : vector<32x128xf32>
    %cst_70 = arith.constant 0.000000e+00 : f32
    %199 = vector.broadcast %cst_70 : f32 to vector<32x128xf32>
    %200 = arith.subf %199, %178 : vector<32x128xf32>
    %201 = arith.mulf %200, %178 : vector<32x128xf32>
    %202 = math.exp %201 : vector<32x128xf32>
    %203 = arith.mulf %198, %202 : vector<32x128xf32>
    %cst_71 = arith.constant 1.000000e+00 : f32
    %204 = vector.broadcast %cst_71 : f32 to vector<32x128xf32>
    %205 = arith.subf %204, %203 : vector<32x128xf32>
    %206 = arith.mulf %177, %205 : vector<32x128xf32>
    %cst_72 = arith.constant 1.000000e+00 : f32
    %207 = vector.broadcast %cst_72 : f32 to vector<32x128xf32>
    %208 = arith.addf %207, %206 : vector<32x128xf32>
    %209 = arith.mulf %170, %208 : vector<32x128xf32>
    %210 = arith.truncf %209 : vector<32x128xf32> to vector<32x128xbf16>
    %c0_73 = arith.constant 0 : index
    %c0_74 = arith.constant 0 : index
    %211 = vector.load %arg11[%c0_73, %c0_74] : memref<128x32xbf16, #tpu.memory_space<vmem>>, vector<128x32xbf16>
    %cst_75 = arith.constant dense<0.000000e+00> : vector<32x32xf32>
    %212 = tpu.matmul %210, %211, %cst_75 {dimension_numbers = #tpu.dot_dimension_numbers<[1], [0], [0], [1], [0, 0, 1, 1], [], []>} : vector<32x128xbf16>, vector<128x32xbf16>, vector<32x32xf32> -> vector<32x32xf32>
    %213 = arith.addf %163, %212 : vector<32x32xf32>
    %214 = arith.addf %137, %213 : vector<32x32xf32>
    %c0_76 = arith.constant 0 : index
    %c0_77 = arith.constant 0 : index
    %215 = vector.load %arg12[%c0_76, %c0_77] : memref<1x32xf32, #tpu.memory_space<vmem>>, vector<1x32xf32>
    %216 = vector.broadcast %215 : vector<1x32xf32> to vector<32x32xf32>
    %217 = arith.addf %214, %216 : vector<32x32xf32>
    %c0_78 = arith.constant 0 : index
    %c0_79 = arith.constant 0 : index
    %218 = vector.load %arg13[%c0_78, %c0_79] : memref<32x32xf32, #tpu.memory_space<vmem>>, vector<32x32xf32>
    tpu.vector_store %arg13[%c0_78, %c0_79], %217 {strides = array<i32>} : memref<32x32xf32, #tpu.memory_space<vmem>>, vector<32x32xf32>,
    return
  }
  func.func @transform_0(%arg0: i32) -> (i32, i32) {
    %c0_i32 = arith.constant 0 : i32
    %c0_i32_0 = arith.constant 0 : i32
    return %arg0, %c0_i32 : i32, i32
  }
  func.func @transform_1(%arg0: i32) -> (i32, i32) {
    %c0_i32 = arith.constant 0 : i32
    %c0_i32_0 = arith.constant 0 : i32
    %c0_i32_1 = arith.constant 0 : i32
    return %c0_i32, %c0_i32_0 : i32, i32
  }
  func.func @transform_2(%arg0: i32) -> (i32, i32) {
    %c0_i32 = arith.constant 0 : i32
    %c0_i32_0 = arith.constant 0 : i32
    %c0_i32_1 = arith.constant 0 : i32
    return %c0_i32, %c0_i32_0 : i32, i32
  }
  func.func @transform_3(%arg0: i32) -> (i32, i32) {
    %c0_i32 = arith.constant 0 : i32
    %c0_i32_0 = arith.constant 0 : i32
    %c0_i32_1 = arith.constant 0 : i32
    return %c0_i32, %c0_i32_0 : i32, i32
  }
  func.func @transform_4(%arg0: i32) -> (i32, i32) {
    %c0_i32 = arith.constant 0 : i32
    %c0_i32_0 = arith.constant 0 : i32
    %c0_i32_1 = arith.constant 0 : i32
    return %c0_i32, %c0_i32_0 : i32, i32
  }
  func.func @transform_5(%arg0: i32) -> (i32, i32) {
    %c0_i32 = arith.constant 0 : i32
    %c0_i32_0 = arith.constant 0 : i32
    %c0_i32_1 = arith.constant 0 : i32
    return %c0_i32, %c0_i32_0 : i32, i32
  }
  func.func @transform_6(%arg0: i32) -> (i32, i32) {
    %c0_i32 = arith.constant 0 : i32
    %c0_i32_0 = arith.constant 0 : i32
    %c0_i32_1 = arith.constant 0 : i32
    return %c0_i32, %c0_i32_0 : i32, i32
  }
  func.func @transform_7(%arg0: i32) -> (i32, i32) {
    %c0_i32 = arith.constant 0 : i32
    %c0_i32_0 = arith.constant 0 : i32
    %c0_i32_1 = arith.constant 0 : i32
    return %c0_i32, %c0_i32_0 : i32, i32
  }
  func.func @transform_8(%arg0: i32) -> (i32, i32) {
    %c0_i32 = arith.constant 0 : i32
    %c0_i32_0 = arith.constant 0 : i32
    %c0_i32_1 = arith.constant 0 : i32
    return %c0_i32, %c0_i32_0 : i32, i32
  }
  func.func @transform_9(%arg0: i32) -> (i32, i32) {
    %c0_i32 = arith.constant 0 : i32
    %c0_i32_0 = arith.constant 0 : i32
    %c0_i32_1 = arith.constant 0 : i32
    return %c0_i32, %c0_i32_0 : i32, i32
  }
  func.func @transform_10(%arg0: i32) -> (i32, i32) {
    %c0_i32 = arith.constant 0 : i32
    %c0_i32_0 = arith.constant 0 : i32
    %c0_i32_1 = arith.constant 0 : i32
    return %c0_i32, %c0_i32_0 : i32, i32
  }
  func.func @transform_11(%arg0: i32) -> (i32, i32) {
    %c0_i32 = arith.constant 0 : i32
    %c0_i32_0 = arith.constant 0 : i32
    %c0_i32_1 = arith.constant 0 : i32
    return %c0_i32, %c0_i32_0 : i32, i32
  }
  func.func @transform_12(%arg0: i32) -> (i32, i32) {
    %c0_i32 = arith.constant 0 : i32
    %c0_i32_0 = arith.constant 0 : i32
    return %arg0, %c0_i32 : i32, i32
  }
}

module attributes {stable_mosaic.version = 11 : i64} {
  func.func @block_kernel(%arg0: i32, %arg1: memref<32x32xf32, #tpu.memory_space<vmem>>, %arg2: memref<1x32xf32, #tpu.memory_space<vmem>>, %arg3: memref<1x32xf32, #tpu.memory_space<vmem>>, %arg4: memref<32x96xbf16, #tpu.memory_space<vmem>>, %arg5: memref<32x32xbf16, #tpu.memory_space<vmem>>, %arg6: memref<1x32xf32, #tpu.memory_space<vmem>>, %arg7: memref<1x32xf32, #tpu.memory_space<vmem>>, %arg8: memref<1x32xf32, #tpu.memory_space<vmem>>, %arg9: memref<32x128xbf16, #tpu.memory_space<vmem>>, %arg10: memref<1x128xf32, #tpu.memory_space<vmem>>, %arg11: memref<128x32xbf16, #tpu.memory_space<vmem>>, %arg12: memref<1x32xf32, #tpu.memory_space<vmem>>, %arg13: memref<32x32xf32, #tpu.memory_space<vmem>>, %arg14: memref<32x32xbf16, #tpu.memory_space<vmem>>) attributes {dimension_semantics = [#tpu.dimension_semantics<parallel>], iteration_bounds = array<i64: 1>, scalar_prefetch = 0 : i64, scratch_operands = 1 : i64, tpu.core_type = #tpu.core_type<tc>, window_params = [{transform_indices = @transform_0, window_bounds = array<i64: 32, 32>}, {pipeline_mode = #tpu.pipeline_mode<synchronous>, transform_indices = @transform_1, window_bounds = array<i64: 1, 32>}, {pipeline_mode = #tpu.pipeline_mode<synchronous>, transform_indices = @transform_2, window_bounds = array<i64: 1, 32>}, {pipeline_mode = #tpu.pipeline_mode<synchronous>, transform_indices = @transform_3, window_bounds = array<i64: 32, 96>}, {pipeline_mode = #tpu.pipeline_mode<synchronous>, transform_indices = @transform_4, window_bounds = array<i64: 32, 32>}, {pipeline_mode = #tpu.pipeline_mode<synchronous>, transform_indices = @transform_5, window_bounds = array<i64: 1, 32>}, {pipeline_mode = #tpu.pipeline_mode<synchronous>, transform_indices = @transform_6, window_bounds = array<i64: 1, 32>}, {pipeline_mode = #tpu.pipeline_mode<synchronous>, transform_indices = @transform_7, window_bounds = array<i64: 1, 32>}, {pipeline_mode = #tpu.pipeline_mode<synchronous>, transform_indices = @transform_8, window_bounds = array<i64: 32, 128>}, {pipeline_mode = #tpu.pipeline_mode<synchronous>, transform_indices = @transform_9, window_bounds = array<i64: 1, 128>}, {pipeline_mode = #tpu.pipeline_mode<synchronous>, transform_indices = @transform_10, window_bounds = array<i64: 128, 32>}, {pipeline_mode = #tpu.pipeline_mode<synchronous>, transform_indices = @transform_11, window_bounds = array<i64: 1, 32>}, {transform_indices = @transform_12, window_bounds = array<i64: 32, 32>}]} {
    %c0 = arith.constant 0 : index
    %c0_0 = arith.constant 0 : index
    %0 = vector.load %arg1[%c0, %c0_0] : memref<32x32xf32, #tpu.memory_space<vmem>>, vector<32x32xf32>
    %c0_1 = arith.constant 0 : index
    %c0_2 = arith.constant 0 : index
    %1 = vector.load %arg2[%c0_1, %c0_2] : memref<1x32xf32, #tpu.memory_space<vmem>>, vector<1x32xf32>
    %c0_3 = arith.constant 0 : index
    %c0_4 = arith.constant 0 : index
    %2 = vector.load %arg3[%c0_3, %c0_4] : memref<1x32xf32, #tpu.memory_space<vmem>>, vector<1x32xf32>
    %cst = arith.constant dense<0.000000e+00> : vector<32xf32>
    %3 = vector.multi_reduction <add>, %0, %cst [1] : vector<32x32xf32> to vector<32xf32>
    %4 = vector.shape_cast %3 : vector<32xf32> to vector<32x1xf32>
    %cst_5 = arith.constant 3.200000e+01 : f32
    %5 = vector.broadcast %cst_5 : f32 to vector<32x1xf32>
    %6 = arith.divf %4, %5 : vector<32x1xf32>
    %7 = vector.broadcast %6 : vector<32x1xf32> to vector<32x32xf32>
    %8 = arith.subf %0, %7 : vector<32x32xf32>
    %9 = arith.mulf %8, %8 : vector<32x32xf32>
    %cst_6 = arith.constant dense<0.000000e+00> : vector<32xf32>
    %10 = vector.multi_reduction <add>, %9, %cst_6 [1] : vector<32x32xf32> to vector<32xf32>
    %11 = vector.shape_cast %10 : vector<32xf32> to vector<32x1xf32>
    %cst_7 = arith.constant 3.200000e+01 : f32
    %12 = vector.broadcast %cst_7 : f32 to vector<32x1xf32>
    %13 = arith.divf %11, %12 : vector<32x1xf32>
    %14 = vector.broadcast %6 : vector<32x1xf32> to vector<32x32xf32>
    %15 = arith.subf %0, %14 : vector<32x32xf32>
    %cst_8 = arith.constant 9.99999974E-6 : f32
    %16 = vector.broadcast %cst_8 : f32 to vector<32x1xf32>
    %17 = arith.addf %13, %16 : vector<32x1xf32>
    %18 = math.rsqrt %17 : vector<32x1xf32>
    %19 = vector.broadcast %18 : vector<32x1xf32> to vector<32x32xf32>
    %20 = arith.mulf %15, %19 : vector<32x32xf32>
    %21 = vector.broadcast %1 : vector<1x32xf32> to vector<32x32xf32>
    %22 = arith.mulf %20, %21 : vector<32x32xf32>
    %23 = vector.broadcast %2 : vector<1x32xf32> to vector<32x32xf32>
    %24 = arith.addf %22, %23 : vector<32x32xf32>
    %25 = arith.truncf %24 : vector<32x32xf32> to vector<32x32xbf16>
    %c0_9 = arith.constant 0 : index
    %c0_10 = arith.constant 0 : index
    %26 = vector.load %arg4[%c0_9, %c0_10] : memref<32x96xbf16, #tpu.memory_space<vmem>>, vector<32x96xbf16>
    %cst_11 = arith.constant dense<0.000000e+00> : vector<32x96xf32>
    %27 = tpu.matmul %25, %26, %cst_11 {dimension_numbers = #tpu.dot_dimension_numbers<[1], [0], [0], [1], [0, 0, 1, 1], [], []>} : vector<32x32xbf16>, vector<32x96xbf16>, vector<32x96xf32> -> vector<32x96xf32>
    %28 = arith.truncf %27 : vector<32x96xf32> to vector<32x96xbf16>
    %29 = tpu.iota {dimensions = array<i32: 2>} : vector<1x1x8xi32>
    %c7_i32 = arith.constant 7 : i32
    %30 = vector.broadcast %c7_i32 : i32 to vector<1x1x8xi32>
    %31 = arith.cmpi slt, %29, %30 : vector<1x1x8xi32>
    %cst_12 = arith.constant 0.000000e+00 : f32
    %cst_13 = arith.constant -1.000000e+30 : f32
    %32 = vector.broadcast %cst_12 : f32 to vector<1x1x8xf32>
    %33 = vector.broadcast %cst_13 : f32 to vector<1x1x8xf32>
    %34 = arith.select %31, %32, %33 : vector<1x1x8xi1>, vector<1x1x8xf32>
    %35 = vector.extract_strided_slice %28 {offsets = [0, 0], sizes = [32, 8], strides = [1, 1]} : vector<32x96xbf16> to vector<32x8xbf16>
    %36 = vector.shape_cast %35 : vector<32x8xbf16> to vector<4x8x8xbf16>
    %37 = vector.extract_strided_slice %28 {offsets = [0, 32], sizes = [32, 8], strides = [1, 1]} : vector<32x96xbf16> to vector<32x8xbf16>
    %38 = vector.shape_cast %37 : vector<32x8xbf16> to vector<4x8x8xbf16>
    %39 = vector.extract_strided_slice %28 {offsets = [0, 64], sizes = [32, 8], strides = [1, 1]} : vector<32x96xbf16> to vector<32x8xbf16>
    %40 = vector.shape_cast %39 : vector<32x8xbf16> to vector<4x8x8xbf16>
    "tpu.trace_start"() <{level = 10 : i32, message = "bqd,bkd->bqk"}> : () -> ()
    %cst_14 = arith.constant dense<0.000000e+00> : vector<4x8x8xf32>
    %41 = tpu.matmul %36, %38, %cst_14 {dimension_numbers = #tpu.dot_dimension_numbers<[2], [2], [1], [1], [0, 0, 0, 1, 1, 1], [0], [0]>} : vector<4x8x8xbf16>, vector<4x8x8xbf16>, vector<4x8x8xf32> -> vector<4x8x8xf32>
    "tpu.trace_stop"() : () -> ()
    %42 = vector.broadcast %34 : vector<1x1x8xf32> to vector<4x8x8xf32>
    %43 = arith.addf %41, %42 : vector<4x8x8xf32>
    %cst_15 = arith.constant dense<0xFF800000> : vector<4x8xf32>
    %44 = vector.multi_reduction <maximumf>, %43, %cst_15 [2] : vector<4x8x8xf32> to vector<4x8xf32>
    %45 = vector.shape_cast %44 : vector<4x8xf32> to vector<4x8x1xf32>
    %46 = vector.broadcast %45 : vector<4x8x1xf32> to vector<4x8x8xf32>
    %47 = arith.subf %43, %46 : vector<4x8x8xf32>
    %48 = math.exp %47 : vector<4x8x8xf32>
    %cst_16 = arith.constant dense<0.000000e+00> : vector<4x8xf32>
    %49 = vector.multi_reduction <add>, %48, %cst_16 [2] : vector<4x8x8xf32> to vector<4x8xf32>
    %50 = vector.shape_cast %49 : vector<4x8xf32> to vector<4x8x1xf32>
    %51 = tpu.reciprocal %50 {approx = true} : vector<4x8x1xf32> -> vector<4x8x1xf32>
    %52 = vector.broadcast %51 : vector<4x8x1xf32> to vector<4x8x8xf32>
    %53 = arith.mulf %48, %52 : vector<4x8x8xf32>
    %54 = arith.truncf %53 : vector<4x8x8xf32> to vector<4x8x8xbf16>
    "tpu.trace_start"() <{level = 10 : i32, message = "bqk,bkd->bqd"}> : () -> ()
    %cst_17 = arith.constant dense<0.000000e+00> : vector<4x8x8xf32>
    %55 = tpu.matmul %54, %40, %cst_17 {dimension_numbers = #tpu.dot_dimension_numbers<[2], [1], [1], [2], [0, 0, 0, 1, 1, 2], [0], [0]>} : vector<4x8x8xbf16>, vector<4x8x8xbf16>, vector<4x8x8xf32> -> vector<4x8x8xf32>
    "tpu.trace_stop"() : () -> ()
    %56 = vector.shape_cast %55 : vector<4x8x8xf32> to vector<32x8xf32>
    %57 = arith.truncf %56 : vector<32x8xf32> to vector<32x8xbf16>
    %c0_18 = arith.constant 0 : index
    %c0_19 = arith.constant 0 : index
    %58 = vector.load %arg14[%c0_18, %c0_19] : memref<32x32xbf16, #tpu.memory_space<vmem>>, vector<32x8xbf16>
    tpu.vector_store %arg14[%c0_18, %c0_19], %57 {strides = array<i32>} : memref<32x32xbf16, #tpu.memory_space<vmem>>, vector<32x8xbf16>,
    %59 = vector.extract_strided_slice %28 {offsets = [0, 8], sizes = [32, 8], strides = [1, 1]} : vector<32x96xbf16> to vector<32x8xbf16>
    %60 = vector.shape_cast %59 : vector<32x8xbf16> to vector<4x8x8xbf16>
    %61 = vector.extract_strided_slice %28 {offsets = [0, 40], sizes = [32, 8], strides = [1, 1]} : vector<32x96xbf16> to vector<32x8xbf16>
    %62 = vector.shape_cast %61 : vector<32x8xbf16> to vector<4x8x8xbf16>
    %63 = vector.extract_strided_slice %28 {offsets = [0, 72], sizes = [32, 8], strides = [1, 1]} : vector<32x96xbf16> to vector<32x8xbf16>
    %64 = vector.shape_cast %63 : vector<32x8xbf16> to vector<4x8x8xbf16>
    "tpu.trace_start"() <{level = 10 : i32, message = "bqd,bkd->bqk"}> : () -> ()
    %cst_20 = arith.constant dense<0.000000e+00> : vector<4x8x8xf32>
    %65 = tpu.matmul %60, %62, %cst_20 {dimension_numbers = #tpu.dot_dimension_numbers<[2], [2], [1], [1], [0, 0, 0, 1, 1, 1], [0], [0]>} : vector<4x8x8xbf16>, vector<4x8x8xbf16>, vector<4x8x8xf32> -> vector<4x8x8xf32>
    "tpu.trace_stop"() : () -> ()
    %66 = vector.broadcast %34 : vector<1x1x8xf32> to vector<4x8x8xf32>
    %67 = arith.addf %65, %66 : vector<4x8x8xf32>
    %cst_21 = arith.constant dense<0xFF800000> : vector<4x8xf32>
    %68 = vector.multi_reduction <maximumf>, %67, %cst_21 [2] : vector<4x8x8xf32> to vector<4x8xf32>
    %69 = vector.shape_cast %68 : vector<4x8xf32> to vector<4x8x1xf32>
    %70 = vector.broadcast %69 : vector<4x8x1xf32> to vector<4x8x8xf32>
    %71 = arith.subf %67, %70 : vector<4x8x8xf32>
    %72 = math.exp %71 : vector<4x8x8xf32>
    %cst_22 = arith.constant dense<0.000000e+00> : vector<4x8xf32>
    %73 = vector.multi_reduction <add>, %72, %cst_22 [2] : vector<4x8x8xf32> to vector<4x8xf32>
    %74 = vector.shape_cast %73 : vector<4x8xf32> to vector<4x8x1xf32>
    %75 = tpu.reciprocal %74 {approx = true} : vector<4x8x1xf32> -> vector<4x8x1xf32>
    %76 = vector.broadcast %75 : vector<4x8x1xf32> to vector<4x8x8xf32>
    %77 = arith.mulf %72, %76 : vector<4x8x8xf32>
    %78 = arith.truncf %77 : vector<4x8x8xf32> to vector<4x8x8xbf16>
    "tpu.trace_start"() <{level = 10 : i32, message = "bqk,bkd->bqd"}> : () -> ()
    %cst_23 = arith.constant dense<0.000000e+00> : vector<4x8x8xf32>
    %79 = tpu.matmul %78, %64, %cst_23 {dimension_numbers = #tpu.dot_dimension_numbers<[2], [1], [1], [2], [0, 0, 0, 1, 1, 2], [0], [0]>} : vector<4x8x8xbf16>, vector<4x8x8xbf16>, vector<4x8x8xf32> -> vector<4x8x8xf32>
    "tpu.trace_stop"() : () -> ()
    %80 = vector.shape_cast %79 : vector<4x8x8xf32> to vector<32x8xf32>
    %81 = arith.truncf %80 : vector<32x8xf32> to vector<32x8xbf16>
    %c0_24 = arith.constant 0 : index
    %c8 = arith.constant 8 : index
    %82 = vector.load %arg14[%c0_24, %c8] : memref<32x32xbf16, #tpu.memory_space<vmem>>, vector<32x8xbf16>
    tpu.vector_store %arg14[%c0_24, %c8], %81 {strides = array<i32>} : memref<32x32xbf16, #tpu.memory_space<vmem>>, vector<32x8xbf16>,
    %83 = vector.extract_strided_slice %28 {offsets = [0, 16], sizes = [32, 8], strides = [1, 1]} : vector<32x96xbf16> to vector<32x8xbf16>
    %84 = vector.shape_cast %83 : vector<32x8xbf16> to vector<4x8x8xbf16>
    %85 = vector.extract_strided_slice %28 {offsets = [0, 48], sizes = [32, 8], strides = [1, 1]} : vector<32x96xbf16> to vector<32x8xbf16>
    %86 = vector.shape_cast %85 : vector<32x8xbf16> to vector<4x8x8xbf16>
    %87 = vector.extract_strided_slice %28 {offsets = [0, 80], sizes = [32, 8], strides = [1, 1]} : vector<32x96xbf16> to vector<32x8xbf16>
    %88 = vector.shape_cast %87 : vector<32x8xbf16> to vector<4x8x8xbf16>
    "tpu.trace_start"() <{level = 10 : i32, message = "bqd,bkd->bqk"}> : () -> ()
    %cst_25 = arith.constant dense<0.000000e+00> : vector<4x8x8xf32>
    %89 = tpu.matmul %84, %86, %cst_25 {dimension_numbers = #tpu.dot_dimension_numbers<[2], [2], [1], [1], [0, 0, 0, 1, 1, 1], [0], [0]>} : vector<4x8x8xbf16>, vector<4x8x8xbf16>, vector<4x8x8xf32> -> vector<4x8x8xf32>
    "tpu.trace_stop"() : () -> ()
    %90 = vector.broadcast %34 : vector<1x1x8xf32> to vector<4x8x8xf32>
    %91 = arith.addf %89, %90 : vector<4x8x8xf32>
    %cst_26 = arith.constant dense<0xFF800000> : vector<4x8xf32>
    %92 = vector.multi_reduction <maximumf>, %91, %cst_26 [2] : vector<4x8x8xf32> to vector<4x8xf32>
    %93 = vector.shape_cast %92 : vector<4x8xf32> to vector<4x8x1xf32>
    %94 = vector.broadcast %93 : vector<4x8x1xf32> to vector<4x8x8xf32>
    %95 = arith.subf %91, %94 : vector<4x8x8xf32>
    %96 = math.exp %95 : vector<4x8x8xf32>
    %cst_27 = arith.constant dense<0.000000e+00> : vector<4x8xf32>
    %97 = vector.multi_reduction <add>, %96, %cst_27 [2] : vector<4x8x8xf32> to vector<4x8xf32>
    %98 = vector.shape_cast %97 : vector<4x8xf32> to vector<4x8x1xf32>
    %99 = tpu.reciprocal %98 {approx = true} : vector<4x8x1xf32> -> vector<4x8x1xf32>
    %100 = vector.broadcast %99 : vector<4x8x1xf32> to vector<4x8x8xf32>
    %101 = arith.mulf %96, %100 : vector<4x8x8xf32>
    %102 = arith.truncf %101 : vector<4x8x8xf32> to vector<4x8x8xbf16>
    "tpu.trace_start"() <{level = 10 : i32, message = "bqk,bkd->bqd"}> : () -> ()
    %cst_28 = arith.constant dense<0.000000e+00> : vector<4x8x8xf32>
    %103 = tpu.matmul %102, %88, %cst_28 {dimension_numbers = #tpu.dot_dimension_numbers<[2], [1], [1], [2], [0, 0, 0, 1, 1, 2], [0], [0]>} : vector<4x8x8xbf16>, vector<4x8x8xbf16>, vector<4x8x8xf32> -> vector<4x8x8xf32>
    "tpu.trace_stop"() : () -> ()
    %104 = vector.shape_cast %103 : vector<4x8x8xf32> to vector<32x8xf32>
    %105 = arith.truncf %104 : vector<32x8xf32> to vector<32x8xbf16>
    %c0_29 = arith.constant 0 : index
    %c16 = arith.constant 16 : index
    %106 = vector.load %arg14[%c0_29, %c16] : memref<32x32xbf16, #tpu.memory_space<vmem>>, vector<32x8xbf16>
    tpu.vector_store %arg14[%c0_29, %c16], %105 {strides = array<i32>} : memref<32x32xbf16, #tpu.memory_space<vmem>>, vector<32x8xbf16>,
    %107 = vector.extract_strided_slice %28 {offsets = [0, 24], sizes = [32, 8], strides = [1, 1]} : vector<32x96xbf16> to vector<32x8xbf16>
    %108 = vector.shape_cast %107 : vector<32x8xbf16> to vector<4x8x8xbf16>
    %109 = vector.extract_strided_slice %28 {offsets = [0, 56], sizes = [32, 8], strides = [1, 1]} : vector<32x96xbf16> to vector<32x8xbf16>
    %110 = vector.shape_cast %109 : vector<32x8xbf16> to vector<4x8x8xbf16>
    %111 = vector.extract_strided_slice %28 {offsets = [0, 88], sizes = [32, 8], strides = [1, 1]} : vector<32x96xbf16> to vector<32x8xbf16>
    %112 = vector.shape_cast %111 : vector<32x8xbf16> to vector<4x8x8xbf16>
    "tpu.trace_start"() <{level = 10 : i32, message = "bqd,bkd->bqk"}> : () -> ()
    %cst_30 = arith.constant dense<0.000000e+00> : vector<4x8x8xf32>
    %113 = tpu.matmul %108, %110, %cst_30 {dimension_numbers = #tpu.dot_dimension_numbers<[2], [2], [1], [1], [0, 0, 0, 1, 1, 1], [0], [0]>} : vector<4x8x8xbf16>, vector<4x8x8xbf16>, vector<4x8x8xf32> -> vector<4x8x8xf32>
    "tpu.trace_stop"() : () -> ()
    %114 = vector.broadcast %34 : vector<1x1x8xf32> to vector<4x8x8xf32>
    %115 = arith.addf %113, %114 : vector<4x8x8xf32>
    %cst_31 = arith.constant dense<0xFF800000> : vector<4x8xf32>
    %116 = vector.multi_reduction <maximumf>, %115, %cst_31 [2] : vector<4x8x8xf32> to vector<4x8xf32>
    %117 = vector.shape_cast %116 : vector<4x8xf32> to vector<4x8x1xf32>
    %118 = vector.broadcast %117 : vector<4x8x1xf32> to vector<4x8x8xf32>
    %119 = arith.subf %115, %118 : vector<4x8x8xf32>
    %120 = math.exp %119 : vector<4x8x8xf32>
    %cst_32 = arith.constant dense<0.000000e+00> : vector<4x8xf32>
    %121 = vector.multi_reduction <add>, %120, %cst_32 [2] : vector<4x8x8xf32> to vector<4x8xf32>
    %122 = vector.shape_cast %121 : vector<4x8xf32> to vector<4x8x1xf32>
    %123 = tpu.reciprocal %122 {approx = true} : vector<4x8x1xf32> -> vector<4x8x1xf32>
    %124 = vector.broadcast %123 : vector<4x8x1xf32> to vector<4x8x8xf32>
    %125 = arith.mulf %120, %124 : vector<4x8x8xf32>
    %126 = arith.truncf %125 : vector<4x8x8xf32> to vector<4x8x8xbf16>
    "tpu.trace_start"() <{level = 10 : i32, message = "bqk,bkd->bqd"}> : () -> ()
    %cst_33 = arith.constant dense<0.000000e+00> : vector<4x8x8xf32>
    %127 = tpu.matmul %126, %112, %cst_33 {dimension_numbers = #tpu.dot_dimension_numbers<[2], [1], [1], [2], [0, 0, 0, 1, 1, 2], [0], [0]>} : vector<4x8x8xbf16>, vector<4x8x8xbf16>, vector<4x8x8xf32> -> vector<4x8x8xf32>
    "tpu.trace_stop"() : () -> ()
    %128 = vector.shape_cast %127 : vector<4x8x8xf32> to vector<32x8xf32>
    %129 = arith.truncf %128 : vector<32x8xf32> to vector<32x8xbf16>
    %c0_34 = arith.constant 0 : index
    %c24 = arith.constant 24 : index
    %130 = vector.load %arg14[%c0_34, %c24] : memref<32x32xbf16, #tpu.memory_space<vmem>>, vector<32x8xbf16>
    tpu.vector_store %arg14[%c0_34, %c24], %129 {strides = array<i32>} : memref<32x32xbf16, #tpu.memory_space<vmem>>, vector<32x8xbf16>,
    %c0_35 = arith.constant 0 : index
    %c0_36 = arith.constant 0 : index
    %131 = vector.load %arg14[%c0_35, %c0_36] : memref<32x32xbf16, #tpu.memory_space<vmem>>, vector<32x32xbf16>
    %c0_37 = arith.constant 0 : index
    %c0_38 = arith.constant 0 : index
    %132 = vector.load %arg5[%c0_37, %c0_38] : memref<32x32xbf16, #tpu.memory_space<vmem>>, vector<32x32xbf16>
    %cst_39 = arith.constant dense<0.000000e+00> : vector<32x32xf32>
    %133 = tpu.matmul %131, %132, %cst_39 {dimension_numbers = #tpu.dot_dimension_numbers<[1], [0], [0], [1], [0, 0, 1, 1], [], []>} : vector<32x32xbf16>, vector<32x32xbf16>, vector<32x32xf32> -> vector<32x32xf32>
    %134 = arith.addf %0, %133 : vector<32x32xf32>
    %c0_40 = arith.constant 0 : index
    %c0_41 = arith.constant 0 : index
    %135 = vector.load %arg6[%c0_40, %c0_41] : memref<1x32xf32, #tpu.memory_space<vmem>>, vector<1x32xf32>
    %136 = vector.broadcast %135 : vector<1x32xf32> to vector<32x32xf32>
    %137 = arith.addf %134, %136 : vector<32x32xf32>
    %c0_42 = arith.constant 0 : index
    %c0_43 = arith.constant 0 : index
    %138 = vector.load %arg7[%c0_42, %c0_43] : memref<1x32xf32, #tpu.memory_space<vmem>>, vector<1x32xf32>
    %c0_44 = arith.constant 0 : index
    %c0_45 = arith.constant 0 : index
    %139 = vector.load %arg8[%c0_44, %c0_45] : memref<1x32xf32, #tpu.memory_space<vmem>>, vector<1x32xf32>
    %cst_46 = arith.constant dense<0.000000e+00> : vector<32xf32>
    %140 = vector.multi_reduction <add>, %137, %cst_46 [1] : vector<32x32xf32> to vector<32xf32>
    %141 = vector.shape_cast %140 : vector<32xf32> to vector<32x1xf32>
    %cst_47 = arith.constant 3.200000e+01 : f32
    %142 = vector.broadcast %cst_47 : f32 to vector<32x1xf32>
    %143 = arith.divf %141, %142 : vector<32x1xf32>
    %144 = vector.broadcast %143 : vector<32x1xf32> to vector<32x32xf32>
    %145 = arith.subf %137, %144 : vector<32x32xf32>
    %146 = arith.mulf %145, %145 : vector<32x32xf32>
    %cst_48 = arith.constant dense<0.000000e+00> : vector<32xf32>
    %147 = vector.multi_reduction <add>, %146, %cst_48 [1] : vector<32x32xf32> to vector<32xf32>
    %148 = vector.shape_cast %147 : vector<32xf32> to vector<32x1xf32>
    %cst_49 = arith.constant 3.200000e+01 : f32
    %149 = vector.broadcast %cst_49 : f32 to vector<32x1xf32>
    %150 = arith.divf %148, %149 : vector<32x1xf32>
    %151 = vector.broadcast %143 : vector<32x1xf32> to vector<32x32xf32>
    %152 = arith.subf %137, %151 : vector<32x32xf32>
    %cst_50 = arith.constant 9.99999974E-6 : f32
    %153 = vector.broadcast %cst_50 : f32 to vector<32x1xf32>
    %154 = arith.addf %150, %153 : vector<32x1xf32>
    %155 = math.rsqrt %154 : vector<32x1xf32>
    %156 = vector.broadcast %155 : vector<32x1xf32> to vector<32x32xf32>
    %157 = arith.mulf %152, %156 : vector<32x32xf32>
    %158 = vector.broadcast %138 : vector<1x32xf32> to vector<32x32xf32>
    %159 = arith.mulf %157, %158 : vector<32x32xf32>
    %160 = vector.broadcast %139 : vector<1x32xf32> to vector<32x32xf32>
    %161 = arith.addf %159, %160 : vector<32x32xf32>
    %162 = arith.truncf %161 : vector<32x32xf32> to vector<32x32xbf16>
    %cst_51 = arith.constant 0.000000e+00 : f32
    %163 = vector.broadcast %cst_51 : f32 to vector<32x32xf32>
    %c0_52 = arith.constant 0 : index
    %c0_53 = arith.constant 0 : index
    %164 = vector.load %arg9[%c0_52, %c0_53] : memref<32x128xbf16, #tpu.memory_space<vmem>>, vector<32x128xbf16>
    %cst_54 = arith.constant dense<0.000000e+00> : vector<32x128xf32>
    %165 = tpu.matmul %162, %164, %cst_54 {dimension_numbers = #tpu.dot_dimension_numbers<[1], [0], [0], [1], [0, 0, 1, 1], [], []>} : vector<32x32xbf16>, vector<32x128xbf16>, vector<32x128xf32> -> vector<32x128xf32>
    %c0_55 = arith.constant 0 : index
    %c0_56 = arith.constant 0 : index
    %166 = vector.load %arg10[%c0_55, %c0_56] : memref<1x128xf32, #tpu.memory_space<vmem>>, vector<1x128xf32>
    %167 = vector.broadcast %166 : vector<1x128xf32> to vector<32x128xf32>
    %168 = arith.addf %165, %167 : vector<32x128xf32>
    %cst_57 = arith.constant 5.000000e-01 : f32
    %169 = vector.broadcast %cst_57 : f32 to vector<32x128xf32>
    %170 = arith.mulf %169, %168 : vector<32x128xf32>
    %cst_58 = arith.constant 0.707106769 : f32
    %171 = vector.broadcast %cst_58 : f32 to vector<32x128xf32>
    %172 = arith.mulf %168, %171 : vector<32x128xf32>
    %cst_59 = arith.constant 0.000000e+00 : f32
    %173 = vector.broadcast %cst_59 : f32 to vector<32x128xf32>
    %174 = arith.cmpf oge, %172, %173 : vector<32x128xf32>
    %cst_60 = arith.constant 1.000000e+00 : f32
    %cst_61 = arith.constant -1.000000e+00 : f32
    %175 = vector.broadcast %cst_60 : f32 to vector<32x128xf32>
    %176 = vector.broadcast %cst_61 : f32 to vector<32x128xf32>
    %177 = arith.select %174, %175, %176 : vector<32x128xi1>, vector<32x128xf32>
    %178 = math.absf %172 : vector<32x128xf32>
    %cst_62 = arith.constant 0.327591091 : f32
    %179 = vector.broadcast %cst_62 : f32 to vector<32x128xf32>
    %180 = arith.mulf %179, %178 : vector<32x128xf32>
    %cst_63 = arith.constant 1.000000e+00 : f32
    %181 = vector.broadcast %cst_63 : f32 to vector<32x128xf32>
    %182 = arith.addf %181, %180 : vector<32x128xf32>
    %cst_64 = arith.constant 1.000000e+00 : f32
    %183 = vector.broadcast %cst_64 : f32 to vector<32x128xf32>
    %184 = arith.divf %183, %182 : vector<32x128xf32>
    %cst_65 = arith.constant 1.06140542 : f32
    %185 = vector.broadcast %cst_65 : f32 to vector<32x128xf32>
    %186 = arith.mulf %185, %184 : vector<32x128xf32>
    %cst_66 = arith.constant -1.45315206 : f32
    %187 = vector.broadcast %cst_66 : f32 to vector<32x128xf32>
    %188 = arith.addf %186, %187 : vector<32x128xf32>
    %189 = arith.mulf %188, %184 : vector<32x128xf32>
    %cst_67 = arith.constant 1.42141378 : f32
    %190 = vector.broadcast %cst_67 : f32 to vector<32x128xf32>
    %191 = arith.addf %189, %190 : vector<32x128xf32>
    %192 = arith.mulf %191, %184 : vector<32x128xf32>
    %cst_68 = arith.constant -0.284496725 : f32
    %193 = vector.broadcast %cst_68 : f32 to vector<32x128xf32>
    %194 = arith.addf %192, %193 : vector<32x128xf32>
    %195 = arith.mulf %194, %184 : vector<32x128xf32>
    %cst_69 = arith.constant 0.254829586 : f32
    %196 = vector.broadcast %cst_69 : f32 to vector<32x128xf32>
    %197 = arith.addf %195, %196 : vector<32x128xf32>
    %198 = arith.mulf %197, %184 : vector<32x128xf32>
    %cst_70 = arith.constant 0.000000e+00 : f32
    %199 = vector.broadcast %cst_70 : f32 to vector<32x128xf32>
    %200 = arith.subf %199, %178 : vector<32x128xf32>
    %201 = arith.mulf %200, %178 : vector<32x128xf32>
    %202 = math.exp %201 : vector<32x128xf32>
    %203 = arith.mulf %198, %202 : vector<32x128xf32>
    %cst_71 = arith.constant 1.000000e+00 : f32
    %204 = vector.broadcast %cst_71 : f32 to vector<32x128xf32>
    %205 = arith.subf %204, %203 : vector<32x128xf32>
    %206 = arith.mulf %177, %205 : vector<32x128xf32>
    %cst_72 = arith.constant 1.000000e+00 : f32
    %207 = vector.broadcast %cst_72 : f32 to vector<32x128xf32>
    %208 = arith.addf %207, %206 : vector<32x128xf32>
    %209 = arith.mulf %170, %208 : vector<32x128xf32>
    %210 = arith.truncf %209 : vector<32x128xf32> to vector<32x128xbf16>
    %c0_73 = arith.constant 0 : index
    %c0_74 = arith.constant 0 : index
    %211 = vector.load %arg11[%c0_73, %c0_74] : memref<128x32xbf16, #tpu.memory_space<vmem>>, vector<128x32xbf16>
    %cst_75 = arith.constant dense<0.000000e+00> : vector<32x32xf32>
    %212 = tpu.matmul %210, %211, %cst_75 {dimension_numbers = #tpu.dot_dimension_numbers<[1], [0], [0], [1], [0, 0, 1, 1], [], []>} : vector<32x128xbf16>, vector<128x32xbf16>, vector<32x32xf32> -> vector<32x32xf32>
    %213 = arith.addf %163, %212 : vector<32x32xf32>
    %214 = arith.addf %137, %213 : vector<32x32xf32>
    %c0_76 = arith.constant 0 : index
    %c0_77 = arith.constant 0 : index
    %215 = vector.load %arg12[%c0_76, %c0_77] : memref<1x32xf32, #tpu.memory_space<vmem>>, vector<1x32xf32>
    %216 = vector.broadcast %215 : vector<1x32xf32> to vector<32x32xf32>
    %217 = arith.addf %214, %216 : vector<32x32xf32>
    %c0_78 = arith.constant 0 : index
    %c0_79 = arith.constant 0 : index
    %218 = vector.load %arg13[%c0_78, %c0_79] : memref<32x32xf32, #tpu.memory_space<vmem>>, vector<32x32xf32>
    tpu.vector_store %arg13[%c0_78, %c0_79], %217 {strides = array<i32>} : memref<32x32xf32, #tpu.memory_space<vmem>>, vector<32x32xf32>,
    return
  }
  func.func @transform_0(%arg0: i32) -> (i32, i32) {
    %c0_i32 = arith.constant 0 : i32
    %c0_i32_0 = arith.constant 0 : i32
    return %arg0, %c0_i32 : i32, i32
  }
  func.func @transform_1(%arg0: i32) -> (i32, i32) {
    %c0_i32 = arith.constant 0 : i32
    %c0_i32_0 = arith.constant 0 : i32
    %c0_i32_1 = arith.constant 0 : i32
    return %c0_i32, %c0_i32_0 : i32, i32
  }
  func.func @transform_2(%arg0: i32) -> (i32, i32) {
    %c0_i32 = arith.constant 0 : i32
    %c0_i32_0 = arith.constant 0 : i32
    %c0_i32_1 = arith.constant 0 : i32
    return %c0_i32, %c0_i32_0 : i32, i32
  }
  func.func @transform_3(%arg0: i32) -> (i32, i32) {
    %c0_i32 = arith.constant 0 : i32
    %c0_i32_0 = arith.constant 0 : i32
    %c0_i32_1 = arith.constant 0 : i32
    return %c0_i32, %c0_i32_0 : i32, i32
  }
  func.func @transform_4(%arg0: i32) -> (i32, i32) {
    %c0_i32 = arith.constant 0 : i32
    %c0_i32_0 = arith.constant 0 : i32
    %c0_i32_1 = arith.constant 0 : i32
    return %c0_i32, %c0_i32_0 : i32, i32
  }
  func.func @transform_5(%arg0: i32) -> (i32, i32) {
    %c0_i32 = arith.constant 0 : i32
    %c0_i32_0 = arith.constant 0 : i32
    %c0_i32_1 = arith.constant 0 : i32
    return %c0_i32, %c0_i32_0 : i32, i32
  }
  func.func @transform_6(%arg0: i32) -> (i32, i32) {
    %c0_i32 = arith.constant 0 : i32
    %c0_i32_0 = arith.constant 0 : i32
    %c0_i32_1 = arith.constant 0 : i32
    return %c0_i32, %c0_i32_0 : i32, i32
  }
  func.func @transform_7(%arg0: i32) -> (i32, i32) {
    %c0_i32 = arith.constant 0 : i32
    %c0_i32_0 = arith.constant 0 : i32
    %c0_i32_1 = arith.constant 0 : i32
    return %c0_i32, %c0_i32_0 : i32, i32
  }
  func.func @transform_8(%arg0: i32) -> (i32, i32) {
    %c0_i32 = arith.constant 0 : i32
    %c0_i32_0 = arith.constant 0 : i32
    %c0_i32_1 = arith.constant 0 : i32
    return %c0_i32, %c0_i32_0 : i32, i32
  }
  func.func @transform_9(%arg0: i32) -> (i32, i32) {
    %c0_i32 = arith.constant 0 : i32
    %c0_i32_0 = arith.constant 0 : i32
    %c0_i32_1 = arith.constant 0 : i32
    return %c0_i32, %c0_i32_0 : i32, i32
  }
  func.func @transform_10(%arg0: i32) -> (i32, i32) {
    %c0_i32 = arith.constant 0 : i32
    %c0_i32_0 = arith.constant 0 : i32
    %c0_i32_1 = arith.constant 0 : i32
    return %c0_i32, %c0_i32_0 : i32, i32
  }
  func.func @transform_11(%arg0: i32) -> (i32, i32) {
    %c0_i32 = arith.constant 0 : i32
    %c0_i32_0 = arith.constant 0 : i32
    %c0_i32_1 = arith.constant 0 : i32
    return %c0_i32, %c0_i32_0 : i32, i32
  }
  func.func @transform_12(%arg0: i32) -> (i32, i32) {
    %c0_i32 = arith.constant 0 : i32
    %c0_i32_0 = arith.constant 0 : i32
    return %arg0, %c0_i32 : i32, i32
  }
}

</mosaic_0001>

<bundles_post_ra>
// kernel: tpu_custom_call.1
= control target key start
LH: loop header
LB: loop body
LE: loop exit
PB: predicated region body
PF: predicated region fallthrough
CT: control target
= control target key end

     0   :  { %vm49_vm0 = vcmask 261120   ;;  %s3627_s0 = inlined_call_operand.vmem [shape: f32[32,32], index: 0, kind: input, shape index: {}]   ;;  %s3628_s1 = inlined_call_operand.vmem [shape: f32[1,32], index: 1, kind: input, shape index: {}]   ;;  %s3629_s2 = inlined_call_operand.vmem [shape: f32[1,32], index: 2, kind: input, shape index: {}]   ;;  %s3630_s3 = inlined_call_operand.vmem [shape: bf16[32,96], index: 3, kind: input, shape index: {}]   ;;  %s3631_s4 = inlined_call_operand.vmem [shape: bf16[32,32], index: 4, kind: input, shape index: {}]   ;;  %s3632_s5 = inlined_call_operand.vmem [shape: f32[1,32], index: 5, kind: input, shape index: {}]   ;;  %s3633_s6 = inlined_call_operand.vmem [shape: f32[1,32], index: 6, kind: input, shape index: {}]   ;;  %s3634_s7 = inlined_call_operand.vmem [shape: f32[1,32], index: 7, kind: input, shape index: {}]   ;;  %s3635_s8 = inlined_call_operand.vmem [shape: bf16[32,128], index: 8, kind: input, shape index: {}]   ;;  %s3636_s9 = inlined_call_operand.vmem [shape: f32[1,128], index: 9, kind: input, shape index: {}]   ;;  %s3637_s10 = inlined_call_operand.vmem [shape: bf16[128,32], index: 10, kind: input, shape index: {}]   ;;  %s3638_s11 = inlined_call_operand.vmem [shape: f32[1,32], index: 11, kind: input, shape index: {}]   ;;  %s3639_s12 = inlined_call_operand.hbm [shape: f32[32,32], index: 12, kind: output, shape index: {}]  }
   0x1   :  { %v43_v0 = vld [vmem:[%s3627_s0] sm:$0xff]  ;;  %v45_v1 = vld [vmem:[%s3627_s0 + $0x10] sm:$0xff]  ;;  %v44_v2 = vld [vmem:[%s3627_s0 + $0x8] sm:$0xff] }
   0x2   :  { %v50_v3 = vsel %vm49_vm0, %v43_v0, 0.0  ;;  %v56_v4 = vsel %vm49_vm0, %v45_v1, 0.0  ;;  %v46_v5 = vld [vmem:[%s3627_s0 + $0x18] sm:$0xff]  ;;  %v53_v6 = vsel %vm49_vm0, %v44_v2, 0.0 }
   0x3   :  { %51 = vadd.xlane.f32.xlu0 %v50_v3  ;;  %57 = vadd.xlane.f32.xlu1 %v56_v4  ;;  %v59_v7 = vsel %vm49_vm0, %v46_v5, 0.0 }
   0x7   :  { %54 = vadd.xlane.f32.xlu0 %v53_v6  ;;  %60 = vadd.xlane.f32.xlu1 %v59_v7 }
   0x8   :  { %17 = vsyncpa [#allocation4], 0  ;;  %v2918_v28 = vld [vmem:[%s3630_s3] sm:$0xff]   ;;  %v2919_v29 = vld [vmem:[%s3630_s3 + $0x8] sm:$0xff]   ;;  %v3056_v62 = vmov 0.0   ;;  %vm3057_vm1 = vmmov 0  }
   0x9   :  { %2662 = vmatprep.subr.bf16.mxu0 %v2918_v28  ;;  %v2509_v44 = vld [vmem:[%s3628_s1] ss:$0 sm:$0xff]  ;;  %2682 = vmatprep.subr.bf16.mxu1 %v3056_v62  ;;  %s3058_s1 = smov 96   ;;  %vm214_vm2 = vcmask 64512   ;;  %vm458_vm4 = vcmask 1043456   ;;  %s3061_s18 = smov 88  }
   0xa   :  { %2663 = vmatpush3.bf16.msra.mxu0 %v2918_v28  ;;  %v2510_v50 = vld [vmem:[%s3629_s2] ss:$0 sm:$0xff]  ;;  %2684 = vmatprep.mubr.msk.bf16.mxu1 %vm3057_vm1, %v3056_v62  ;;  %s3060_s2 = smov 64   ;;  %s3062_s19 = smov 120   ;;  %vm1100_vm5 = vcmask 130112   ;;  %vm1553_vm6 = vcmask 195712  }
   0xb   :  { %2664 = vmatprep.subr.bf16.mxu0 %v2919_v29  ;;  %s3063_s20 = smov 56   ;;  %s3064_s21 = smov 80   ;;  %vm2006_vm7 = vcmask 261312  }
   0xc   :  { %s3065_s22 = smov 112   ;;  %s3066_s23 = smov 48  }
   0xd   :  { %s3067_s24 = smov 72   ;;  %s3068_s25 = smov 104  }
   0xe   :  { %2665 = vmatpush3.bf16.msra.mxu0 %v2919_v29  ;;  %s3069_s26 = smov 40   ;;  %s3070_s27 = smov 8  }
   0xf   :  { %2670 = vmatprep.subr.bf16.mxu0 %v3056_v62  ;;  %s3071_s28 = smov 16   ;;  %s3072_s29 = smov 24  }
  0x90   :  { %v52_v8 = vpop.xlane.xlu0 %51  ;;  %v58_v9 = vpop.xlane.xlu1 %57 }
  0x91   :  { %v63_v10 = vmul.f32 0.03125, %v52_v8  ;;  %v65_v11 = vmul.f32 0.03125, %v58_v9 }
  0x93   :  { %v67_v12 = vsub.f32 %v43_v0, %v63_v10  ;;  %v69_v13 = vsub.f32 %v45_v1, %v65_v11 }
  0x94   :  { %v55_v14 = vpop.xlane.xlu0 %54  ;;  %v61_v15 = vpop.xlane.xlu1 %60 }
  0x95   :  { %v64_v16 = vmul.f32 0.03125, %v55_v14  ;;  %v66_v17 = vmul.f32 0.03125, %v61_v15  ;;  %v71_v18 = vmul.f32 %v67_v12, %v67_v12  ;;  %v73_v19 = vmul.f32 %v69_v13, %v69_v13 }
  0x96   :  { %v198_v15 = vlaneseq }
  0x97   :  { %v68_v20 = vsub.f32 %v44_v2, %v64_v16  ;;  %v70_v21 = vsub.f32 %v46_v5, %v66_v17  ;;  %v75_v22 = vsel %vm49_vm0, %v71_v18, 0.0  ;;  %v81_v23 = vsel %vm49_vm0, %v73_v19, 0.0 }
  0x98   :  { %76 = vadd.xlane.f32.xlu0 %v75_v22  ;;  %v199_v16 = vand.u32 127, %v198_v15  ;;  %v3059_v17 = vmov -1e+30  }
  0x99   :  { %v72_v24 = vmul.f32 %v68_v20, %v68_v20  ;;  %v74_v25 = vmul.f32 %v70_v21, %v70_v21 }
  0x9a   :  { %vm200_vm3 = vcmp.lt.s32.totalorder %v199_v16, 7 }
  0x9b   :  { %v78_v26 = vsel %vm49_vm0, %v72_v24, 0.0  ;;  %v84_v27 = vsel %vm49_vm0, %v74_v25, 0.0  ;;  %v3217_v18 = vsel %vm200_vm3, 0.0, %v3059_v17 }
  0x9c   :  { %82 = vadd.xlane.f32.xlu0 %v81_v23  ;;  %79 = vadd.xlane.f32.xlu1 %v78_v26 }
  0xa0   :  { %85 = vadd.xlane.f32.xlu1 %v84_v27 }
 0x125   :  { %v77_v30 = vpop.xlane.xlu0 %76 }
 0x126   :  { %v87_v31 = vmul.f32 0.03125, %v77_v30 }
 0x128   :  { %v91_v32 = vadd.f32 1e-05, %v87_v31 }
 0x129   :  { %v80_v33 = vpop.xlane.xlu1 %79  ;;  %v83_v34 = vpop.xlane.xlu0 %82 }
 0x12a   :  { %2932 = vrsqrt.f32 %v91_v32  ;;  %v88_v35 = vmul.f32 0.03125, %v80_v33  ;;  %v89_v36 = vmul.f32 0.03125, %v83_v34 }
 0x12c   :  { %v92_v37 = vadd.f32 1e-05, %v88_v35  ;;  %v93_v38 = vadd.f32 1e-05, %v89_v36 }
 0x12d   :  { %v86_v39 = vpop.xlane.xlu1 %85 }
 0x12e   :  { %2934 = vrsqrt.f32 %v92_v37  ;;  %v90_v40 = vmul.f32 0.03125, %v86_v39 }
 0x12f   :  { %2936 = vrsqrt.f32 %v93_v38 }
 0x130   :  { %v94_v41 = vadd.f32 1e-05, %v90_v40 }
 0x132   :  { %2938 = vrsqrt.f32 %v94_v41 }
 0x134   :  { %v2933_v42 = vpop.eup %2932 }
 0x135   :  { %v99_v43 = vmul.f32 %v2933_v42, %v67_v12 }
 0x137   :  { %v109_v48 = vmul.f32 %v2509_v44, %v99_v43 }
 0x138   :  { %v2935_v45 = vpop.eup %2934 }
 0x139   :  { %v2937_v46 = vpop.eup %2936  ;;  %v100_v47 = vmul.f32 %v2935_v45, %v68_v20  ;;  %v119_v54 = vadd.f32 %v2510_v50, %v109_v48 }
 0x13a   :  { %v101_v49 = vmul.f32 %v2937_v46, %v69_v13 }
 0x13b   :  { %v110_v51 = vmul.f32 %v2509_v44, %v100_v47 }
 0x13c   :  { %v2939_v52 = vpop.eup %2938  ;;  %v111_v56 = vmul.f32 %v2509_v44, %v101_v49 }
 0x13d   :  { %v102_v53 = vmul.f32 %v2939_v52, %v70_v21  ;;  %v120_v55 = vadd.f32 %v2510_v50, %v110_v51 }
 0x13e   :  { %v121_v59 = vadd.f32 %v2510_v50, %v111_v56 }
 0x13f   :  { %v123_v57 = vpack.c.bf16 %v120_v55, %v119_v54  ;;  %v112_v58 = vmul.f32 %v2509_v44, %v102_v53 }
 0x141   :  { %2666 = vmatprep.mubr.msk.bf16.mxu0 %vm49_vm0, %v123_v57  ;;  %v122_v60 = vadd.f32 %v2510_v50, %v112_v58 }
 0x143   :  { %v124_v61 = vpack.c.bf16 %v122_v60, %v121_v59 }
 0x145   :  { %2667 = vmatmul.mubr.msk.bf16.vlgmr.msra.gmra.mrb[0].mxu0 %vm49_vm0, %v124_v61 }
 0x146   :  { %2672 = vmatprep.mubr.msk.bf16.mxu0 %vm3057_vm1, %v3056_v62 }
 0x218   :  { %v2668_v63 = vpop.f32.mrb[0].mxu0 }
 0x219   :  { %v181_v0 = vpop.f32.mrb[1].mxu0  ;;  %v3187_v5 = vpack.c.bf16 %v2668_v63, %v2668_v63 }
 0x21a   :  { %v3181_v1 = vpack.c.bf16 %v181_v0, %v181_v0  ;;  %v2669_v2 = vpop.f32.mrb[2].mxu0 }
 0x21b   :  { %v184_v3 = vpop.f32.mrb[3].mxu0  ;;  %v3190_v6 = vpack.c.bf16 %v2669_v2, %v2669_v2 }
 0x21c   :  { %v3183_v4 = vpack.c.bf16 %v184_v3, %v184_v3  ;;  %212 = vrot.lane.b32.xlu0 %v3181_v1, %s3058_s1 }
 0x21e   :  { %261 = vrot.lane.b32.xlu1 %v3183_v4, %s3058_s1 }
 0x222   :  { %309 = vrot.lane.b32.xlu1 %v3187_v5, %s3058_s1 }
 0x226   :  { %357 = vrot.lane.b32.xlu1 %v3190_v6, %s3058_s1 }
 0x28e   :  { %v213_v7 = vpop.permute.xlu0 %212 }
 0x28f   :  { %v219_v8 = vsel %vm214_vm2, %v213_v7, 0 }
 0x290   :  { %2671 = vmatpush3.bf16.xpose.msra.mxu0 %v219_v8  ;;  %v262_v9 = vpop.permute.xlu1 %261 }
 0x291   :  { %2676 = vmatprep.subr.bf16.mxu0 %v3056_v62  ;;  %v267_v12 = vsel %vm214_vm2, %v262_v9, 0 }
 0x294   :  { %v310_v10 = vpop.permute.xlu1 %309 }
 0x295   :  { %v315_v11 = vsel %vm214_vm2, %v310_v10, 0 }
 0x296   :  { %2683 = vmatpush3.bf16.xpose.msra.mxu1 %v315_v11 }
 0x297   :  { %2673 = vmatmul.mubr.msk.bf16.vlgmr.msra.gmra.mrb[4].mxu0 %vm214_vm2, %v3181_v1  ;;  %2694 = vmatprep.subr.bf16.mxu1 %v3056_v62 }
 0x298   :  { %2677 = vmatpush3.bf16.xpose.msra.mxu0 %v267_v12  ;;  %2678 = vmatprep.mubr.msk.bf16.mxu0 %vm3057_vm1, %v3056_v62  ;;  %v358_v13 = vpop.permute.xlu1 %357 }
 0x299   :  { %2688 = vmatprep.subr.bf16.mxu0 %v3056_v62  ;;  %v363_v14 = vsel %vm214_vm2, %v358_v13, 0 }
 0x29d   :  { %2685 = vmatmul.mubr.msk.bf16.vlgmr.msra.gmra.mrb[0].mxu1 %vm214_vm2, %v3187_v5 }
 0x29e   :  { %2696 = vmatprep.mubr.msk.bf16.mxu1 %vm3057_vm1, %v3056_v62 }
 0x29f   :  { %2679 = vmatmul.mubr.msk.bf16.vlgmr.msra.gmra.mrb[8].mxu0 %vm214_vm2, %v3183_v4 }
 0x2a0   :  { %2689 = vmatpush3.bf16.xpose.msra.mxu0 %v363_v14  ;;  %2690 = vmatprep.mubr.msk.bf16.mxu0 %vm3057_vm1, %v3056_v62 }
 0x2a1   :  { %2700 = vmatprep.subr.bf16.mxu0 %v3056_v62 }
 0x2a7   :  { %2691 = vmatmul.mubr.msk.bf16.vlgmr.msra.gmra.mrb[12].mxu0 %vm214_vm2, %v3190_v6 }
 0x2a8   :  { %2702 = vmatprep.mubr.msk.bf16.mxu0 %vm3057_vm1, %v3056_v62 }
 0x36a   :  { %v255_v19 = vpop.f32.mrb[4].mxu0 }
 0x36b   :  { %v256_v20 = vadd.f32 %v255_v19, %v3217_v18  ;;  %v2674_v21 = vpop.f32.mrb[5].mxu0 }
 0x36c   :  { %v258_v22 = vpop.f32.mrb[6].mxu0 }
 0x36d   :  { %v2675_v23 = vpop.f32.mrb[7].mxu0  ;;  %v405_v24 = vsel %vm214_vm2, %v256_v20, -inf }
 0x36e   :  { %406 = vmax.xlane.f32.xlu0 %v405_v24 }
 0x370   :  { %v351_v25 = vpop.f32.mrb[0].mxu1 }
 0x371   :  { %v352_v26 = vadd.f32 %v351_v25, %v3217_v18  ;;  %v2686_v27 = vpop.f32.mrb[1].mxu1 }
 0x372   :  { %v303_v28 = vpop.f32.mrb[8].mxu0  ;;  %v354_v29 = vpop.f32.mrb[2].mxu1 }
 0x373   :  { %v304_v30 = vadd.f32 %v303_v28, %v3217_v18  ;;  %v2680_v31 = vpop.f32.mrb[9].mxu0  ;;  %v2687_v32 = vpop.f32.mrb[3].mxu1  ;;  %v411_v33 = vsel %vm214_vm2, %v352_v26, -inf }
 0x374   :  { %v306_v34 = vpop.f32.mrb[10].mxu0  ;;  %412 = vmax.xlane.f32.xlu0 %v411_v33 }
 0x375   :  { %v2681_v35 = vpop.f32.mrb[11].mxu0  ;;  %v408_v36 = vsel %vm214_vm2, %v304_v30, -inf }
 0x376   :  { %409 = vmax.xlane.f32.xlu1 %v408_v36 }
 0x37a   :  { %v399_v37 = vpop.f32.mrb[12].mxu0 }
 0x37b   :  { %v400_v38 = vadd.f32 %v399_v37, %v3217_v18  ;;  %v2692_v39 = vpop.f32.mrb[13].mxu0 }
 0x37c   :  { %v402_v40 = vpop.f32.mrb[14].mxu0 }
 0x37d   :  { %v2693_v41 = vpop.f32.mrb[15].mxu0  ;;  %v414_v42 = vsel %vm214_vm2, %v400_v38, -inf }
 0x37e   :  { %415 = vmax.xlane.f32.xlu0 %v414_v42 }
 0x387   :  { %502 = vrot.lane.b32.xlu1 %v3183_v4, %s3060_s2 }
 0x38b   :  { %550 = vrot.lane.b32.xlu1 %v3187_v5, %s3060_s2 }
 0x38f   :  { %598 = vrot.lane.b32.xlu1 %v3190_v6, %s3060_s2 }
 0x3fb   :  { %v407_v43 = vpop.xlane.xlu0 %406 }
 0x3fc   :  { %v417_v44 = vsub.f32 %v256_v20, %v407_v43 }
 0x3fe   :  { %v421_v47 = vmul.f32 1.442695, %v417_v44 }
 0x401   :  { %v413_v45 = vpop.xlane.xlu0 %412 }
 0x402   :  { %v419_v46 = vsub.f32 %v352_v26, %v413_v45 }
 0x403   :  { %v410_v48 = vpop.xlane.xlu1 %409 }
 0x404   :  { %v425_v49 = vmul.f32 1.442695, %v419_v46  ;;  %v418_v50 = vsub.f32 %v304_v30, %v410_v48 }
 0x406   :  { %2940 = vpow2.f32 %v425_v49  ;;  %v423_v51 = vmul.f32 1.442695, %v418_v50 }
 0x407   :  { %2942 = vpow2.f32 %v421_v47  ;;  %v503_v52 = vpop.permute.xlu1 %502 }
 0x408   :  { %2944 = vpow2.f32 %v423_v51  ;;  %v508_v53 = vsel %vm458_vm4, %v503_v52, 0 }
 0x409   :  { %2701 = vmatpush3.bf16.msra.mxu0 %v508_v53 }
 0x40a   :  { %2712 = vmatprep.subr.bf16.mxu0 %v3056_v62 }
 0x40b   :  { %v416_v60 = vpop.xlane.xlu0 %415  ;;  %v551_v3 = vpop.permute.xlu1 %550 }
 0x40c   :  { %v420_v61 = vsub.f32 %v400_v38, %v416_v60  ;;  %v556_v22 = vsel %vm458_vm4, %v551_v3, 0 }
 0x40e   :  { %v427_v63 = vmul.f32 1.442695, %v420_v61 }
 0x40f   :  { %v599_v7 = vpop.permute.xlu1 %598 }
 0x410   :  { %v2941_v54 = vpop.eup %2940  ;;  %2946 = vpow2.f32 %v427_v63  ;;  %v604_v19 = vsel %vm458_vm4, %v599_v7, 0 }
 0x411   :  { %v2943_v55 = vpop.eup %2942  ;;  %v435_v56 = vsel %vm214_vm2, %v2941_v54, 0.0 }
 0x412   :  { %v2945_v57 = vpop.eup %2944  ;;  %436 = vadd.xlane.f32.xlu0 %v435_v56  ;;  %v429_v59 = vsel %vm214_vm2, %v2943_v55, 0.0 }
 0x413   :  { %v432_v58 = vsel %vm214_vm2, %v2945_v57, 0.0 }
 0x414   :  { %433 = vadd.xlane.f32.xlu1 %v432_v58 }
 0x416   :  { %430 = vadd.xlane.f32.xlu0 %v429_v59 }
 0x41a   :  { %v2947_v0 = vpop.eup %2946 }
 0x41b   :  { %v438_v2 = vsel %vm214_vm2, %v2947_v0, 0.0 }
 0x425   :  { %702 = vrot.lane.b32.xlu1 %v3183_v4, %s3061_s18 }
 0x42c   :  { %453 = vrot.lane.b32.xlu0 %v3181_v1, %s3060_s2 }
 0x430   :  { %652 = vrot.lane.b32.xlu0 %v3181_v1, %s3061_s18 }
 0x434   :  { %650 = vrot.lane.b32.xlu0 %v3181_v1, %s3062_s19 }
 0x438   :  { %752 = vrot.lane.b32.xlu0 %v3187_v5, %s3061_s18 }
 0x43c   :  { %750 = vrot.lane.b32.xlu0 %v3187_v5, %s3062_s19 }
 0x449   :  { %439 = vadd.xlane.f32.xlu1 %v438_v2 }
 0x45a   :  { %700 = vrot.lane.b32.xlu1 %v3183_v4, %s3062_s19 }
 0x45e   :  { %802 = vrot.lane.b32.xlu1 %v3190_v6, %s3061_s18 }
 0x462   :  { %800 = vrot.lane.b32.xlu1 %v3190_v6, %s3062_s19 }
 0x49f   :  { %v437_v8 = vpop.xlane.xlu0 %436 }
 0x4a1   :  { %v434_v9 = vpop.xlane.xlu1 %433 }
 0x4a2   :  { %2948 = vrcp.f32 %v434_v9 }
 0x4a3   :  { %v431_v10 = vpop.xlane.xlu0 %430 }
 0x4a4   :  { %2950 = vrcp.f32 %v431_v10 }
 0x4a5   :  { %2952 = vrcp.f32 %v437_v8  ;;  %v703_v31 = vpop.permute.xlu1 %702 }
 0x4a6   :  { %v708_v37 = vsel %vm214_vm2, %v703_v31, 0 }
 0x4a7   :  { %v454_v11 = vpop.permute.xlu0 %453 }
 0x4a8   :  { %v460_v12 = vsel %vm458_vm4, %v454_v11, 0 }
 0x4a9   :  { %2695 = vmatpush3.bf16.msra.mxu1 %v460_v12 }
 0x4aa   :  { %2706 = vmatprep.subr.bf16.mxu1 %v3056_v62 }
 0x4ab   :  { %v653_v24 = vpop.permute.xlu0 %652 }
 0x4ac   :  { %v2949_v13 = vpop.eup %2948  ;;  %v658_v27 = vsel %vm214_vm2, %v653_v24, 0 }
 0x4ad   :  { %v446_v14 = vmul.f32 %v2949_v13, %v2945_v57 }
 0x4ae   :  { %v2951_v15 = vpop.eup %2950 }
 0x4af   :  { %v445_v16 = vmul.f32 %v2951_v15, %v2943_v55  ;;  %v450_v17 = vpack.c.bf16 %v446_v14, %v446_v14  ;;  %v2953_v21 = vpop.eup %2952  ;;  %v651_v26 = vpop.permute.xlu0 %650 }
 0x4b0   :  { %v447_v23 = vmul.f32 %v2953_v21, %v2941_v54 }
 0x4b1   :  { %2703 = vmatmul.mubr.msk.bf16.vlgmr.msra.gmra.mrb[16].mxu0 %vm214_vm2, %v450_v17  ;;  %v449_v20 = vpack.c.bf16 %v445_v16, %v445_v16 }
 0x4b2   :  { %2713 = vmatpush3.bf16.msra.mxu0 %v604_v19  ;;  %2714 = vmatprep.mubr.msk.bf16.mxu0 %vm3057_vm1, %v3056_v62  ;;  %v451_v25 = vpack.c.bf16 %v447_v23, %v447_v23 }
 0x4b3   :  { %2697 = vmatmul.mubr.msk.bf16.vlgmr.msra.gmra.mrb[4].mxu1 %vm214_vm2, %v449_v20  ;;  %2724 = vmatprep.subr.bf16.mxu0 %v3056_v62  ;;  %v753_v28 = vpop.permute.xlu0 %752 }
 0x4b4   :  { %2707 = vmatpush3.bf16.msra.mxu1 %v556_v22  ;;  %2708 = vmatprep.mubr.msk.bf16.mxu1 %vm3057_vm1, %v3056_v62  ;;  %v758_v29 = vsel %vm214_vm2, %v753_v28, 0 }
 0x4b5   :  { %2718 = vmatprep.subr.bf16.mxu1 %v3056_v62 }
 0x4b7   :  { %v751_v30 = vpop.permute.xlu0 %750 }
 0x4bb   :  { %2709 = vmatmul.mubr.msk.bf16.vlgmr.msra.gmra.mrb[8].mxu1 %vm214_vm2, %v451_v25 }
 0x4bc   :  { %2720 = vmatprep.mubr.msk.bf16.mxu1 %vm3057_vm1, %v3056_v62 }
 0x4bd   :  { %2719 = vmatpush3.bf16.xpose.msra.mxu1 %v658_v27 }
 0x4be   :  { %2730 = vmatprep.subr.bf16.mxu1 %v3056_v62 }
 0x4c4   :  { %2721 = vmatmul.mubr.msk.bf16.vlgmr.msra.gmra.mrb[12].mxu1 %vm214_vm2, %v651_v26 }
 0x4c5   :  { %2731 = vmatpush3.bf16.xpose.msra.mxu1 %v758_v29  ;;  %2732 = vmatprep.mubr.msk.bf16.mxu1 %vm3057_vm1, %v3056_v62 }
 0x4c6   :  { %2742 = vmatprep.subr.bf16.mxu1 %v3056_v62 }
 0x4cc   :  { %2733 = vmatmul.mubr.msk.bf16.vlgmr.msra.gmra.mrb[16].mxu1 %vm214_vm2, %v751_v30 }
 0x4cd   :  { %2744 = vmatprep.mubr.msk.bf16.mxu1 %vm3057_vm1, %v3056_v62 }
 0x4d6   :  { %v440_v32 = vpop.xlane.xlu1 %439 }
 0x4d7   :  { %2954 = vrcp.f32 %v440_v32 }
 0x4da   :  { %v701_v36 = vpop.permute.xlu1 %700 }
 0x4de   :  { %v803_v38 = vpop.permute.xlu1 %802 }
 0x4df   :  { %v808_v39 = vsel %vm214_vm2, %v803_v38, 0 }
 0x4e1   :  { %v2955_v33 = vpop.eup %2954 }
 0x4e2   :  { %v448_v34 = vmul.f32 %v2955_v33, %v2947_v0  ;;  %v801_v40 = vpop.permute.xlu1 %800 }
 0x4e4   :  { %v452_v35 = vpack.c.bf16 %v448_v34, %v448_v34 }
 0x4e6   :  { %2715 = vmatmul.mubr.msk.bf16.vlgmr.msra.gmra.mrb[20].mxu0 %vm214_vm2, %v452_v35 }
 0x4e7   :  { %2725 = vmatpush3.bf16.xpose.msra.mxu0 %v708_v37  ;;  %2726 = vmatprep.mubr.msk.bf16.mxu0 %vm3057_vm1, %v3056_v62 }
 0x4e8   :  { %2736 = vmatprep.subr.bf16.mxu0 %v3056_v62 }
 0x4ee   :  { %2727 = vmatmul.mubr.msk.bf16.vlgmr.msra.gmra.mrb[24].mxu0 %vm214_vm2, %v701_v36 }
 0x4ef   :  { %2737 = vmatpush3.bf16.xpose.msra.mxu0 %v808_v39  ;;  %2738 = vmatprep.mubr.msk.bf16.mxu0 %vm3057_vm1, %v3056_v62 }
 0x4f0   :  { %2748 = vmatprep.subr.bf16.mxu0 %v3056_v62 }
 0x4f6   :  { %2739 = vmatmul.mubr.msk.bf16.vlgmr.msra.gmra.mrb[28].mxu0 %vm214_vm2, %v801_v40 }
 0x4f7   :  { %2750 = vmatprep.mubr.msk.bf16.mxu0 %vm3057_vm1, %v3056_v62 }
 0x584   :  { %v544_v41 = vpop.f32.mrb[16].mxu0 }
 0x585   :  { %v2704_v42 = vpop.f32.mrb[17].mxu0 }
 0x586   :  { %v496_v43 = vpop.f32.mrb[4].mxu1  ;;  %v547_v44 = vpop.f32.mrb[18].mxu0 }
 0x587   :  { %v646_v45 = vpack.c.bf16 %v544_v41, %v496_v43  ;;  %v2698_v46 = vpop.f32.mrb[5].mxu1  ;;  %v2705_v47 = vpop.f32.mrb[19].mxu0 }
 0x588   :  { %v499_v48 = vpop.f32.mrb[6].mxu1 }
 0x589   :  { %648 = vst.msk [vmem:[#allocation2] sm:$0xff] %vm214_vm2, %v646_v45  ;;  %v2699_v49 = vpop.f32.mrb[7].mxu1 }
 0x58e   :  { %v592_v50 = vpop.f32.mrb[8].mxu1 }
 0x58f   :  { %v2710_v51 = vpop.f32.mrb[9].mxu1 }
 0x590   :  { %v595_v52 = vpop.f32.mrb[10].mxu1 }
 0x591   :  { %v2711_v53 = vpop.f32.mrb[11].mxu1 }
 0x597   :  { %v694_v54 = vpop.f32.mrb[12].mxu1 }
 0x598   :  { %v695_v55 = vadd.f32 %v694_v54, %v3217_v18  ;;  %v2722_v56 = vpop.f32.mrb[13].mxu1 }
 0x599   :  { %v697_v57 = vpop.f32.mrb[14].mxu1 }
 0x59a   :  { %v2723_v58 = vpop.f32.mrb[15].mxu1  ;;  %v850_v59 = vsel %vm214_vm2, %v695_v55, -inf }
 0x59b   :  { %851 = vmax.xlane.f32.xlu0 %v850_v59 }
 0x59f   :  { %v794_v60 = vpop.f32.mrb[16].mxu1 }
 0x5a0   :  { %v795_v61 = vadd.f32 %v794_v60, %v3217_v18  ;;  %v2734_v63 = vpop.f32.mrb[17].mxu1 }
 0x5a1   :  { %v797_v0 = vpop.f32.mrb[18].mxu1 }
 0x5a2   :  { %v2735_v2 = vpop.f32.mrb[19].mxu1  ;;  %v856_v3 = vsel %vm214_vm2, %v795_v61, -inf }
 0x5a3   :  { %857 = vmax.xlane.f32.xlu0 %v856_v3 }
 0x5b9   :  { %v640_v7 = vpop.f32.mrb[20].mxu0 }
 0x5ba   :  { %v647_v8 = vpack.c.bf16 %v640_v7, %v592_v50  ;;  %v2716_v9 = vpop.f32.mrb[21].mxu0 }
 0x5bb   :  { %v643_v10 = vpop.f32.mrb[22].mxu0 }
 0x5bc   :  { %649 = vst.msk [vmem:[#allocation2 + $0x8] sm:$0xff] %vm214_vm2, %v647_v8  ;;  %v2717_v11 = vpop.f32.mrb[23].mxu0 }
 0x5c1   :  { %v744_v12 = vpop.f32.mrb[24].mxu0 }
 0x5c2   :  { %v745_v13 = vadd.f32 %v744_v12, %v3217_v18  ;;  %v2728_v14 = vpop.f32.mrb[25].mxu0 }
 0x5c3   :  { %v747_v15 = vpop.f32.mrb[26].mxu0 }
 0x5c4   :  { %v2729_v16 = vpop.f32.mrb[27].mxu0  ;;  %v853_v17 = vsel %vm214_vm2, %v745_v13, -inf }
 0x5c5   :  { %854 = vmax.xlane.f32.xlu1 %v853_v17 }
 0x5c9   :  { %v844_v19 = vpop.f32.mrb[28].mxu0 }
 0x5ca   :  { %v845_v20 = vadd.f32 %v844_v19, %v3217_v18  ;;  %v2740_v21 = vpop.f32.mrb[29].mxu0 }
 0x5cb   :  { %v847_v22 = vpop.f32.mrb[30].mxu0 }
 0x5cc   :  { %v2741_v23 = vpop.f32.mrb[31].mxu0  ;;  %v859_v24 = vsel %vm214_vm2, %v845_v20, -inf }
 0x5cd   :  { %860 = vmax.xlane.f32.xlu0 %v859_v24 }
 0x5d6   :  { %946 = vrot.lane.b32.xlu1 %v3183_v4, %s3063_s20 }
 0x5da   :  { %994 = vrot.lane.b32.xlu1 %v3187_v5, %s3063_s20 }
 0x5de   :  { %1042 = vrot.lane.b32.xlu1 %v3190_v6, %s3063_s20 }
 0x628   :  { %v852_v25 = vpop.xlane.xlu0 %851 }
 0x629   :  { %v862_v26 = vsub.f32 %v695_v55, %v852_v25 }
 0x62b   :  { %v866_v27 = vmul.f32 1.442695, %v862_v26 }
 0x62d   :  { %2956 = vpow2.f32 %v866_v27 }
 0x630   :  { %v858_v32 = vpop.xlane.xlu0 %857 }
 0x631   :  { %v864_v36 = vsub.f32 %v795_v61, %v858_v32 }
 0x633   :  { %v870_v37 = vmul.f32 1.442695, %v864_v36 }
 0x637   :  { %v2957_v28 = vpop.eup %2956 }
 0x638   :  { %v874_v29 = vsel %vm214_vm2, %v2957_v28, 0.0 }
 0x639   :  { %875 = vadd.xlane.f32.xlu0 %v874_v29 }
 0x64f   :  { %898 = vrot.lane.b32.xlu0 %v3181_v1, %s3063_s20 }
 0x652   :  { %v855_v30 = vpop.xlane.xlu1 %854 }
 0x653   :  { %v863_v31 = vsub.f32 %v745_v13, %v855_v30 }
 0x655   :  { %v868_v33 = vmul.f32 1.442695, %v863_v31 }
 0x656   :  { %v947_v34 = vpop.permute.xlu1 %946 }
 0x657   :  { %2958 = vpow2.f32 %v868_v33  ;;  %v952_v35 = vsel %vm458_vm4, %v947_v34, 0 }
 0x658   :  { %2749 = vmatpush3.bf16.msra.mxu0 %v952_v35  ;;  %2960 = vpow2.f32 %v870_v37 }
 0x659   :  { %2760 = vmatprep.subr.bf16.mxu0 %v3056_v62 }
 0x65a   :  { %v861_v42 = vpop.xlane.xlu0 %860  ;;  %v995_v52 = vpop.permute.xlu1 %994 }
 0x65b   :  { %v865_v43 = vsub.f32 %v845_v20, %v861_v42  ;;  %v1000_v54 = vsel %vm458_vm4, %v995_v52, 0 }
 0x65d   :  { %v872_v44 = vmul.f32 1.442695, %v865_v43 }
 0x65e   :  { %v1043_v55 = vpop.permute.xlu1 %1042 }
 0x65f   :  { %2962 = vpow2.f32 %v872_v44  ;;  %v1048_v61 = vsel %vm458_vm4, %v1043_v55, 0 }
 0x661   :  { %v2959_v38 = vpop.eup %2958 }
 0x662   :  { %v877_v39 = vsel %vm214_vm2, %v2959_v38, 0.0  ;;  %v2961_v40 = vpop.eup %2960 }
 0x663   :  { %878 = vadd.xlane.f32.xlu1 %v877_v39  ;;  %v880_v41 = vsel %vm214_vm2, %v2961_v40, 0.0 }
 0x669   :  { %v2963_v45 = vpop.eup %2962 }
 0x66a   :  { %v883_v46 = vsel %vm214_vm2, %v2963_v45, 0.0 }
 0x66e   :  { %881 = vadd.xlane.f32.xlu0 %v880_v41 }
 0x674   :  { %1155 = vrot.lane.b32.xlu1 %v3183_v4, %s3064_s21 }
 0x684   :  { %1105 = vrot.lane.b32.xlu0 %v3181_v1, %s3064_s21 }
 0x688   :  { %1103 = vrot.lane.b32.xlu0 %v3181_v1, %s3065_s22 }
 0x68c   :  { %1205 = vrot.lane.b32.xlu0 %v3187_v5, %s3064_s21 }
 0x690   :  { %1203 = vrot.lane.b32.xlu0 %v3187_v5, %s3065_s22 }
 0x698   :  { %884 = vadd.xlane.f32.xlu1 %v883_v46 }
 0x6a9   :  { %1153 = vrot.lane.b32.xlu1 %v3183_v4, %s3065_s22 }
 0x6ad   :  { %1255 = vrot.lane.b32.xlu1 %v3190_v6, %s3064_s21 }
 0x6b1   :  { %1253 = vrot.lane.b32.xlu1 %v3190_v6, %s3065_s22 }
 0x6c6   :  { %v876_v47 = vpop.xlane.xlu0 %875 }
 0x6c7   :  { %2964 = vrcp.f32 %v876_v47 }
 0x6ca   :  { %v899_v48 = vpop.permute.xlu0 %898 }
 0x6cb   :  { %v904_v49 = vsel %vm458_vm4, %v899_v48, 0 }
 0x6cc   :  { %2743 = vmatpush3.bf16.msra.mxu1 %v904_v49 }
 0x6cd   :  { %2754 = vmatprep.subr.bf16.mxu1 %v3056_v62 }
 0x6d1   :  { %v2965_v50 = vpop.eup %2964 }
 0x6d2   :  { %v890_v51 = vmul.f32 %v2965_v50, %v2957_v28 }
 0x6d4   :  { %v894_v53 = vpack.c.bf16 %v890_v51, %v890_v51 }
 0x6d6   :  { %2745 = vmatmul.mubr.msk.bf16.vlgmr.msra.gmra.mrb[20].mxu1 %vm214_vm2, %v894_v53 }
 0x6d7   :  { %2755 = vmatpush3.bf16.msra.mxu1 %v1000_v54  ;;  %2756 = vmatprep.mubr.msk.bf16.mxu1 %vm3057_vm1, %v3056_v62 }
 0x6d8   :  { %2766 = vmatprep.subr.bf16.mxu1 %v3056_v62 }
 0x6f0   :  { %v879_v56 = vpop.xlane.xlu1 %878 }
 0x6f1   :  { %2966 = vrcp.f32 %v879_v56 }
 0x6f4   :  { %v1156_v12 = vpop.permute.xlu1 %1155 }
 0x6f5   :  { %v1161_v19 = vsel %vm214_vm2, %v1156_v12, 0 }
 0x6fb   :  { %v2967_v57 = vpop.eup %2966  ;;  %v882_v58 = vpop.xlane.xlu0 %881 }
 0x6fc   :  { %v891_v59 = vmul.f32 %v2967_v57, %v2959_v38  ;;  %2968 = vrcp.f32 %v882_v58 }
 0x6fe   :  { %v895_v60 = vpack.c.bf16 %v891_v59, %v891_v59 }
 0x6ff   :  { %v1106_v63 = vpop.permute.xlu0 %1105 }
 0x700   :  { %2751 = vmatmul.mubr.msk.bf16.vlgmr.msra.gmra.mrb[32].mxu0 %vm214_vm2, %v895_v60  ;;  %v1111_v8 = vsel %vm214_vm2, %v1106_v63, 0 }
 0x701   :  { %2761 = vmatpush3.bf16.msra.mxu0 %v1048_v61  ;;  %2762 = vmatprep.mubr.msk.bf16.mxu0 %vm3057_vm1, %v3056_v62 }
 0x702   :  { %2772 = vmatprep.subr.bf16.mxu0 %v3056_v62 }
 0x703   :  { %v1104_v7 = vpop.permute.xlu0 %1103 }
 0x706   :  { %v2969_v0 = vpop.eup %2968 }
 0x707   :  { %v892_v2 = vmul.f32 %v2969_v0, %v2961_v40  ;;  %v1206_v9 = vpop.permute.xlu0 %1205 }
 0x708   :  { %v1211_v10 = vsel %vm214_vm2, %v1206_v9, 0 }
 0x709   :  { %v896_v3 = vpack.c.bf16 %v892_v2, %v892_v2 }
 0x70b   :  { %2757 = vmatmul.mubr.msk.bf16.vlgmr.msra.gmra.mrb[24].mxu1 %vm214_vm2, %v896_v3  ;;  %v1204_v11 = vpop.permute.xlu0 %1203 }
 0x70c   :  { %2767 = vmatpush3.bf16.xpose.msra.mxu1 %v1111_v8  ;;  %2768 = vmatprep.mubr.msk.bf16.mxu1 %vm3057_vm1, %v3056_v62 }
 0x70d   :  { %2778 = vmatprep.subr.bf16.mxu1 %v3056_v62 }
 0x713   :  { %2769 = vmatmul.mubr.msk.bf16.vlgmr.msra.gmra.mrb[28].mxu1 %vm214_vm2, %v1104_v7 }
 0x714   :  { %2779 = vmatpush3.bf16.xpose.msra.mxu1 %v1211_v10  ;;  %2780 = vmatprep.mubr.msk.bf16.mxu1 %vm3057_vm1, %v3056_v62 }
 0x715   :  { %2790 = vmatprep.subr.bf16.mxu1 %v3056_v62 }
 0x71b   :  { %2781 = vmatmul.mubr.msk.bf16.vlgmr.msra.gmra.mrb[32].mxu1 %vm214_vm2, %v1204_v11 }
 0x71c   :  { %2792 = vmatprep.mubr.msk.bf16.mxu1 %vm3057_vm1, %v3056_v62 }
 0x725   :  { %v885_v13 = vpop.xlane.xlu1 %884 }
 0x726   :  { %2970 = vrcp.f32 %v885_v13 }
 0x729   :  { %v1154_v17 = vpop.permute.xlu1 %1153 }
 0x72d   :  { %v1256_v20 = vpop.permute.xlu1 %1255 }
 0x72e   :  { %v1261_v21 = vsel %vm214_vm2, %v1256_v20, 0 }
 0x730   :  { %v2971_v14 = vpop.eup %2970 }
 0x731   :  { %v893_v15 = vmul.f32 %v2971_v14, %v2963_v45  ;;  %v1254_v22 = vpop.permute.xlu1 %1253 }
 0x733   :  { %v897_v16 = vpack.c.bf16 %v893_v15, %v893_v15 }
 0x735   :  { %2763 = vmatmul.mubr.msk.bf16.vlgmr.msra.gmra.mrb[36].mxu0 %vm214_vm2, %v897_v16 }
 0x736   :  { %2773 = vmatpush3.bf16.xpose.msra.mxu0 %v1161_v19  ;;  %2774 = vmatprep.mubr.msk.bf16.mxu0 %vm3057_vm1, %v3056_v62 }
 0x737   :  { %2784 = vmatprep.subr.bf16.mxu0 %v3056_v62 }
 0x73d   :  { %2775 = vmatmul.mubr.msk.bf16.vlgmr.msra.gmra.mrb[40].mxu0 %vm214_vm2, %v1154_v17 }
 0x73e   :  { %2785 = vmatpush3.bf16.xpose.msra.mxu0 %v1261_v21  ;;  %2786 = vmatprep.mubr.msk.bf16.mxu0 %vm3057_vm1, %v3056_v62 }
 0x73f   :  { %2796 = vmatprep.subr.bf16.mxu0 %v3056_v62 }
 0x745   :  { %2787 = vmatmul.mubr.msk.bf16.vlgmr.msra.gmra.mrb[44].mxu0 %vm214_vm2, %v1254_v22 }
 0x746   :  { %2798 = vmatprep.mubr.msk.bf16.mxu0 %vm3057_vm1, %v3056_v62 }
 0x7a9   :  { %v3353_v23 = vpop.f32.mrb[20].mxu1 }
 0x7aa   :  { %v2746_v24 = vpop.f32.mrb[21].mxu1 }
 0x7ab   :  { %v943_v25 = vpop.f32.mrb[22].mxu1 }
 0x7ac   :  { %v2747_v26 = vpop.f32.mrb[23].mxu1 }
 0x7d3   :  { %v3355_v27 = vpop.f32.mrb[32].mxu0 }
 0x7d4   :  { %v1090_v28 = vpack.c.bf16 %v3355_v27, %v3353_v23  ;;  %v2752_v29 = vpop.f32.mrb[33].mxu0 }
 0x7d5   :  { %v991_v30 = vpop.f32.mrb[34].mxu0 }
 0x7d6   :  { %v2753_v31 = vpop.f32.mrb[35].mxu0 }
 0x7de   :  { %v3359_v32 = vpop.f32.mrb[24].mxu1 }
 0x7df   :  { %v2758_v33 = vpop.f32.mrb[25].mxu1 }
 0x7e0   :  { %v1039_v34 = vpop.f32.mrb[26].mxu1 }
 0x7e1   :  { %v2759_v35 = vpop.f32.mrb[27].mxu1 }
 0x7e6   :  { %v1147_v36 = vpop.f32.mrb[28].mxu1 }
 0x7e7   :  { %v1148_v37 = vadd.f32 %v1147_v36, %v3217_v18  ;;  %v2770_v38 = vpop.f32.mrb[29].mxu1 }
 0x7e8   :  { %v1150_v39 = vpop.f32.mrb[30].mxu1 }
 0x7e9   :  { %v2771_v40 = vpop.f32.mrb[31].mxu1  ;;  %v1303_v41 = vsel %vm214_vm2, %v1148_v37, -inf }
 0x7ea   :  { %1304 = vmax.xlane.f32.xlu0 %v1303_v41 }
 0x7ee   :  { %v1247_v42 = vpop.f32.mrb[32].mxu1 }
 0x7ef   :  { %v1248_v43 = vadd.f32 %v1247_v42, %v3217_v18  ;;  %v2782_v44 = vpop.f32.mrb[33].mxu1 }
 0x7f0   :  { %v1250_v45 = vpop.f32.mrb[34].mxu1 }
 0x7f1   :  { %v2783_v46 = vpop.f32.mrb[35].mxu1  ;;  %v1309_v47 = vsel %vm214_vm2, %v1248_v43, -inf }
 0x7f2   :  { %1310 = vmax.xlane.f32.xlu0 %v1309_v47 }
 0x808   :  { %v3365_v48 = vpop.f32.mrb[36].mxu0 }
 0x809   :  { %v1091_v49 = vpack.c.bf16 %v3365_v48, %v3359_v32  ;;  %v2764_v50 = vpop.f32.mrb[37].mxu0 }
 0x80a   :  { %v1087_v51 = vpop.f32.mrb[38].mxu0 }
 0x80b   :  { %v2765_v52 = vpop.f32.mrb[39].mxu0 }
 0x810   :  { %v1197_v53 = vpop.f32.mrb[40].mxu0 }
 0x811   :  { %v1198_v54 = vadd.f32 %v1197_v53, %v3217_v18  ;;  %v2776_v55 = vpop.f32.mrb[41].mxu0 }
 0x812   :  { %v1200_v56 = vpop.f32.mrb[42].mxu0 }
 0x813   :  { %v2777_v57 = vpop.f32.mrb[43].mxu0  ;;  %v1306_v58 = vsel %vm214_vm2, %v1198_v54, -inf }
 0x814   :  { %1307 = vmax.xlane.f32.xlu1 %v1306_v58 }
 0x818   :  { %v1297_v59 = vpop.f32.mrb[44].mxu0 }
 0x819   :  { %v1298_v60 = vadd.f32 %v1297_v59, %v3217_v18  ;;  %v2788_v61 = vpop.f32.mrb[45].mxu0 }
 0x81a   :  { %v1300_v63 = vpop.f32.mrb[46].mxu0 }
 0x81b   :  { %v2789_v0 = vpop.f32.mrb[47].mxu0  ;;  %v1312_v2 = vsel %vm214_vm2, %v1298_v60, -inf }
 0x81c   :  { %1313 = vmax.xlane.f32.xlu0 %v1312_v2 }
 0x825   :  { %1399 = vrot.lane.b32.xlu1 %v3183_v4, %s3066_s23 }
 0x829   :  { %1447 = vrot.lane.b32.xlu1 %v3187_v5, %s3066_s23 }
 0x82d   :  { %1495 = vrot.lane.b32.xlu1 %v3190_v6, %s3066_s23 }
 0x877   :  { %v1305_v3 = vpop.xlane.xlu0 %1304 }
 0x878   :  { %v1315_v7 = vsub.f32 %v1148_v37, %v1305_v3 }
 0x87a   :  { %v1319_v8 = vmul.f32 1.442695, %v1315_v7 }
 0x87c   :  { %2972 = vpow2.f32 %v1319_v8 }
 0x87f   :  { %v1311_v13 = vpop.xlane.xlu0 %1310 }
 0x880   :  { %v1317_v17 = vsub.f32 %v1248_v43, %v1311_v13 }
 0x882   :  { %v1323_v19 = vmul.f32 1.442695, %v1317_v17 }
 0x886   :  { %v2973_v9 = vpop.eup %2972 }
 0x887   :  { %v1327_v10 = vsel %vm214_vm2, %v2973_v9, 0.0 }
 0x888   :  { %1328 = vadd.xlane.f32.xlu0 %v1327_v10 }
 0x89e   :  { %1351 = vrot.lane.b32.xlu0 %v3181_v1, %s3066_s23 }
 0x8a1   :  { %v1308_v11 = vpop.xlane.xlu1 %1307 }
 0x8a2   :  { %v1316_v12 = vsub.f32 %v1198_v54, %v1308_v11 }
 0x8a4   :  { %v1321_v14 = vmul.f32 1.442695, %v1316_v12 }
 0x8a5   :  { %v1400_v15 = vpop.permute.xlu1 %1399 }
 0x8a6   :  { %2974 = vpow2.f32 %v1321_v14  ;;  %v1405_v16 = vsel %vm458_vm4, %v1400_v15, 0 }
 0x8a7   :  { %2797 = vmatpush3.bf16.msra.mxu0 %v1405_v16  ;;  %2976 = vpow2.f32 %v1323_v19 }
 0x8a8   :  { %2808 = vmatprep.subr.bf16.mxu0 %v3056_v62 }
 0x8a9   :  { %v1314_v25 = vpop.xlane.xlu0 %1313  ;;  %v1448_v38 = vpop.permute.xlu1 %1447 }
 0x8aa   :  { %v1318_v26 = vsub.f32 %v1298_v60, %v1314_v25  ;;  %v1453_v40 = vsel %vm458_vm4, %v1448_v38, 0 }
 0x8ac   :  { %v1325_v29 = vmul.f32 1.442695, %v1318_v26 }
 0x8ad   :  { %v1496_v41 = vpop.permute.xlu1 %1495 }
 0x8ae   :  { %2978 = vpow2.f32 %v1325_v29  ;;  %v1501_v47 = vsel %vm458_vm4, %v1496_v41, 0 }
 0x8b0   :  { %v2975_v20 = vpop.eup %2974 }
 0x8b1   :  { %v1330_v21 = vsel %vm214_vm2, %v2975_v20, 0.0  ;;  %v2977_v22 = vpop.eup %2976 }
 0x8b2   :  { %1331 = vadd.xlane.f32.xlu1 %v1330_v21  ;;  %v1333_v24 = vsel %vm214_vm2, %v2977_v22, 0.0 }
 0x8b8   :  { %v2979_v30 = vpop.eup %2978 }
 0x8b9   :  { %v1336_v31 = vsel %vm214_vm2, %v2979_v30, 0.0 }
 0x8bd   :  { %1334 = vadd.xlane.f32.xlu0 %v1333_v24 }
 0x8c3   :  { %1608 = vrot.lane.b32.xlu1 %v3183_v4, %s3067_s24 }
 0x8d3   :  { %1558 = vrot.lane.b32.xlu0 %v3181_v1, %s3067_s24 }
 0x8d7   :  { %1556 = vrot.lane.b32.xlu0 %v3181_v1, %s3068_s25 }
 0x8db   :  { %1658 = vrot.lane.b32.xlu0 %v3187_v5, %s3067_s24 }
 0x8df   :  { %1656 = vrot.lane.b32.xlu0 %v3187_v5, %s3068_s25 }
 0x8e7   :  { %1337 = vadd.xlane.f32.xlu1 %v1336_v31 }
 0x8f8   :  { %1606 = vrot.lane.b32.xlu1 %v3183_v4, %s3068_s25 }
 0x8fc   :  { %1708 = vrot.lane.b32.xlu1 %v3190_v6, %s3067_s24 }
 0x900   :  { %1706 = vrot.lane.b32.xlu1 %v3190_v6, %s3068_s25 }
 0x915   :  { %v1329_v33 = vpop.xlane.xlu0 %1328 }
 0x916   :  { %2980 = vrcp.f32 %v1329_v33 }
 0x919   :  { %v1352_v34 = vpop.permute.xlu0 %1351 }
 0x91a   :  { %v1357_v35 = vsel %vm458_vm4, %v1352_v34, 0 }
 0x91b   :  { %2791 = vmatpush3.bf16.msra.mxu1 %v1357_v35 }
 0x91c   :  { %2802 = vmatprep.subr.bf16.mxu1 %v3056_v62 }
 0x920   :  { %v2981_v36 = vpop.eup %2980 }
 0x921   :  { %v1343_v37 = vmul.f32 %v2981_v36, %v2973_v9 }
 0x923   :  { %v1347_v39 = vpack.c.bf16 %v1343_v37, %v1343_v37 }
 0x925   :  { %2793 = vmatmul.mubr.msk.bf16.vlgmr.msra.gmra.mrb[36].mxu1 %vm214_vm2, %v1347_v39 }
 0x926   :  { %2803 = vmatpush3.bf16.msra.mxu1 %v1453_v40  ;;  %2804 = vmatprep.mubr.msk.bf16.mxu1 %vm3057_vm1, %v3056_v62 }
 0x927   :  { %2814 = vmatprep.subr.bf16.mxu1 %v3056_v62 }
 0x93f   :  { %v1332_v42 = vpop.xlane.xlu1 %1331 }
 0x940   :  { %2982 = vrcp.f32 %v1332_v42 }
 0x943   :  { %v1609_v59 = vpop.permute.xlu1 %1608 }
 0x944   :  { %v1614_v3 = vsel %vm214_vm2, %v1609_v59, 0 }
 0x94a   :  { %v2983_v43 = vpop.eup %2982  ;;  %v1335_v44 = vpop.xlane.xlu0 %1334 }
 0x94b   :  { %v1344_v45 = vmul.f32 %v2983_v43, %v2975_v20  ;;  %2984 = vrcp.f32 %v1335_v44 }
 0x94d   :  { %v1348_v46 = vpack.c.bf16 %v1344_v45, %v1344_v45 }
 0x94e   :  { %v1559_v50 = vpop.permute.xlu0 %1558 }
 0x94f   :  { %2799 = vmatmul.mubr.msk.bf16.vlgmr.msra.gmra.mrb[48].mxu0 %vm214_vm2, %v1348_v46  ;;  %v1564_v55 = vsel %vm214_vm2, %v1559_v50, 0 }
 0x950   :  { %2809 = vmatpush3.bf16.msra.mxu0 %v1501_v47  ;;  %2810 = vmatprep.mubr.msk.bf16.mxu0 %vm3057_vm1, %v3056_v62 }
 0x951   :  { %2820 = vmatprep.subr.bf16.mxu0 %v3056_v62 }
 0x952   :  { %v1557_v54 = vpop.permute.xlu0 %1556 }
 0x955   :  { %v2985_v51 = vpop.eup %2984 }
 0x956   :  { %v1345_v52 = vmul.f32 %v2985_v51, %v2977_v22  ;;  %v1659_v56 = vpop.permute.xlu0 %1658 }
 0x957   :  { %v1664_v57 = vsel %vm214_vm2, %v1659_v56, 0 }
 0x958   :  { %v1349_v53 = vpack.c.bf16 %v1345_v52, %v1345_v52 }
 0x95a   :  { %2805 = vmatmul.mubr.msk.bf16.vlgmr.msra.gmra.mrb[40].mxu1 %vm214_vm2, %v1349_v53  ;;  %v1657_v58 = vpop.permute.xlu0 %1656 }
 0x95b   :  { %2815 = vmatpush3.bf16.xpose.msra.mxu1 %v1564_v55  ;;  %2816 = vmatprep.mubr.msk.bf16.mxu1 %vm3057_vm1, %v3056_v62 }
 0x95c   :  { %2826 = vmatprep.subr.bf16.mxu1 %v3056_v62 }
 0x962   :  { %2817 = vmatmul.mubr.msk.bf16.vlgmr.msra.gmra.mrb[44].mxu1 %vm214_vm2, %v1557_v54 }
 0x963   :  { %2827 = vmatpush3.bf16.xpose.msra.mxu1 %v1664_v57  ;;  %2828 = vmatprep.mubr.msk.bf16.mxu1 %vm3057_vm1, %v3056_v62 }
 0x964   :  { %2838 = vmatprep.subr.bf16.mxu1 %v3056_v62 }
 0x96a   :  { %2829 = vmatmul.mubr.msk.bf16.vlgmr.msra.gmra.mrb[48].mxu1 %vm214_vm2, %v1657_v58 }
 0x96b   :  { %2840 = vmatprep.mubr.msk.bf16.mxu1 %vm3057_vm1, %v3056_v62 }
 0x974   :  { %v1338_v60 = vpop.xlane.xlu1 %1337 }
 0x975   :  { %2986 = vrcp.f32 %v1338_v60 }
 0x978   :  { %v1607_v2 = vpop.permute.xlu1 %1606 }
 0x97c   :  { %v1709_v7 = vpop.permute.xlu1 %1708 }
 0x97d   :  { %v1714_v8 = vsel %vm214_vm2, %v1709_v7, 0 }
 0x97f   :  { %v2987_v61 = vpop.eup %2986 }
 0x980   :  { %v1346_v63 = vmul.f32 %v2987_v61, %v2979_v30  ;;  %v1707_v9 = vpop.permute.xlu1 %1706 }
 0x982   :  { %v1350_v0 = vpack.c.bf16 %v1346_v63, %v1346_v63 }
 0x984   :  { %2811 = vmatmul.mubr.msk.bf16.vlgmr.msra.gmra.mrb[52].mxu0 %vm214_vm2, %v1350_v0 }
 0x985   :  { %2821 = vmatpush3.bf16.xpose.msra.mxu0 %v1614_v3  ;;  %2822 = vmatprep.mubr.msk.bf16.mxu0 %vm3057_vm1, %v3056_v62 }
 0x986   :  { %2832 = vmatprep.subr.bf16.mxu0 %v3056_v62 }
 0x98c   :  { %2823 = vmatmul.mubr.msk.bf16.vlgmr.msra.gmra.mrb[56].mxu0 %vm214_vm2, %v1607_v2 }
 0x98d   :  { %2833 = vmatpush3.bf16.xpose.msra.mxu0 %v1714_v8  ;;  %2834 = vmatprep.mubr.msk.bf16.mxu0 %vm3057_vm1, %v3056_v62 }
 0x98e   :  { %2844 = vmatprep.subr.bf16.mxu0 %v3056_v62 }
 0x994   :  { %2835 = vmatmul.mubr.msk.bf16.vlgmr.msra.gmra.mrb[60].mxu0 %vm214_vm2, %v1707_v9 }
 0x995   :  { %2846 = vmatprep.mubr.msk.bf16.mxu0 %vm3057_vm1, %v3056_v62 }
 0x9f8   :  { %v3429_v10 = vpop.f32.mrb[36].mxu1 }
 0x9f9   :  { %v2794_v11 = vpop.f32.mrb[37].mxu1 }
 0x9fa   :  { %v1396_v12 = vpop.f32.mrb[38].mxu1 }
 0x9fb   :  { %v2795_v13 = vpop.f32.mrb[39].mxu1 }
 0xa22   :  { %v3431_v14 = vpop.f32.mrb[48].mxu0 }
 0xa23   :  { %v1543_v15 = vpack.c.bf16 %v3431_v14, %v3429_v10  ;;  %v2800_v16 = vpop.f32.mrb[49].mxu0 }
 0xa24   :  { %v1444_v17 = vpop.f32.mrb[50].mxu0 }
 0xa25   :  { %v2801_v19 = vpop.f32.mrb[51].mxu0 }
 0xa2d   :  { %v3435_v20 = vpop.f32.mrb[40].mxu1 }
 0xa2e   :  { %v2806_v21 = vpop.f32.mrb[41].mxu1 }
 0xa2f   :  { %v1492_v22 = vpop.f32.mrb[42].mxu1 }
 0xa30   :  { %v2807_v24 = vpop.f32.mrb[43].mxu1 }
 0xa35   :  { %v1600_v25 = vpop.f32.mrb[44].mxu1 }
 0xa36   :  { %v1601_v26 = vadd.f32 %v1600_v25, %v3217_v18  ;;  %v2818_v29 = vpop.f32.mrb[45].mxu1 }
 0xa37   :  { %v1603_v30 = vpop.f32.mrb[46].mxu1 }
 0xa38   :  { %v2819_v31 = vpop.f32.mrb[47].mxu1  ;;  %v1756_v33 = vsel %vm214_vm2, %v1601_v26, -inf }
 0xa39   :  { %1757 = vmax.xlane.f32.xlu0 %v1756_v33 }
 0xa3d   :  { %v1700_v34 = vpop.f32.mrb[48].mxu1 }
 0xa3e   :  { %v1701_v35 = vadd.f32 %v1700_v34, %v3217_v18  ;;  %v2830_v36 = vpop.f32.mrb[49].mxu1 }
 0xa3f   :  { %v1703_v37 = vpop.f32.mrb[50].mxu1 }
 0xa40   :  { %v2831_v38 = vpop.f32.mrb[51].mxu1  ;;  %v1762_v39 = vsel %vm214_vm2, %v1701_v35, -inf }
 0xa41   :  { %1763 = vmax.xlane.f32.xlu0 %v1762_v39 }
 0xa57   :  { %v1537_v40 = vpop.f32.mrb[52].mxu0 }
 0xa58   :  { %v1544_v41 = vpack.c.bf16 %v1537_v40, %v3435_v20  ;;  %v2812_v42 = vpop.f32.mrb[53].mxu0 }
 0xa59   :  { %v1540_v43 = vpop.f32.mrb[54].mxu0 }
 0xa5a   :  { %v2813_v44 = vpop.f32.mrb[55].mxu0 }
 0xa5f   :  { %v1650_v45 = vpop.f32.mrb[56].mxu0 }
 0xa60   :  { %v1651_v46 = vadd.f32 %v1650_v45, %v3217_v18  ;;  %v2824_v47 = vpop.f32.mrb[57].mxu0 }
 0xa61   :  { %v1653_v50 = vpop.f32.mrb[58].mxu0 }
 0xa62   :  { %v2825_v51 = vpop.f32.mrb[59].mxu0  ;;  %v1759_v52 = vsel %vm214_vm2, %v1651_v46, -inf }
 0xa63   :  { %1760 = vmax.xlane.f32.xlu1 %v1759_v52 }
 0xa67   :  { %v1750_v53 = vpop.f32.mrb[60].mxu0 }
 0xa68   :  { %v1751_v54 = vadd.f32 %v1750_v53, %v3217_v18  ;;  %v2836_v55 = vpop.f32.mrb[61].mxu0 }
 0xa69   :  { %v1753_v56 = vpop.f32.mrb[62].mxu0 }
 0xa6a   :  { %v2837_v57 = vpop.f32.mrb[63].mxu0  ;;  %v1765_v58 = vsel %vm214_vm2, %v1751_v54, -inf  ;;  %v2920_v56 = vld [vmem:[%s3631_s4] sm:$0xff]  }
 0xa6b   :  { %1766 = vmax.xlane.f32.xlu0 %v1765_v58  ;;  %v2921_v57 = vld [vmem:[%s3631_s4 + $0x8] sm:$0xff]  }
 0xac6   :  { %v1758_v59 = vpop.xlane.xlu0 %1757 }
 0xac7   :  { %v1768_v60 = vsub.f32 %v1601_v26, %v1758_v59 }
 0xac9   :  { %v1772_v61 = vmul.f32 1.442695, %v1768_v60 }
 0xacb   :  { %2988 = vpow2.f32 %v1772_v61 }
 0xace   :  { %v1764_v63 = vpop.xlane.xlu0 %1763 }
 0xacf   :  { %v1770_v0 = vsub.f32 %v1701_v35, %v1764_v63 }
 0xad1   :  { %v1776_v2 = vmul.f32 1.442695, %v1770_v0 }
 0xad3   :  { %2990 = vpow2.f32 %v1776_v2 }
 0xad5   :  { %v2989_v3 = vpop.eup %2988 }
 0xad6   :  { %v1780_v7 = vsel %vm214_vm2, %v2989_v3, 0.0 }
 0xad7   :  { %1781 = vadd.xlane.f32.xlu0 %v1780_v7 }
 0xadd   :  { %v2991_v8 = vpop.eup %2990 }
 0xade   :  { %v1786_v18 = vsel %vm214_vm2, %v2991_v8, 0.0 }
 0xadf   :  { %1787 = vadd.xlane.f32.xlu0 %v1786_v18  ;;  %v2555_v18 = vld [vmem:[%s3632_s5] ss:$0 sm:$0xff] }
 0xaf0   :  { %v1761_v9 = vpop.xlane.xlu1 %1760 }
 0xaf1   :  { %v1769_v11 = vsub.f32 %v1651_v46, %v1761_v9 }
 0xaf3   :  { %v1774_v12 = vmul.f32 1.442695, %v1769_v11  ;;  %v3028_v11 = vld [vmem:[%s3627_s0 + $0x10] sm:$0xff] }
 0xaf5   :  { %2992 = vpow2.f32 %v1774_v12  ;;  %1804 = vrot.lane.b32.xlu0 %v3181_v1, %s3069_s26 }
 0xaf8   :  { %v1767_v1 = vpop.xlane.xlu0 %1766 }
 0xaf9   :  { %1094 = vrot.lane.b32.xlu0 %v1090_v28, %s3070_s27  ;;  %v1771_v17 = vsub.f32 %v1751_v54, %v1767_v1 }
 0xafb   :  { %v1778_v19 = vmul.f32 1.442695, %v1771_v17 }
 0xafd   :  { %1547 = vrot.lane.b32.xlu0 %v1543_v15, %s3071_s28  ;;  %2994 = vpow2.f32 %v1778_v19 }
 0xaff   :  { %v2993_v13 = vpop.eup %2992 }
 0xb00   :  { %v1783_v16 = vsel %vm214_vm2, %v2993_v13, 0.0 }
 0xb01   :  { %1784 = vadd.xlane.f32.xlu1 %v1783_v16 }
 0xb07   :  { %v2995_v20 = vpop.eup %2994 }
 0xb08   :  { %v1789_v23 = vsel %vm214_vm2, %v2995_v20, 0.0 }
 0xb12   :  { %1852 = vrot.lane.b32.xlu1 %v3183_v4, %s3069_s26 }
 0xb16   :  { %1900 = vrot.lane.b32.xlu1 %v3187_v5, %s3069_s26 }
 0xb3a   :  { %1790 = vadd.xlane.f32.xlu1 %v1789_v23 }
 0xb4b   :  { %1948 = vrot.lane.b32.xlu1 %v3190_v6, %s3069_s26 }
 0xb4f   :  { %1096 = vrot.lane.b32.xlu1 %v1091_v49, %s3070_s27 }
 0xb53   :  { %1549 = vrot.lane.b32.xlu1 %v1544_v41, %s3071_s28 }
 0xb64   :  { %v1782_v27 = vpop.xlane.xlu0 %1781 }
 0xb65   :  { %2996 = vrcp.f32 %v1782_v27 }
 0xb6c   :  { %v1788_v4 = vpop.xlane.xlu0 %1787 }
 0xb6d   :  { %2998 = vrcp.f32 %v1788_v4  ;;  %v3031_v4 = vld [vmem:[%s3627_s0 + $0x18] sm:$0xff] }
 0xb6f   :  { %v2997_v5 = vpop.eup %2996 }
 0xb70   :  { %v1796_v28 = vmul.f32 %v2997_v5, %v2989_v3  ;;  %v1805_v10 = vpop.permute.xlu0 %1804 }
 0xb71   :  { %v1810_v14 = vsel %vm458_vm4, %v1805_v10, 0 }
 0xb72   :  { %2839 = vmatpush3.bf16.msra.mxu1 %v1810_v14  ;;  %v1800_v15 = vpack.c.bf16 %v1796_v28, %v1796_v28 }
 0xb73   :  { %2850 = vmatprep.subr.bf16.mxu1 %v3056_v62 }
 0xb74   :  { %v1095_v6 = vpop.permute.xlu0 %1094 }
 0xb75   :  { %1101 = vst.msk [vmem:[#allocation2] sm:$0xff] %vm1100_vm5, %v1095_v6  ;;  %2841 = vmatmul.mubr.msk.bf16.vlgmr.msra.gmra.mrb[52].mxu1 %vm214_vm2, %v1800_v15 }
 0xb76   :  { %2852 = vmatprep.mubr.msk.bf16.mxu1 %vm3057_vm1, %v3056_v62 }
 0xb77   :  { %v2999_v49 = vpop.eup %2998 }
 0xb78   :  { %v1548_v32 = vpop.permute.xlu0 %1547  ;;  %v1798_v24 = vmul.f32 %v2999_v49, %v2991_v8 }
 0xb79   :  { %1554 = vst.msk [vmem:[#allocation2] sm:$0xff] %vm1553_vm6, %v1548_v32 }
 0xb7a   :  { %v1802_v30 = vpack.c.bf16 %v1798_v24, %v1798_v24 }
 0xb8e   :  { %v1785_v48 = vpop.xlane.xlu1 %1784 }
 0xb8f   :  { %3000 = vrcp.f32 %v1785_v48 }
 0xb92   :  { %v1853_v21 = vpop.permute.xlu1 %1852 }
 0xb93   :  { %v1858_v22 = vsel %vm458_vm4, %v1853_v21, 0 }
 0xb94   :  { %2845 = vmatpush3.bf16.msra.mxu0 %v1858_v22 }
 0xb95   :  { %2856 = vmatprep.subr.bf16.mxu0 %v3056_v62 }
 0xb96   :  { %v1901_v25 = vpop.permute.xlu1 %1900 }
 0xb97   :  { %v1906_v26 = vsel %vm458_vm4, %v1901_v25, 0 }
 0xb98   :  { %2851 = vmatpush3.bf16.msra.mxu1 %v1906_v26 }
 0xb99   :  { %v3001_v29 = vpop.eup %3000  ;;  %2862 = vmatprep.subr.bf16.mxu1 %v2920_v56 }
 0xb9a   :  { %v1797_v31 = vmul.f32 %v3001_v29, %v2993_v13  ;;  %v3029_v13 = vld [vmem:[%s3627_s0] sm:$0xff] }
 0xb9b   :  { %2853 = vmatmul.mubr.msk.bf16.vlgmr.msra.gmra.mrb[56].mxu1 %vm214_vm2, %v1802_v30 }
 0xb9c   :  { %v1801_v33 = vpack.c.bf16 %v1797_v31, %v1797_v31  ;;  %2863 = vmatpush3.bf16.msra.mxu1 %v2920_v56 }
 0xb9d   :  { %2864 = vmatprep.subr.bf16.mxu1 %v2921_v57 }
 0xb9e   :  { %2847 = vmatmul.mubr.msk.bf16.vlgmr.msra.gmra.mrb[64].mxu0 %vm214_vm2, %v1801_v33 }
 0xb9f   :  { %2858 = vmatprep.mubr.msk.bf16.mxu0 %vm3057_vm1, %v3056_v62 }
 0xba0   :  { %2865 = vmatpush3.bf16.msra.mxu1 %v2921_v57 }
 0xbc7   :  { %v1791_v34 = vpop.xlane.xlu1 %1790 }
 0xbc8   :  { %3002 = vrcp.f32 %v1791_v34 }
 0xbcb   :  { %v1949_v35 = vpop.permute.xlu1 %1948 }
 0xbcc   :  { %v1954_v36 = vsel %vm458_vm4, %v1949_v35, 0 }
 0xbcd   :  { %2857 = vmatpush3.bf16.msra.mxu0 %v1954_v36 }
 0xbcf   :  { %v1097_v37 = vpop.permute.xlu1 %1096 }
 0xbd0   :  { %1102 = vst.msk [vmem:[#allocation2 + $0x8] sm:$0xff] %vm1100_vm5, %v1097_v37 }
 0xbd2   :  { %v3003_v38 = vpop.eup %3002 }
 0xbd3   :  { %v1799_v39 = vmul.f32 %v3003_v38, %v2995_v20  ;;  %v1550_v40 = vpop.permute.xlu1 %1549  ;;  %v3030_v20 = vld [vmem:[%s3627_s0 + $0x8] sm:$0xff]  ;;  %s3074_s0 = smov [#allocation3]  }
 0xbd4   :  { %1555 = vst.msk [vmem:[#allocation2 + $0x8] sm:$0xff] %vm1553_vm6, %v1550_v40  ;;  %s2498_s21 = sshll.u32 %s3074_s0, 4  ;;  %s2499_s21 = int_to_ptr.vmem [resolvable:$true] %s2498_s21 }
 0xbd5   :  { %v1803_v41 = vpack.c.bf16 %v1799_v39, %v1799_v39  ;;  %p3037_p1 = scmp.lt.s32.totalorder %s2499_s21, %s2499_s21 }
 0xbd7   :  { %2859 = vmatmul.mubr.msk.bf16.vlgmr.msra.gmra.mrb[68].mxu0 %vm214_vm2, %v1803_v41 }
 0xc48   :  { %v1846_v42 = vpop.f32.mrb[52].mxu1 }
 0xc49   :  { %v2842_v43 = vpop.f32.mrb[53].mxu1 }
 0xc4a   :  { %v1849_v62 = vpop.f32.mrb[54].mxu1  ;;  %v2922_v43 = vld [vmem:[%s3635_s8] sm:$0xff]  }
 0xc4b   :  { %v2843_v44 = vpop.f32.mrb[55].mxu1  ;;  %2870 = vmatprep.subr.bf16.mxu0 %v2922_v43  ;;  %v2923_v62 = vld [vmem:[%s3635_s8 + $0x8] sm:$0xff]  }
 0xc4c   :  { %2871 = vmatpush3.bf16.msra.mxu0 %v2922_v43 }
 0xc4d   :  { %2872 = vmatprep.subr.bf16.mxu0 %v2923_v62 }
 0xc50   :  { %2873 = vmatpush3.bf16.msra.mxu0 %v2923_v62 }
 0xc6e   :  { %v1942_v45 = vpop.f32.mrb[56].mxu1 }
 0xc6f   :  { %v2854_v46 = vpop.f32.mrb[57].mxu1 }
 0xc70   :  { %v1945_v47 = vpop.f32.mrb[58].mxu1 }
 0xc71   :  { %v1894_v50 = vpop.f32.mrb[64].mxu0  ;;  %v2855_v51 = vpop.f32.mrb[59].mxu1 }
 0xc72   :  { %v1996_v52 = vpack.c.bf16 %v1894_v50, %v1846_v42  ;;  %v2848_v53 = vpop.f32.mrb[65].mxu0 }
 0xc73   :  { %v1897_v54 = vpop.f32.mrb[66].mxu0 }
 0xc74   :  { %2000 = vrot.lane.b32.xlu0 %v1996_v52, %s3072_s29  ;;  %v2849_v55 = vpop.f32.mrb[67].mxu0 }
 0xcaa   :  { %v1990_v58 = vpop.f32.mrb[68].mxu0 }
 0xcab   :  { %v1997_v59 = vpack.c.bf16 %v1990_v58, %v1942_v45  ;;  %v2860_v60 = vpop.f32.mrb[69].mxu0 }
 0xcac   :  { %v1993_v61 = vpop.f32.mrb[70].mxu0 }
 0xcad   :  { %2002 = vrot.lane.b32.xlu1 %v1997_v59, %s3072_s29  ;;  %v2861_v63 = vpop.f32.mrb[71].mxu0  ;;  %v2556_v59 = vld [vmem:[%s3633_s6] ss:$0 sm:$0xff] }
 0xce6   :  { %v2001_v0 = vpop.permute.xlu0 %2000 }
 0xce7   :  { %2007 = vst.msk [vmem:[#allocation2] sm:$0xff] %vm2006_vm7, %v2001_v0 }
 0xcee   :  { %v2009_v2 = vld [vmem:[#allocation2] sm:$0xff] }
 0xcef   :  { %2866 = vmatprep.mubr.msk.bf16.mxu1 %vm49_vm0, %v2009_v2 }
 0xd1f   :  { %v2003_v3 = vpop.permute.xlu1 %2002 }
 0xd20   :  { %2008 = vst.msk [vmem:[#allocation2 + $0x8] sm:$0xff] %vm2006_vm7, %v2003_v3  ;;  %v2557_v3 = vld [vmem:[%s3634_s7] ss:$0 sm:$0xff] }
 0xd27   :  { %v2010_v7 = vld [vmem:[#allocation2 + $0x8] sm:$0xff] }
 0xd28   :  { %2867 = vmatmul.mubr.msk.bf16.vlgmr.msra.gmra.mrb[60].mxu1 %vm49_vm0, %v2010_v7 }
 0xdfb   :  { %v2868_v8 = vpop.f32.mrb[60].mxu1 }
 0xdfc   :  { %v2067_v9 = vpop.f32.mrb[61].mxu1  ;;  %v2084_v12 = vadd.f32 %v3028_v11, %v2868_v8 }
 0xdfd   :  { %v2082_v16 = vadd.f32 %v3029_v13, %v2067_v9  ;;  %v2869_v1 = vpop.f32.mrb[62].mxu1 }
 0xdfe   :  { %v2070_v17 = vpop.f32.mrb[63].mxu1  ;;  %v3505_v27 = vadd.f32 %v2555_v18, %v2084_v12  ;;  %v2085_v5 = vadd.f32 %v3031_v4, %v2869_v1  ;;  %v2924_v4 = vld [vmem:[%s3637_s10] sm:$0xff]  }
 0xdff   :  { %v3500_v19 = vadd.f32 %v2555_v18, %v2082_v16  ;;  %v2083_v23 = vadd.f32 %v3030_v20, %v2070_v17  ;;  %2878 = vmatprep.subr.bf16.mxu1 %v2924_v4 }
 0xe00   :  { %v3516_v15 = vadd.f32 %v2555_v18, %v2085_v5  ;;  %v2105_v6 = vsel %vm49_vm0, %v3505_v27, 0.0  ;;  %2879 = vmatpush3.bf16.msra.mxu1 %v2924_v4  ;;  %v2925_v5 = vld [vmem:[%s3637_s10 + $0x8] sm:$0xff]  }
 0xe01   :  { %v3510_v28 = vadd.f32 %v2555_v18, %v2083_v23  ;;  %v2099_v10 = vsel %vm49_vm0, %v3500_v19, 0.0  ;;  %2880 = vmatprep.subr.bf16.mxu1 %v2925_v5 }
 0xe02   :  { %2100 = vadd.xlane.f32.xlu0 %v2099_v10  ;;  %v2108_v32 = vsel %vm49_vm0, %v3516_v15, 0.0  ;;  %v2926_v10 = vld [vmem:[%s3637_s10 + $0x10] sm:$0xff]  }
 0xe03   :  { %v2102_v14 = vsel %vm49_vm0, %v3510_v28, 0.0 }
 0xe04   :  { %2103 = vadd.xlane.f32.xlu1 %v2102_v14  ;;  %2881 = vmatpush3.bf16.msra.mxu1 %v2925_v5  ;;  %v2927_v14 = vld [vmem:[%s3637_s10 + $0x18] sm:$0xff]  }
 0xe05   :  { %2882 = vmatprep.subr.bf16.mxu1 %v2926_v10 }
 0xe06   :  { %2106 = vadd.xlane.f32.xlu0 %v2105_v6  ;;  %v2928_v6 = vld [vmem:[%s3637_s10 + $0x20] sm:$0xff]  }
 0xe08   :  { %2883 = vmatpush3.bf16.msra.mxu1 %v2926_v10 }
 0xe09   :  { %2884 = vmatprep.subr.bf16.mxu1 %v2927_v14 }
 0xe0a   :  { %2109 = vadd.xlane.f32.xlu0 %v2108_v32  ;;  %v2929_v32 = vld [vmem:[%s3637_s10 + $0x28] sm:$0xff]  }
 0xe0c   :  { %2885 = vmatpush3.bf16.msra.mxu1 %v2927_v14 }
 0xe0d   :  { %2886 = vmatprep.subr.bf16.mxu1 %v2928_v6 }
 0xe10   :  { %2887 = vmatpush3.bf16.msra.mxu1 %v2928_v6 }
 0xe11   :  { %2888 = vmatprep.subr.bf16.mxu1 %v2929_v32 }
 0xe14   :  { %2889 = vmatpush3.bf16.msra.mxu1 %v2929_v32 }
 0xe8f   :  { %v2101_v48 = vpop.xlane.xlu0 %2100 }
 0xe90   :  { %v2111_v49 = vmul.f32 0.03125, %v2101_v48  ;;  %v2930_v48 = vld [vmem:[%s3637_s10 + $0x30] sm:$0xff]  }
 0xe91   :  { %v2104_v21 = vpop.xlane.xlu1 %2103  ;;  %2890 = vmatprep.subr.bf16.mxu1 %v2930_v48 }
 0xe92   :  { %v2115_v22 = vsub.f32 %v3500_v19, %v2111_v49  ;;  %v2112_v24 = vmul.f32 0.03125, %v2104_v21  ;;  %2891 = vmatpush3.bf16.msra.mxu1 %v2930_v48  ;;  %v2931_v49 = vld [vmem:[%s3637_s10 + $0x38] sm:$0xff]   ;;  %v2558_v21 = vld [vmem:[%s3636_s9] ss:$0 sm:$0xff] }
 0xe93   :  { %v2107_v25 = vpop.xlane.xlu0 %2106  ;;  %2892 = vmatprep.subr.bf16.mxu1 %v2931_v49 }
 0xe94   :  { %v2116_v26 = vsub.f32 %v3510_v28, %v2112_v24  ;;  %v2113_v29 = vmul.f32 0.03125, %v2107_v25  ;;  %v2119_v30 = vmul.f32 %v2115_v22, %v2115_v22 }
 0xe96   :  { %v2117_v31 = vsub.f32 %v3505_v27, %v2113_v29  ;;  %v2123_v33 = vsel %vm49_vm0, %v2119_v30, 0.0  ;;  %v2120_v34 = vmul.f32 %v2116_v26, %v2116_v26  ;;  %2893 = vmatpush3.bf16.msra.mxu1 %v2931_v49 }
 0xe97   :  { %2124 = vadd.xlane.f32.xlu0 %v2123_v33  ;;  %v2110_v35 = vpop.xlane.xlu0 %2109 }
 0xe98   :  { %v2114_v36 = vmul.f32 0.03125, %v2110_v35  ;;  %v2126_v37 = vsel %vm49_vm0, %v2120_v34, 0.0  ;;  %v2121_v38 = vmul.f32 %v2117_v31, %v2117_v31 }
 0xe99   :  { %2127 = vadd.xlane.f32.xlu1 %v2126_v37 }
 0xe9a   :  { %v2118_v39 = vsub.f32 %v3516_v15, %v2114_v36  ;;  %v2129_v40 = vsel %vm49_vm0, %v2121_v38, 0.0 }
 0xe9b   :  { %2130 = vadd.xlane.f32.xlu0 %v2129_v40 }
 0xe9c   :  { %v2122_v41 = vmul.f32 %v2118_v39, %v2118_v39 }
 0xe9e   :  { %v2132_v42 = vsel %vm49_vm0, %v2122_v41, 0.0 }
 0xe9f   :  { %2133 = vadd.xlane.f32.xlu1 %v2132_v42 }
 0xf24   :  { %v2125_v44 = vpop.xlane.xlu0 %2124 }
 0xf25   :  { %v2135_v45 = vmul.f32 0.03125, %v2125_v44 }
 0xf26   :  { %v2128_v46 = vpop.xlane.xlu1 %2127 }
 0xf27   :  { %v2139_v47 = vadd.f32 1e-05, %v2135_v45  ;;  %v2136_v50 = vmul.f32 0.03125, %v2128_v46 }
 0xf28   :  { %v2131_v51 = vpop.xlane.xlu0 %2130 }
 0xf29   :  { %3004 = vrsqrt.f32 %v2139_v47  ;;  %v2140_v52 = vadd.f32 1e-05, %v2136_v50  ;;  %v2137_v53 = vmul.f32 0.03125, %v2131_v51 }
 0xf2b   :  { %3006 = vrsqrt.f32 %v2140_v52  ;;  %v2141_v54 = vadd.f32 1e-05, %v2137_v53 }
 0xf2c   :  { %v2134_v55 = vpop.xlane.xlu1 %2133 }
 0xf2d   :  { %3008 = vrsqrt.f32 %v2141_v54  ;;  %v2138_v56 = vmul.f32 0.03125, %v2134_v55 }
 0xf2f   :  { %v2142_v57 = vadd.f32 1e-05, %v2138_v56 }
 0xf31   :  { %3010 = vrsqrt.f32 %v2142_v57 }
 0xf33   :  { %v3005_v58 = vpop.eup %3004 }
 0xf34   :  { %v2147_v60 = vmul.f32 %v3005_v58, %v2115_v22 }
 0xf35   :  { %v3007_v61 = vpop.eup %3006 }
 0xf36   :  { %v2148_v63 = vmul.f32 %v3007_v61, %v2116_v26  ;;  %v2157_v0 = vmul.f32 %v2556_v59, %v2147_v60 }
 0xf37   :  { %v3009_v2 = vpop.eup %3008 }
 0xf38   :  { %v2149_v7 = vmul.f32 %v3009_v2, %v2117_v31  ;;  %v2158_v8 = vmul.f32 %v2556_v59, %v2148_v63  ;;  %v2167_v18 = vadd.f32 %v2557_v3, %v2157_v0 }
 0xf3a   :  { %v2168_v9 = vadd.f32 %v2557_v3, %v2158_v8  ;;  %v2159_v12 = vmul.f32 %v2556_v59, %v2149_v7 }
 0xf3b   :  { %v3011_v11 = vpop.eup %3010 }
 0xf3c   :  { %v2150_v13 = vmul.f32 %v3011_v11, %v2118_v39  ;;  %v2171_v16 = vpack.c.bf16 %v2168_v9, %v2167_v18  ;;  %v2169_v17 = vadd.f32 %v2557_v3, %v2159_v12 }
 0xf3e   :  { %v2160_v1 = vmul.f32 %v2556_v59, %v2150_v13  ;;  %2874 = vmatprep.mubr.msk.bf16.mxu0 %vm49_vm0, %v2171_v16 }
 0xf40   :  { %v2170_v20 = vadd.f32 %v2557_v3, %v2160_v1 }
 0xf42   :  { %v2172_v23 = vpack.c.bf16 %v2170_v20, %v2169_v17 }
 0xf44   :  { %2875 = vmatmul.mubr.msk.bf16.vlgmr.msra.gmra.mrb[72].mxu0 %vm49_vm0, %v2172_v23 }
0x1017   :  { %v2876_v22 = vpop.f32.mrb[72].mxu0 }
0x1018   :  { %v3571_v24 = vadd.f32 %v2876_v22, %v2558_v21  ;;  %v2236_v25 = vpop.f32.mrb[73].mxu0 }
0x1019   :  { %v3573_v26 = vadd.f32 %v2558_v21, %v2236_v25  ;;  %v2877_v29 = vpop.f32.mrb[74].mxu0 }
0x101a   :  { %v3576_v30 = vmul.f32 0.70710677, %v3571_v24  ;;  %v3578_v31 = vadd.f32 %v2877_v29, %v2558_v21  ;;  %v2239_v33 = vpop.f32.mrb[75].mxu0 }
0x101b   :  { %v3581_v34 = vmul.f32 0.70710677, %v3573_v26  ;;  %v3587_v37 = vadd.f32 %v2558_v21, %v2239_v33 }
0x101c   :  { %v2269_v35 = vand.u32 2147483647, %v3576_v30  ;;  %v3585_v36 = vmul.f32 0.70710677, %v3578_v31  ;;  %vm2261_vm8 = vcmp.ge.f32.partialorder %v3576_v30, 0.0 }
0x101d   :  { %v2267_v38 = vand.u32 2147483647, %v3581_v34  ;;  %v3592_v43 = vmul.f32 0.70710677, %v3587_v37  ;;  %vm2259_vm9 = vcmp.ge.f32.partialorder %v3581_v34, 0.0 }
0x101e   :  { %v2273_v39 = vmul.f32 0.3275911, %v2269_v35  ;;  %v2270_v41 = vand.u32 2147483647, %v3585_v36  ;;  %v2325_v51 = vsub.f32 0.0, %v2269_v35  ;;  %vm2262_vm10 = vcmp.ge.f32.partialorder %v3585_v36, 0.0 }
0x101f   :  { %v2271_v40 = vmul.f32 0.3275911, %v2267_v38  ;;  %v2268_v45 = vand.u32 2147483647, %v3592_v43  ;;  %v2323_v52 = vsub.f32 0.0, %v2267_v38  ;;  %vm2260_vm11 = vcmp.ge.f32.partialorder %v3592_v43, 0.0 }
0x1020   :  { %v2277_v42 = vadd.f32 1.0, %v2273_v39  ;;  %v2274_v44 = vmul.f32 0.3275911, %v2270_v41  ;;  %v2329_v54 = vmul.f32 %v2325_v51, %v2269_v35  ;;  %v2326_v55 = vsub.f32 0.0, %v2270_v41 }
0x1021   :  { %v2275_v62 = vadd.f32 1.0, %v2271_v40  ;;  %v2272_v47 = vmul.f32 0.3275911, %v2268_v45  ;;  %v2327_v58 = vmul.f32 %v2323_v52, %v2267_v38  ;;  %v2324_v60 = vsub.f32 0.0, %v2268_v45 }
0x1022   :  { %3012 = vrcp.f32 %v2277_v42  ;;  %v2278_v46 = vadd.f32 1.0, %v2274_v44  ;;  %v2335_v0 = vmul.f32 1.442695, %v2329_v54  ;;  %v2330_v3 = vmul.f32 %v2326_v55, %v2270_v41 }
0x1023   :  { %3014 = vrcp.f32 %v2275_v62  ;;  %v2276_v50 = vadd.f32 1.0, %v2272_v47  ;;  %v2331_v8 = vmul.f32 1.442695, %v2327_v58  ;;  %v2328_v12 = vmul.f32 %v2324_v60, %v2268_v45 }
0x1024   :  { %3016 = vrcp.f32 %v2278_v46  ;;  %v2337_v20 = vmul.f32 1.442695, %v2330_v3  ;;  %v3073_v58 = vmov -1.0  }
0x1025   :  { %3018 = vrcp.f32 %v2276_v50  ;;  %v2333_v14 = vmul.f32 1.442695, %v2328_v12  ;;  %v2263_v30 = vsel %vm2259_vm9, 1.0, %v3073_v58  ;;  %v2264_v12 = vsel %vm2260_vm11, 1.0, %v3073_v58 }
0x1026   :  { %3020 = vpow2.f32 %v2335_v0 }
0x1027   :  { %3022 = vpow2.f32 %v2331_v8  ;;  %v2266_v8 = vsel %vm2262_vm10, 1.0, %v3073_v58 }
0x1028   :  { %3024 = vpow2.f32 %v2337_v20 }
0x1029   :  { %3026 = vpow2.f32 %v2333_v14 }
0x102c   :  { %v3013_v53 = vpop.eup %3012 }
0x102d   :  { %v3015_v56 = vpop.eup %3014  ;;  %v2289_v57 = vmul.f32 1.0614054, %v3013_v53 }
0x102e   :  { %v2287_v59 = vmul.f32 1.0614054, %v3015_v56  ;;  %v3017_v63 = vpop.eup %3016 }
0x102f   :  { %v2293_v61 = vadd.f32 -1.4531521, %v2289_v57  ;;  %v2290_v18 = vmul.f32 1.0614054, %v3017_v63  ;;  %v3019_v9 = vpop.eup %3018 }
0x1030   :  { %v2291_v2 = vadd.f32 -1.4531521, %v2287_v59  ;;  %v2288_v1 = vmul.f32 1.0614054, %v3019_v9  ;;  %v3021_v62 = vpop.eup %3020  ;;  %v2265_v59 = vsel %vm2261_vm8, 1.0, %v3073_v58 }
0x1031   :  { %v2297_v7 = vmul.f32 %v3013_v53, %v2293_v61  ;;  %v2294_v16 = vadd.f32 -1.4531521, %v2290_v18  ;;  %v3023_v45 = vpop.eup %3022 }
0x1032   :  { %v2295_v11 = vmul.f32 %v3015_v56, %v2291_v2  ;;  %v2292_v5 = vadd.f32 -1.4531521, %v2288_v1  ;;  %v3025_v57 = vpop.eup %3024 }
0x1033   :  { %v2301_v13 = vadd.f32 1.4214138, %v2297_v7  ;;  %v2298_v4 = vmul.f32 %v3017_v63, %v2294_v16  ;;  %v3027_v0 = vpop.eup %3026  ;;  %v2254_v16 = vmul.f32 0.5, %v3578_v31  ;;  %v2571_v31 = vld [vmem:[%s3638_s11] ss:$0 sm:$0xff]  ;;  %s3032_s11 = scalar_lea.vmem %s2499_s21, 512 }
0x1034   :  { %v2299_v17 = vadd.f32 1.4214138, %v2295_v11  ;;  %v2296_v48 = vmul.f32 %v3019_v9, %v2292_v5  ;;  %v2253_v11 = vmul.f32 0.5, %v3571_v24  ;;  %p3033_p0 = scmp.ne.s32.totalorder %s2499_s21, %s3032_s11  ;;  %p3038_p2 = scmp.lt.s32.totalorder %s3032_s11, %s3032_s11 }
0x1035   :  { %v2305_v23 = vmul.f32 %v3013_v53, %v2301_v13  ;;  %v2302_v32 = vadd.f32 1.4214138, %v2298_v4 }
0x1036   :  { %v2303_v10 = vmul.f32 %v3015_v56, %v2299_v17  ;;  %v2300_v25 = vadd.f32 1.4214138, %v2296_v48  ;;  %p3039_p3 = por %p3038_p2, %p3037_p1 }
0x1037   :  { %v2309_v6 = vadd.f32 -0.28449672, %v2305_v23  ;;  %v2306_v22 = vmul.f32 %v3017_v63, %v2302_v32  ;;  %v2252_v23 = vmul.f32 0.5, %v3587_v37 }
0x1038   :  { %v2307_v49 = vadd.f32 -0.28449672, %v2303_v10  ;;  %v2304_v38 = vmul.f32 %v3019_v9, %v2300_v25  ;;  %p3040_p4 = pnand %p3039_p3, %p3033_p0 }
0x1039   :  { %v2313_v21 = vmul.f32 %v3013_v53, %v2309_v6  ;;  %v2310_v35 = vadd.f32 -0.28449672, %v2306_v22 }
0x103a   :  { %v2311_v29 = vmul.f32 %v3015_v56, %v2307_v49  ;;  %v2308_v42 = vadd.f32 -0.28449672, %v2304_v38 }
0x103b   :  { %v2317_v33 = vadd.f32 0.2548296, %v2313_v21  ;;  %v2314_v41 = vmul.f32 %v3017_v63, %v2310_v35 }
0x103c   :  { %v2315_v39 = vadd.f32 0.2548296, %v2311_v29  ;;  %v2312_v50 = vmul.f32 %v3019_v9, %v2308_v42 }
0x103d   :  { %v2321_v40 = vmul.f32 %v3013_v53, %v2317_v33  ;;  %v2318_v47 = vadd.f32 0.2548296, %v2314_v41 }
0x103e   :  { %v2319_v44 = vmul.f32 %v3015_v56, %v2315_v39  ;;  %v2316_v55 = vadd.f32 0.2548296, %v2312_v50 }
0x103f   :  { %v2341_v46 = vmul.f32 %v3021_v62, %v2321_v40  ;;  %v2322_v54 = vmul.f32 %v3017_v63, %v2318_v47 }
0x1040   :  { %v2339_v51 = vmul.f32 %v3023_v45, %v2319_v44  ;;  %v2320_v61 = vmul.f32 %v3019_v9, %v2316_v55  ;;  %v2251_v9 = vmul.f32 0.5, %v3573_v26 }
0x1041   :  { %v2345_v52 = vsub.f32 1.0, %v2341_v46  ;;  %v2342_v56 = vmul.f32 %v3025_v57, %v2322_v54 }
0x1042   :  { %v2343_v53 = vsub.f32 1.0, %v2339_v51  ;;  %v2340_v7 = vmul.f32 %v3027_v0, %v2320_v61 }
0x1043   :  { %v2349_v60 = vmul.f32 %v2345_v52, %v2265_v59  ;;  %v2346_v3 = vsub.f32 1.0, %v2342_v56 }
0x1044   :  { %v2347_v2 = vmul.f32 %v2343_v53, %v2263_v30  ;;  %v2344_v18 = vsub.f32 1.0, %v2340_v7 }
0x1045   :  { %v2353_v34 = vadd.f32 1.0, %v2349_v60  ;;  %v2350_v63 = vmul.f32 %v2346_v3, %v2266_v8 }
0x1046   :  { %v2351_v13 = vadd.f32 1.0, %v2347_v2  ;;  %v2348_v1 = vmul.f32 %v2344_v18, %v2264_v12 }
0x1047   :  { %v2354_v36 = vadd.f32 1.0, %v2350_v63  ;;  %v2357_v17 = vmul.f32 %v2353_v34, %v2253_v11 }
0x1048   :  { %v2352_v43 = vadd.f32 1.0, %v2348_v1  ;;  %v2355_v4 = vmul.f32 %v2351_v13, %v2251_v9 }
0x1049   :  { %v2358_v20 = vmul.f32 %v2354_v36, %v2254_v16 }
0x104a   :  { %v2356_v10 = vmul.f32 %v2352_v43, %v2252_v23 }
0x104b   :  { %v2360_v5 = vpack.c.bf16 %v2358_v20, %v2357_v17 }
0x104c   :  { %v2359_v14 = vpack.c.bf16 %v2356_v10, %v2355_v4 }
0x104e   :  { %2894 = vmatprep.mubr.bf16.mxu1 %v2359_v14 }
0x104f   :  { %2895 = vmatmul.mubr.bf16.vlgmr.msra.gmra.mrb[64].mxu1 %v2360_v5 }
0x1122   :  { %v2896_v24 = vpop.f32.mrb[64].mxu1 }
0x1123   :  { %v2476_v6 = vadd.f32 %v2896_v24, %v3505_v27  ;;  %v2459_v32 = vpop.f32.mrb[65].mxu1 }
0x1124   :  { %v2474_v26 = vadd.f32 %v2459_v32, %v3500_v19  ;;  %v2897_v48 = vpop.f32.mrb[66].mxu1 }
0x1125   :  { %v2487_v49 = vadd.f32 %v2571_v31, %v2476_v6  ;;  %v2477_v37 = vadd.f32 %v2897_v48, %v3516_v15  ;;  %v2462_v21 = vpop.f32.mrb[67].mxu1 }
0x1126   :  { %v2485_v22 = vadd.f32 %v2571_v31, %v2474_v26  ;;  %v2475_v25 = vadd.f32 %v2462_v21, %v3510_v28 }
0x1127   :  { %2491 = vst.msk [vmem:[#allocation3 + $0x10] sm:$0xff] %vm49_vm0, %v2487_v49  ;;  %v2488_v29 = vadd.f32 %v2571_v31, %v2477_v37 }
0x1128   :  { %2489 = vst.msk [vmem:[#allocation3] sm:$0xff] %vm49_vm0, %v2485_v22  ;;  %v2486_v33 = vadd.f32 %v2571_v31, %v2475_v25 }
0x1129   :  { %2492 = vst.msk [vmem:[#allocation3 + $0x18] sm:$0xff] %vm49_vm0, %v2488_v29 }
0x112a   :  { %2490 = vst.msk [vmem:[#allocation3 + $0x8] sm:$0xff] %vm49_vm0, %v2486_v33 }
0x112b   :  { %3043 = shalt.err (!%p3040_p4)
}
0x112c   :  { %s3044_s8 = scalar_lea.hbm %s3639_s12, 512 }
0x112d   :  { %p3045_p5 = scmp.ne.s32.totalorder %s3639_s12, %s3044_s8  ;;  %p3048_p6 = scmp.lt.u32.totalorder %s3044_s8, %s3639_s12 }
0x112f   :  { %p3050_p7 = pnand %p3048_p6, %p3045_p5 }
0x1131   :  { %3053 = shalt.err (!%p3050_p7)
}
0x1132   :  { %s3075_s28 = smov 128  }
0x1133   :  { %2504 = dma.vmem_to_hbm [thread:$0]  %s2499_s21, 512, %s3639_s12, [#allocation4], %s3075_s28, %s3075_s28, %s3070_s27  }
0x1134   :  { %3054 = dma.done.wait [#allocation4], 512  }
0x1135   :  { %3055 = vsyncadd [#allocation4], 4294966784 }
0x1136   :  { %2508 = vsyncpa [#allocation4], 1 }

// kernel: tpu_custom_call.1
= control target key start
LH: loop header
LB: loop body
LE: loop exit
PB: predicated region body
PF: predicated region fallthrough
CT: control target
= control target key end

     0   :  { %vm49_vm0 = vcmask 261120   ;;  %s3627_s0 = inlined_call_operand.vmem [shape: f32[32,32], index: 0, kind: input, shape index: {}]   ;;  %s3628_s1 = inlined_call_operand.vmem [shape: f32[1,32], index: 1, kind: input, shape index: {}]   ;;  %s3629_s2 = inlined_call_operand.vmem [shape: f32[1,32], index: 2, kind: input, shape index: {}]   ;;  %s3630_s3 = inlined_call_operand.vmem [shape: bf16[32,96], index: 3, kind: input, shape index: {}]   ;;  %s3631_s4 = inlined_call_operand.vmem [shape: bf16[32,32], index: 4, kind: input, shape index: {}]   ;;  %s3632_s5 = inlined_call_operand.vmem [shape: f32[1,32], index: 5, kind: input, shape index: {}]   ;;  %s3633_s6 = inlined_call_operand.vmem [shape: f32[1,32], index: 6, kind: input, shape index: {}]   ;;  %s3634_s7 = inlined_call_operand.vmem [shape: f32[1,32], index: 7, kind: input, shape index: {}]   ;;  %s3635_s8 = inlined_call_operand.vmem [shape: bf16[32,128], index: 8, kind: input, shape index: {}]   ;;  %s3636_s9 = inlined_call_operand.vmem [shape: f32[1,128], index: 9, kind: input, shape index: {}]   ;;  %s3637_s10 = inlined_call_operand.vmem [shape: bf16[128,32], index: 10, kind: input, shape index: {}]   ;;  %s3638_s11 = inlined_call_operand.vmem [shape: f32[1,32], index: 11, kind: input, shape index: {}]   ;;  %s3639_s12 = inlined_call_operand.hbm [shape: f32[32,32], index: 12, kind: output, shape index: {}]  }
   0x1   :  { %v43_v0 = vld [vmem:[%s3627_s0] sm:$0xff]  ;;  %v45_v1 = vld [vmem:[%s3627_s0 + $0x10] sm:$0xff]  ;;  %v44_v2 = vld [vmem:[%s3627_s0 + $0x8] sm:$0xff] }
   0x2   :  { %v50_v3 = vsel %vm49_vm0, %v43_v0, 0.0  ;;  %v56_v4 = vsel %vm49_vm0, %v45_v1, 0.0  ;;  %v46_v5 = vld [vmem:[%s3627_s0 + $0x18] sm:$0xff]  ;;  %v53_v6 = vsel %vm49_vm0, %v44_v2, 0.0 }
   0x3   :  { %51 = vadd.xlane.f32.xlu0 %v50_v3  ;;  %57 = vadd.xlane.f32.xlu1 %v56_v4  ;;  %v59_v7 = vsel %vm49_vm0, %v46_v5, 0.0 }
   0x7   :  { %54 = vadd.xlane.f32.xlu0 %v53_v6  ;;  %60 = vadd.xlane.f32.xlu1 %v59_v7 }
   0x8   :  { %17 = vsyncpa [#allocation4], 0  ;;  %v2918_v28 = vld [vmem:[%s3630_s3] sm:$0xff]   ;;  %v2919_v29 = vld [vmem:[%s3630_s3 + $0x8] sm:$0xff]   ;;  %v3056_v62 = vmov 0.0   ;;  %vm3057_vm1 = vmmov 0  }
   0x9   :  { %2662 = vmatprep.subr.bf16.mxu0 %v2918_v28  ;;  %v2509_v44 = vld [vmem:[%s3628_s1] ss:$0 sm:$0xff]  ;;  %2682 = vmatprep.subr.bf16.mxu1 %v3056_v62  ;;  %s3058_s1 = smov 96   ;;  %vm214_vm2 = vcmask 64512   ;;  %vm458_vm4 = vcmask 1043456   ;;  %s3061_s18 = smov 88  }
   0xa   :  { %2663 = vmatpush3.bf16.msra.mxu0 %v2918_v28  ;;  %v2510_v50 = vld [vmem:[%s3629_s2] ss:$0 sm:$0xff]  ;;  %2684 = vmatprep.mubr.msk.bf16.mxu1 %vm3057_vm1, %v3056_v62  ;;  %s3060_s2 = smov 64   ;;  %s3062_s19 = smov 120   ;;  %vm1100_vm5 = vcmask 130112   ;;  %vm1553_vm6 = vcmask 195712  }
   0xb   :  { %2664 = vmatprep.subr.bf16.mxu0 %v2919_v29  ;;  %s3063_s20 = smov 56   ;;  %s3064_s21 = smov 80   ;;  %vm2006_vm7 = vcmask 261312  }
   0xc   :  { %s3065_s22 = smov 112   ;;  %s3066_s23 = smov 48  }
   0xd   :  { %s3067_s24 = smov 72   ;;  %s3068_s25 = smov 104  }
   0xe   :  { %2665 = vmatpush3.bf16.msra.mxu0 %v2919_v29  ;;  %s3069_s26 = smov 40   ;;  %s3070_s27 = smov 8  }
   0xf   :  { %2670 = vmatprep.subr.bf16.mxu0 %v3056_v62  ;;  %s3071_s28 = smov 16   ;;  %s3072_s29 = smov 24  }
  0x90   :  { %v52_v8 = vpop.xlane.xlu0 %51  ;;  %v58_v9 = vpop.xlane.xlu1 %57 }
  0x91   :  { %v63_v10 = vmul.f32 0.03125, %v52_v8  ;;  %v65_v11 = vmul.f32 0.03125, %v58_v9 }
  0x93   :  { %v67_v12 = vsub.f32 %v43_v0, %v63_v10  ;;  %v69_v13 = vsub.f32 %v45_v1, %v65_v11 }
  0x94   :  { %v55_v14 = vpop.xlane.xlu0 %54  ;;  %v61_v15 = vpop.xlane.xlu1 %60 }
  0x95   :  { %v64_v16 = vmul.f32 0.03125, %v55_v14  ;;  %v66_v17 = vmul.f32 0.03125, %v61_v15  ;;  %v71_v18 = vmul.f32 %v67_v12, %v67_v12  ;;  %v73_v19 = vmul.f32 %v69_v13, %v69_v13 }
  0x96   :  { %v198_v15 = vlaneseq }
  0x97   :  { %v68_v20 = vsub.f32 %v44_v2, %v64_v16  ;;  %v70_v21 = vsub.f32 %v46_v5, %v66_v17  ;;  %v75_v22 = vsel %vm49_vm0, %v71_v18, 0.0  ;;  %v81_v23 = vsel %vm49_vm0, %v73_v19, 0.0 }
  0x98   :  { %76 = vadd.xlane.f32.xlu0 %v75_v22  ;;  %v199_v16 = vand.u32 127, %v198_v15  ;;  %v3059_v17 = vmov -1e+30  }
  0x99   :  { %v72_v24 = vmul.f32 %v68_v20, %v68_v20  ;;  %v74_v25 = vmul.f32 %v70_v21, %v70_v21 }
  0x9a   :  { %vm200_vm3 = vcmp.lt.s32.totalorder %v199_v16, 7 }
  0x9b   :  { %v78_v26 = vsel %vm49_vm0, %v72_v24, 0.0  ;;  %v84_v27 = vsel %vm49_vm0, %v74_v25, 0.0  ;;  %v3217_v18 = vsel %vm200_vm3, 0.0, %v3059_v17 }
  0x9c   :  { %82 = vadd.xlane.f32.xlu0 %v81_v23  ;;  %79 = vadd.xlane.f32.xlu1 %v78_v26 }
  0xa0   :  { %85 = vadd.xlane.f32.xlu1 %v84_v27 }
 0x125   :  { %v77_v30 = vpop.xlane.xlu0 %76 }
 0x126   :  { %v87_v31 = vmul.f32 0.03125, %v77_v30 }
 0x128   :  { %v91_v32 = vadd.f32 1e-05, %v87_v31 }
 0x129   :  { %v80_v33 = vpop.xlane.xlu1 %79  ;;  %v83_v34 = vpop.xlane.xlu0 %82 }
 0x12a   :  { %2932 = vrsqrt.f32 %v91_v32  ;;  %v88_v35 = vmul.f32 0.03125, %v80_v33  ;;  %v89_v36 = vmul.f32 0.03125, %v83_v34 }
 0x12c   :  { %v92_v37 = vadd.f32 1e-05, %v88_v35  ;;  %v93_v38 = vadd.f32 1e-05, %v89_v36 }
 0x12d   :  { %v86_v39 = vpop.xlane.xlu1 %85 }
 0x12e   :  { %2934 = vrsqrt.f32 %v92_v37  ;;  %v90_v40 = vmul.f32 0.03125, %v86_v39 }
 0x12f   :  { %2936 = vrsqrt.f32 %v93_v38 }
 0x130   :  { %v94_v41 = vadd.f32 1e-05, %v90_v40 }
 0x132   :  { %2938 = vrsqrt.f32 %v94_v41 }
 0x134   :  { %v2933_v42 = vpop.eup %2932 }
 0x135   :  { %v99_v43 = vmul.f32 %v2933_v42, %v67_v12 }
 0x137   :  { %v109_v48 = vmul.f32 %v2509_v44, %v99_v43 }
 0x138   :  { %v2935_v45 = vpop.eup %2934 }
 0x139   :  { %v2937_v46 = vpop.eup %2936  ;;  %v100_v47 = vmul.f32 %v2935_v45, %v68_v20  ;;  %v119_v54 = vadd.f32 %v2510_v50, %v109_v48 }
 0x13a   :  { %v101_v49 = vmul.f32 %v2937_v46, %v69_v13 }
 0x13b   :  { %v110_v51 = vmul.f32 %v2509_v44, %v100_v47 }
 0x13c   :  { %v2939_v52 = vpop.eup %2938  ;;  %v111_v56 = vmul.f32 %v2509_v44, %v101_v49 }
 0x13d   :  { %v102_v53 = vmul.f32 %v2939_v52, %v70_v21  ;;  %v120_v55 = vadd.f32 %v2510_v50, %v110_v51 }
 0x13e   :  { %v121_v59 = vadd.f32 %v2510_v50, %v111_v56 }
 0x13f   :  { %v123_v57 = vpack.c.bf16 %v120_v55, %v119_v54  ;;  %v112_v58 = vmul.f32 %v2509_v44, %v102_v53 }
 0x141   :  { %2666 = vmatprep.mubr.msk.bf16.mxu0 %vm49_vm0, %v123_v57  ;;  %v122_v60 = vadd.f32 %v2510_v50, %v112_v58 }
 0x143   :  { %v124_v61 = vpack.c.bf16 %v122_v60, %v121_v59 }
 0x145   :  { %2667 = vmatmul.mubr.msk.bf16.vlgmr.msra.gmra.mrb[0].mxu0 %vm49_vm0, %v124_v61 }
 0x146   :  { %2672 = vmatprep.mubr.msk.bf16.mxu0 %vm3057_vm1, %v3056_v62 }
 0x218   :  { %v2668_v63 = vpop.f32.mrb[0].mxu0 }
 0x219   :  { %v181_v0 = vpop.f32.mrb[1].mxu0  ;;  %v3187_v5 = vpack.c.bf16 %v2668_v63, %v2668_v63 }
 0x21a   :  { %v3181_v1 = vpack.c.bf16 %v181_v0, %v181_v0  ;;  %v2669_v2 = vpop.f32.mrb[2].mxu0 }
 0x21b   :  { %v184_v3 = vpop.f32.mrb[3].mxu0  ;;  %v3190_v6 = vpack.c.bf16 %v2669_v2, %v2669_v2 }
 0x21c   :  { %v3183_v4 = vpack.c.bf16 %v184_v3, %v184_v3  ;;  %212 = vrot.lane.b32.xlu0 %v3181_v1, %s3058_s1 }
 0x21e   :  { %261 = vrot.lane.b32.xlu1 %v3183_v4, %s3058_s1 }
 0x222   :  { %309 = vrot.lane.b32.xlu1 %v3187_v5, %s3058_s1 }
 0x226   :  { %357 = vrot.lane.b32.xlu1 %v3190_v6, %s3058_s1 }
 0x28e   :  { %v213_v7 = vpop.permute.xlu0 %212 }
 0x28f   :  { %v219_v8 = vsel %vm214_vm2, %v213_v7, 0 }
 0x290   :  { %2671 = vmatpush3.bf16.xpose.msra.mxu0 %v219_v8  ;;  %v262_v9 = vpop.permute.xlu1 %261 }
 0x291   :  { %2676 = vmatprep.subr.bf16.mxu0 %v3056_v62  ;;  %v267_v12 = vsel %vm214_vm2, %v262_v9, 0 }
 0x294   :  { %v310_v10 = vpop.permute.xlu1 %309 }
 0x295   :  { %v315_v11 = vsel %vm214_vm2, %v310_v10, 0 }
 0x296   :  { %2683 = vmatpush3.bf16.xpose.msra.mxu1 %v315_v11 }
 0x297   :  { %2673 = vmatmul.mubr.msk.bf16.vlgmr.msra.gmra.mrb[4].mxu0 %vm214_vm2, %v3181_v1  ;;  %2694 = vmatprep.subr.bf16.mxu1 %v3056_v62 }
 0x298   :  { %2677 = vmatpush3.bf16.xpose.msra.mxu0 %v267_v12  ;;  %2678 = vmatprep.mubr.msk.bf16.mxu0 %vm3057_vm1, %v3056_v62  ;;  %v358_v13 = vpop.permute.xlu1 %357 }
 0x299   :  { %2688 = vmatprep.subr.bf16.mxu0 %v3056_v62  ;;  %v363_v14 = vsel %vm214_vm2, %v358_v13, 0 }
 0x29d   :  { %2685 = vmatmul.mubr.msk.bf16.vlgmr.msra.gmra.mrb[0].mxu1 %vm214_vm2, %v3187_v5 }
 0x29e   :  { %2696 = vmatprep.mubr.msk.bf16.mxu1 %vm3057_vm1, %v3056_v62 }
 0x29f   :  { %2679 = vmatmul.mubr.msk.bf16.vlgmr.msra.gmra.mrb[8].mxu0 %vm214_vm2, %v3183_v4 }
 0x2a0   :  { %2689 = vmatpush3.bf16.xpose.msra.mxu0 %v363_v14  ;;  %2690 = vmatprep.mubr.msk.bf16.mxu0 %vm3057_vm1, %v3056_v62 }
 0x2a1   :  { %2700 = vmatprep.subr.bf16.mxu0 %v3056_v62 }
 0x2a7   :  { %2691 = vmatmul.mubr.msk.bf16.vlgmr.msra.gmra.mrb[12].mxu0 %vm214_vm2, %v3190_v6 }
 0x2a8   :  { %2702 = vmatprep.mubr.msk.bf16.mxu0 %vm3057_vm1, %v3056_v62 }
 0x36a   :  { %v255_v19 = vpop.f32.mrb[4].mxu0 }
 0x36b   :  { %v256_v20 = vadd.f32 %v255_v19, %v3217_v18  ;;  %v2674_v21 = vpop.f32.mrb[5].mxu0 }
 0x36c   :  { %v258_v22 = vpop.f32.mrb[6].mxu0 }
 0x36d   :  { %v2675_v23 = vpop.f32.mrb[7].mxu0  ;;  %v405_v24 = vsel %vm214_vm2, %v256_v20, -inf }
 0x36e   :  { %406 = vmax.xlane.f32.xlu0 %v405_v24 }
 0x370   :  { %v351_v25 = vpop.f32.mrb[0].mxu1 }
 0x371   :  { %v352_v26 = vadd.f32 %v351_v25, %v3217_v18  ;;  %v2686_v27 = vpop.f32.mrb[1].mxu1 }
 0x372   :  { %v303_v28 = vpop.f32.mrb[8].mxu0  ;;  %v354_v29 = vpop.f32.mrb[2].mxu1 }
 0x373   :  { %v304_v30 = vadd.f32 %v303_v28, %v3217_v18  ;;  %v2680_v31 = vpop.f32.mrb[9].mxu0  ;;  %v2687_v32 = vpop.f32.mrb[3].mxu1  ;;  %v411_v33 = vsel %vm214_vm2, %v352_v26, -inf }
 0x374   :  { %v306_v34 = vpop.f32.mrb[10].mxu0  ;;  %412 = vmax.xlane.f32.xlu0 %v411_v33 }
 0x375   :  { %v2681_v35 = vpop.f32.mrb[11].mxu0  ;;  %v408_v36 = vsel %vm214_vm2, %v304_v30, -inf }
 0x376   :  { %409 = vmax.xlane.f32.xlu1 %v408_v36 }
 0x37a   :  { %v399_v37 = vpop.f32.mrb[12].mxu0 }
 0x37b   :  { %v400_v38 = vadd.f32 %v399_v37, %v3217_v18  ;;  %v2692_v39 = vpop.f32.mrb[13].mxu0 }
 0x37c   :  { %v402_v40 = vpop.f32.mrb[14].mxu0 }
 0x37d   :  { %v2693_v41 = vpop.f32.mrb[15].mxu0  ;;  %v414_v42 = vsel %vm214_vm2, %v400_v38, -inf }
 0x37e   :  { %415 = vmax.xlane.f32.xlu0 %v414_v42 }
 0x387   :  { %502 = vrot.lane.b32.xlu1 %v3183_v4, %s3060_s2 }
 0x38b   :  { %550 = vrot.lane.b32.xlu1 %v3187_v5, %s3060_s2 }
 0x38f   :  { %598 = vrot.lane.b32.xlu1 %v3190_v6, %s3060_s2 }
 0x3fb   :  { %v407_v43 = vpop.xlane.xlu0 %406 }
 0x3fc   :  { %v417_v44 = vsub.f32 %v256_v20, %v407_v43 }
 0x3fe   :  { %v421_v47 = vmul.f32 1.442695, %v417_v44 }
 0x401   :  { %v413_v45 = vpop.xlane.xlu0 %412 }
 0x402   :  { %v419_v46 = vsub.f32 %v352_v26, %v413_v45 }
 0x403   :  { %v410_v48 = vpop.xlane.xlu1 %409 }
 0x404   :  { %v425_v49 = vmul.f32 1.442695, %v419_v46  ;;  %v418_v50 = vsub.f32 %v304_v30, %v410_v48 }
 0x406   :  { %2940 = vpow2.f32 %v425_v49  ;;  %v423_v51 = vmul.f32 1.442695, %v418_v50 }
 0x407   :  { %2942 = vpow2.f32 %v421_v47  ;;  %v503_v52 = vpop.permute.xlu1 %502 }
 0x408   :  { %2944 = vpow2.f32 %v423_v51  ;;  %v508_v53 = vsel %vm458_vm4, %v503_v52, 0 }
 0x409   :  { %2701 = vmatpush3.bf16.msra.mxu0 %v508_v53 }
 0x40a   :  { %2712 = vmatprep.subr.bf16.mxu0 %v3056_v62 }
 0x40b   :  { %v416_v60 = vpop.xlane.xlu0 %415  ;;  %v551_v3 = vpop.permute.xlu1 %550 }
 0x40c   :  { %v420_v61 = vsub.f32 %v400_v38, %v416_v60  ;;  %v556_v22 = vsel %vm458_vm4, %v551_v3, 0 }
 0x40e   :  { %v427_v63 = vmul.f32 1.442695, %v420_v61 }
 0x40f   :  { %v599_v7 = vpop.permute.xlu1 %598 }
 0x410   :  { %v2941_v54 = vpop.eup %2940  ;;  %2946 = vpow2.f32 %v427_v63  ;;  %v604_v19 = vsel %vm458_vm4, %v599_v7, 0 }
 0x411   :  { %v2943_v55 = vpop.eup %2942  ;;  %v435_v56 = vsel %vm214_vm2, %v2941_v54, 0.0 }
 0x412   :  { %v2945_v57 = vpop.eup %2944  ;;  %436 = vadd.xlane.f32.xlu0 %v435_v56  ;;  %v429_v59 = vsel %vm214_vm2, %v2943_v55, 0.0 }
 0x413   :  { %v432_v58 = vsel %vm214_vm2, %v2945_v57, 0.0 }
 0x414   :  { %433 = vadd.xlane.f32.xlu1 %v432_v58 }
 0x416   :  { %430 = vadd.xlane.f32.xlu0 %v429_v59 }
 0x41a   :  { %v2947_v0 = vpop.eup %2946 }
 0x41b   :  { %v438_v2 = vsel %vm214_vm2, %v2947_v0, 0.0 }
 0x425   :  { %702 = vrot.lane.b32.xlu1 %v3183_v4, %s3061_s18 }
 0x42c   :  { %453 = vrot.lane.b32.xlu0 %v3181_v1, %s3060_s2 }
 0x430   :  { %652 = vrot.lane.b32.xlu0 %v3181_v1, %s3061_s18 }
 0x434   :  { %650 = vrot.lane.b32.xlu0 %v3181_v1, %s3062_s19 }
 0x438   :  { %752 = vrot.lane.b32.xlu0 %v3187_v5, %s3061_s18 }
 0x43c   :  { %750 = vrot.lane.b32.xlu0 %v3187_v5, %s3062_s19 }
 0x449   :  { %439 = vadd.xlane.f32.xlu1 %v438_v2 }
 0x45a   :  { %700 = vrot.lane.b32.xlu1 %v3183_v4, %s3062_s19 }
 0x45e   :  { %802 = vrot.lane.b32.xlu1 %v3190_v6, %s3061_s18 }
 0x462   :  { %800 = vrot.lane.b32.xlu1 %v3190_v6, %s3062_s19 }
 0x49f   :  { %v437_v8 = vpop.xlane.xlu0 %436 }
 0x4a1   :  { %v434_v9 = vpop.xlane.xlu1 %433 }
 0x4a2   :  { %2948 = vrcp.f32 %v434_v9 }
 0x4a3   :  { %v431_v10 = vpop.xlane.xlu0 %430 }
 0x4a4   :  { %2950 = vrcp.f32 %v431_v10 }
 0x4a5   :  { %2952 = vrcp.f32 %v437_v8  ;;  %v703_v31 = vpop.permute.xlu1 %702 }
 0x4a6   :  { %v708_v37 = vsel %vm214_vm2, %v703_v31, 0 }
 0x4a7   :  { %v454_v11 = vpop.permute.xlu0 %453 }
 0x4a8   :  { %v460_v12 = vsel %vm458_vm4, %v454_v11, 0 }
 0x4a9   :  { %2695 = vmatpush3.bf16.msra.mxu1 %v460_v12 }
 0x4aa   :  { %2706 = vmatprep.subr.bf16.mxu1 %v3056_v62 }
 0x4ab   :  { %v653_v24 = vpop.permute.xlu0 %652 }
 0x4ac   :  { %v2949_v13 = vpop.eup %2948  ;;  %v658_v27 = vsel %vm214_vm2, %v653_v24, 0 }
 0x4ad   :  { %v446_v14 = vmul.f32 %v2949_v13, %v2945_v57 }
 0x4ae   :  { %v2951_v15 = vpop.eup %2950 }
 0x4af   :  { %v445_v16 = vmul.f32 %v2951_v15, %v2943_v55  ;;  %v450_v17 = vpack.c.bf16 %v446_v14, %v446_v14  ;;  %v2953_v21 = vpop.eup %2952  ;;  %v651_v26 = vpop.permute.xlu0 %650 }
 0x4b0   :  { %v447_v23 = vmul.f32 %v2953_v21, %v2941_v54 }
 0x4b1   :  { %2703 = vmatmul.mubr.msk.bf16.vlgmr.msra.gmra.mrb[16].mxu0 %vm214_vm2, %v450_v17  ;;  %v449_v20 = vpack.c.bf16 %v445_v16, %v445_v16 }
 0x4b2   :  { %2713 = vmatpush3.bf16.msra.mxu0 %v604_v19  ;;  %2714 = vmatprep.mubr.msk.bf16.mxu0 %vm3057_vm1, %v3056_v62  ;;  %v451_v25 = vpack.c.bf16 %v447_v23, %v447_v23 }
 0x4b3   :  { %2697 = vmatmul.mubr.msk.bf16.vlgmr.msra.gmra.mrb[4].mxu1 %vm214_vm2, %v449_v20  ;;  %2724 = vmatprep.subr.bf16.mxu0 %v3056_v62  ;;  %v753_v28 = vpop.permute.xlu0 %752 }
 0x4b4   :  { %2707 = vmatpush3.bf16.msra.mxu1 %v556_v22  ;;  %2708 = vmatprep.mubr.msk.bf16.mxu1 %vm3057_vm1, %v3056_v62  ;;  %v758_v29 = vsel %vm214_vm2, %v753_v28, 0 }
 0x4b5   :  { %2718 = vmatprep.subr.bf16.mxu1 %v3056_v62 }
 0x4b7   :  { %v751_v30 = vpop.permute.xlu0 %750 }
 0x4bb   :  { %2709 = vmatmul.mubr.msk.bf16.vlgmr.msra.gmra.mrb[8].mxu1 %vm214_vm2, %v451_v25 }
 0x4bc   :  { %2720 = vmatprep.mubr.msk.bf16.mxu1 %vm3057_vm1, %v3056_v62 }
 0x4bd   :  { %2719 = vmatpush3.bf16.xpose.msra.mxu1 %v658_v27 }
 0x4be   :  { %2730 = vmatprep.subr.bf16.mxu1 %v3056_v62 }
 0x4c4   :  { %2721 = vmatmul.mubr.msk.bf16.vlgmr.msra.gmra.mrb[12].mxu1 %vm214_vm2, %v651_v26 }
 0x4c5   :  { %2731 = vmatpush3.bf16.xpose.msra.mxu1 %v758_v29  ;;  %2732 = vmatprep.mubr.msk.bf16.mxu1 %vm3057_vm1, %v3056_v62 }
 0x4c6   :  { %2742 = vmatprep.subr.bf16.mxu1 %v3056_v62 }
 0x4cc   :  { %2733 = vmatmul.mubr.msk.bf16.vlgmr.msra.gmra.mrb[16].mxu1 %vm214_vm2, %v751_v30 }
 0x4cd   :  { %2744 = vmatprep.mubr.msk.bf16.mxu1 %vm3057_vm1, %v3056_v62 }
 0x4d6   :  { %v440_v32 = vpop.xlane.xlu1 %439 }
 0x4d7   :  { %2954 = vrcp.f32 %v440_v32 }
 0x4da   :  { %v701_v36 = vpop.permute.xlu1 %700 }
 0x4de   :  { %v803_v38 = vpop.permute.xlu1 %802 }
 0x4df   :  { %v808_v39 = vsel %vm214_vm2, %v803_v38, 0 }
 0x4e1   :  { %v2955_v33 = vpop.eup %2954 }
 0x4e2   :  { %v448_v34 = vmul.f32 %v2955_v33, %v2947_v0  ;;  %v801_v40 = vpop.permute.xlu1 %800 }
 0x4e4   :  { %v452_v35 = vpack.c.bf16 %v448_v34, %v448_v34 }
 0x4e6   :  { %2715 = vmatmul.mubr.msk.bf16.vlgmr.msra.gmra.mrb[20].mxu0 %vm214_vm2, %v452_v35 }
 0x4e7   :  { %2725 = vmatpush3.bf16.xpose.msra.mxu0 %v708_v37  ;;  %2726 = vmatprep.mubr.msk.bf16.mxu0 %vm3057_vm1, %v3056_v62 }
 0x4e8   :  { %2736 = vmatprep.subr.bf16.mxu0 %v3056_v62 }
 0x4ee   :  { %2727 = vmatmul.mubr.msk.bf16.vlgmr.msra.gmra.mrb[24].mxu0 %vm214_vm2, %v701_v36 }
 0x4ef   :  { %2737 = vmatpush3.bf16.xpose.msra.mxu0 %v808_v39  ;;  %2738 = vmatprep.mubr.msk.bf16.mxu0 %vm3057_vm1, %v3056_v62 }
 0x4f0   :  { %2748 = vmatprep.subr.bf16.mxu0 %v3056_v62 }
 0x4f6   :  { %2739 = vmatmul.mubr.msk.bf16.vlgmr.msra.gmra.mrb[28].mxu0 %vm214_vm2, %v801_v40 }
 0x4f7   :  { %2750 = vmatprep.mubr.msk.bf16.mxu0 %vm3057_vm1, %v3056_v62 }
 0x584   :  { %v544_v41 = vpop.f32.mrb[16].mxu0 }
 0x585   :  { %v2704_v42 = vpop.f32.mrb[17].mxu0 }
 0x586   :  { %v496_v43 = vpop.f32.mrb[4].mxu1  ;;  %v547_v44 = vpop.f32.mrb[18].mxu0 }
 0x587   :  { %v646_v45 = vpack.c.bf16 %v544_v41, %v496_v43  ;;  %v2698_v46 = vpop.f32.mrb[5].mxu1  ;;  %v2705_v47 = vpop.f32.mrb[19].mxu0 }
 0x588   :  { %v499_v48 = vpop.f32.mrb[6].mxu1 }
 0x589   :  { %648 = vst.msk [vmem:[#allocation2] sm:$0xff] %vm214_vm2, %v646_v45  ;;  %v2699_v49 = vpop.f32.mrb[7].mxu1 }
 0x58e   :  { %v592_v50 = vpop.f32.mrb[8].mxu1 }
 0x58f   :  { %v2710_v51 = vpop.f32.mrb[9].mxu1 }
 0x590   :  { %v595_v52 = vpop.f32.mrb[10].mxu1 }
 0x591   :  { %v2711_v53 = vpop.f32.mrb[11].mxu1 }
 0x597   :  { %v694_v54 = vpop.f32.mrb[12].mxu1 }
 0x598   :  { %v695_v55 = vadd.f32 %v694_v54, %v3217_v18  ;;  %v2722_v56 = vpop.f32.mrb[13].mxu1 }
 0x599   :  { %v697_v57 = vpop.f32.mrb[14].mxu1 }
 0x59a   :  { %v2723_v58 = vpop.f32.mrb[15].mxu1  ;;  %v850_v59 = vsel %vm214_vm2, %v695_v55, -inf }
 0x59b   :  { %851 = vmax.xlane.f32.xlu0 %v850_v59 }
 0x59f   :  { %v794_v60 = vpop.f32.mrb[16].mxu1 }
 0x5a0   :  { %v795_v61 = vadd.f32 %v794_v60, %v3217_v18  ;;  %v2734_v63 = vpop.f32.mrb[17].mxu1 }
 0x5a1   :  { %v797_v0 = vpop.f32.mrb[18].mxu1 }
 0x5a2   :  { %v2735_v2 = vpop.f32.mrb[19].mxu1  ;;  %v856_v3 = vsel %vm214_vm2, %v795_v61, -inf }
 0x5a3   :  { %857 = vmax.xlane.f32.xlu0 %v856_v3 }
 0x5b9   :  { %v640_v7 = vpop.f32.mrb[20].mxu0 }
 0x5ba   :  { %v647_v8 = vpack.c.bf16 %v640_v7, %v592_v50  ;;  %v2716_v9 = vpop.f32.mrb[21].mxu0 }
 0x5bb   :  { %v643_v10 = vpop.f32.mrb[22].mxu0 }
 0x5bc   :  { %649 = vst.msk [vmem:[#allocation2 + $0x8] sm:$0xff] %vm214_vm2, %v647_v8  ;;  %v2717_v11 = vpop.f32.mrb[23].mxu0 }
 0x5c1   :  { %v744_v12 = vpop.f32.mrb[24].mxu0 }
 0x5c2   :  { %v745_v13 = vadd.f32 %v744_v12, %v3217_v18  ;;  %v2728_v14 = vpop.f32.mrb[25].mxu0 }
 0x5c3   :  { %v747_v15 = vpop.f32.mrb[26].mxu0 }
 0x5c4   :  { %v2729_v16 = vpop.f32.mrb[27].mxu0  ;;  %v853_v17 = vsel %vm214_vm2, %v745_v13, -inf }
 0x5c5   :  { %854 = vmax.xlane.f32.xlu1 %v853_v17 }
 0x5c9   :  { %v844_v19 = vpop.f32.mrb[28].mxu0 }
 0x5ca   :  { %v845_v20 = vadd.f32 %v844_v19, %v3217_v18  ;;  %v2740_v21 = vpop.f32.mrb[29].mxu0 }
 0x5cb   :  { %v847_v22 = vpop.f32.mrb[30].mxu0 }
 0x5cc   :  { %v2741_v23 = vpop.f32.mrb[31].mxu0  ;;  %v859_v24 = vsel %vm214_vm2, %v845_v20, -inf }
 0x5cd   :  { %860 = vmax.xlane.f32.xlu0 %v859_v24 }
 0x5d6   :  { %946 = vrot.lane.b32.xlu1 %v3183_v4, %s3063_s20 }
 0x5da   :  { %994 = vrot.lane.b32.xlu1 %v3187_v5, %s3063_s20 }
 0x5de   :  { %1042 = vrot.lane.b32.xlu1 %v3190_v6, %s3063_s20 }
 0x628   :  { %v852_v25 = vpop.xlane.xlu0 %851 }
 0x629   :  { %v862_v26 = vsub.f32 %v695_v55, %v852_v25 }
 0x62b   :  { %v866_v27 = vmul.f32 1.442695, %v862_v26 }
 0x62d   :  { %2956 = vpow2.f32 %v866_v27 }
 0x630   :  { %v858_v32 = vpop.xlane.xlu0 %857 }
 0x631   :  { %v864_v36 = vsub.f32 %v795_v61, %v858_v32 }
 0x633   :  { %v870_v37 = vmul.f32 1.442695, %v864_v36 }
 0x637   :  { %v2957_v28 = vpop.eup %2956 }
 0x638   :  { %v874_v29 = vsel %vm214_vm2, %v2957_v28, 0.0 }
 0x639   :  { %875 = vadd.xlane.f32.xlu0 %v874_v29 }
 0x64f   :  { %898 = vrot.lane.b32.xlu0 %v3181_v1, %s3063_s20 }
 0x652   :  { %v855_v30 = vpop.xlane.xlu1 %854 }
 0x653   :  { %v863_v31 = vsub.f32 %v745_v13, %v855_v30 }
 0x655   :  { %v868_v33 = vmul.f32 1.442695, %v863_v31 }
 0x656   :  { %v947_v34 = vpop.permute.xlu1 %946 }
 0x657   :  { %2958 = vpow2.f32 %v868_v33  ;;  %v952_v35 = vsel %vm458_vm4, %v947_v34, 0 }
 0x658   :  { %2749 = vmatpush3.bf16.msra.mxu0 %v952_v35  ;;  %2960 = vpow2.f32 %v870_v37 }
 0x659   :  { %2760 = vmatprep.subr.bf16.mxu0 %v3056_v62 }
 0x65a   :  { %v861_v42 = vpop.xlane.xlu0 %860  ;;  %v995_v52 = vpop.permute.xlu1 %994 }
 0x65b   :  { %v865_v43 = vsub.f32 %v845_v20, %v861_v42  ;;  %v1000_v54 = vsel %vm458_vm4, %v995_v52, 0 }
 0x65d   :  { %v872_v44 = vmul.f32 1.442695, %v865_v43 }
 0x65e   :  { %v1043_v55 = vpop.permute.xlu1 %1042 }
 0x65f   :  { %2962 = vpow2.f32 %v872_v44  ;;  %v1048_v61 = vsel %vm458_vm4, %v1043_v55, 0 }
 0x661   :  { %v2959_v38 = vpop.eup %2958 }
 0x662   :  { %v877_v39 = vsel %vm214_vm2, %v2959_v38, 0.0  ;;  %v2961_v40 = vpop.eup %2960 }
 0x663   :  { %878 = vadd.xlane.f32.xlu1 %v877_v39  ;;  %v880_v41 = vsel %vm214_vm2, %v2961_v40, 0.0 }
 0x669   :  { %v2963_v45 = vpop.eup %2962 }
 0x66a   :  { %v883_v46 = vsel %vm214_vm2, %v2963_v45, 0.0 }
 0x66e   :  { %881 = vadd.xlane.f32.xlu0 %v880_v41 }
 0x674   :  { %1155 = vrot.lane.b32.xlu1 %v3183_v4, %s3064_s21 }
 0x684   :  { %1105 = vrot.lane.b32.xlu0 %v3181_v1, %s3064_s21 }
 0x688   :  { %1103 = vrot.lane.b32.xlu0 %v3181_v1, %s3065_s22 }
 0x68c   :  { %1205 = vrot.lane.b32.xlu0 %v3187_v5, %s3064_s21 }
 0x690   :  { %1203 = vrot.lane.b32.xlu0 %v3187_v5, %s3065_s22 }
 0x698   :  { %884 = vadd.xlane.f32.xlu1 %v883_v46 }
 0x6a9   :  { %1153 = vrot.lane.b32.xlu1 %v3183_v4, %s3065_s22 }
 0x6ad   :  { %1255 = vrot.lane.b32.xlu1 %v3190_v6, %s3064_s21 }
 0x6b1   :  { %1253 = vrot.lane.b32.xlu1 %v3190_v6, %s3065_s22 }
 0x6c6   :  { %v876_v47 = vpop.xlane.xlu0 %875 }
 0x6c7   :  { %2964 = vrcp.f32 %v876_v47 }
 0x6ca   :  { %v899_v48 = vpop.permute.xlu0 %898 }
 0x6cb   :  { %v904_v49 = vsel %vm458_vm4, %v899_v48, 0 }
 0x6cc   :  { %2743 = vmatpush3.bf16.msra.mxu1 %v904_v49 }
 0x6cd   :  { %2754 = vmatprep.subr.bf16.mxu1 %v3056_v62 }
 0x6d1   :  { %v2965_v50 = vpop.eup %2964 }
 0x6d2   :  { %v890_v51 = vmul.f32 %v2965_v50, %v2957_v28 }
 0x6d4   :  { %v894_v53 = vpack.c.bf16 %v890_v51, %v890_v51 }
 0x6d6   :  { %2745 = vmatmul.mubr.msk.bf16.vlgmr.msra.gmra.mrb[20].mxu1 %vm214_vm2, %v894_v53 }
 0x6d7   :  { %2755 = vmatpush3.bf16.msra.mxu1 %v1000_v54  ;;  %2756 = vmatprep.mubr.msk.bf16.mxu1 %vm3057_vm1, %v3056_v62 }
 0x6d8   :  { %2766 = vmatprep.subr.bf16.mxu1 %v3056_v62 }
 0x6f0   :  { %v879_v56 = vpop.xlane.xlu1 %878 }
 0x6f1   :  { %2966 = vrcp.f32 %v879_v56 }
 0x6f4   :  { %v1156_v12 = vpop.permute.xlu1 %1155 }
 0x6f5   :  { %v1161_v19 = vsel %vm214_vm2, %v1156_v12, 0 }
 0x6fb   :  { %v2967_v57 = vpop.eup %2966  ;;  %v882_v58 = vpop.xlane.xlu0 %881 }
 0x6fc   :  { %v891_v59 = vmul.f32 %v2967_v57, %v2959_v38  ;;  %2968 = vrcp.f32 %v882_v58 }
 0x6fe   :  { %v895_v60 = vpack.c.bf16 %v891_v59, %v891_v59 }
 0x6ff   :  { %v1106_v63 = vpop.permute.xlu0 %1105 }
 0x700   :  { %2751 = vmatmul.mubr.msk.bf16.vlgmr.msra.gmra.mrb[32].mxu0 %vm214_vm2, %v895_v60  ;;  %v1111_v8 = vsel %vm214_vm2, %v1106_v63, 0 }
 0x701   :  { %2761 = vmatpush3.bf16.msra.mxu0 %v1048_v61  ;;  %2762 = vmatprep.mubr.msk.bf16.mxu0 %vm3057_vm1, %v3056_v62 }
 0x702   :  { %2772 = vmatprep.subr.bf16.mxu0 %v3056_v62 }
 0x703   :  { %v1104_v7 = vpop.permute.xlu0 %1103 }
 0x706   :  { %v2969_v0 = vpop.eup %2968 }
 0x707   :  { %v892_v2 = vmul.f32 %v2969_v0, %v2961_v40  ;;  %v1206_v9 = vpop.permute.xlu0 %1205 }
 0x708   :  { %v1211_v10 = vsel %vm214_vm2, %v1206_v9, 0 }
 0x709   :  { %v896_v3 = vpack.c.bf16 %v892_v2, %v892_v2 }
 0x70b   :  { %2757 = vmatmul.mubr.msk.bf16.vlgmr.msra.gmra.mrb[24].mxu1 %vm214_vm2, %v896_v3  ;;  %v1204_v11 = vpop.permute.xlu0 %1203 }
 0x70c   :  { %2767 = vmatpush3.bf16.xpose.msra.mxu1 %v1111_v8  ;;  %2768 = vmatprep.mubr.msk.bf16.mxu1 %vm3057_vm1, %v3056_v62 }
 0x70d   :  { %2778 = vmatprep.subr.bf16.mxu1 %v3056_v62 }
 0x713   :  { %2769 = vmatmul.mubr.msk.bf16.vlgmr.msra.gmra.mrb[28].mxu1 %vm214_vm2, %v1104_v7 }
 0x714   :  { %2779 = vmatpush3.bf16.xpose.msra.mxu1 %v1211_v10  ;;  %2780 = vmatprep.mubr.msk.bf16.mxu1 %vm3057_vm1, %v3056_v62 }
 0x715   :  { %2790 = vmatprep.subr.bf16.mxu1 %v3056_v62 }
 0x71b   :  { %2781 = vmatmul.mubr.msk.bf16.vlgmr.msra.gmra.mrb[32].mxu1 %vm214_vm2, %v1204_v11 }
 0x71c   :  { %2792 = vmatprep.mubr.msk.bf16.mxu1 %vm3057_vm1, %v3056_v62 }
 0x725   :  { %v885_v13 = vpop.xlane.xlu1 %884 }
 0x726   :  { %2970 = vrcp.f32 %v885_v13 }
 0x729   :  { %v1154_v17 = vpop.permute.xlu1 %1153 }
 0x72d   :  { %v1256_v20 = vpop.permute.xlu1 %1255 }
 0x72e   :  { %v1261_v21 = vsel %vm214_vm2, %v1256_v20, 0 }
 0x730   :  { %v2971_v14 = vpop.eup %2970 }
 0x731   :  { %v893_v15 = vmul.f32 %v2971_v14, %v2963_v45  ;;  %v1254_v22 = vpop.permute.xlu1 %1253 }
 0x733   :  { %v897_v16 = vpack.c.bf16 %v893_v15, %v893_v15 }
 0x735   :  { %2763 = vmatmul.mubr.msk.bf16.vlgmr.msra.gmra.mrb[36].mxu0 %vm214_vm2, %v897_v16 }
 0x736   :  { %2773 = vmatpush3.bf16.xpose.msra.mxu0 %v1161_v19  ;;  %2774 = vmatprep.mubr.msk.bf16.mxu0 %vm3057_vm1, %v3056_v62 }
 0x737   :  { %2784 = vmatprep.subr.bf16.mxu0 %v3056_v62 }
 0x73d   :  { %2775 = vmatmul.mubr.msk.bf16.vlgmr.msra.gmra.mrb[40].mxu0 %vm214_vm2, %v1154_v17 }
 0x73e   :  { %2785 = vmatpush3.bf16.xpose.msra.mxu0 %v1261_v21  ;;  %2786 = vmatprep.mubr.msk.bf16.mxu0 %vm3057_vm1, %v3056_v62 }
 0x73f   :  { %2796 = vmatprep.subr.bf16.mxu0 %v3056_v62 }
 0x745   :  { %2787 = vmatmul.mubr.msk.bf16.vlgmr.msra.gmra.mrb[44].mxu0 %vm214_vm2, %v1254_v22 }
 0x746   :  { %2798 = vmatprep.mubr.msk.bf16.mxu0 %vm3057_vm1, %v3056_v62 }
 0x7a9   :  { %v3353_v23 = vpop.f32.mrb[20].mxu1 }
 0x7aa   :  { %v2746_v24 = vpop.f32.mrb[21].mxu1 }
 0x7ab   :  { %v943_v25 = vpop.f32.mrb[22].mxu1 }
 0x7ac   :  { %v2747_v26 = vpop.f32.mrb[23].mxu1 }
 0x7d3   :  { %v3355_v27 = vpop.f32.mrb[32].mxu0 }
 0x7d4   :  { %v1090_v28 = vpack.c.bf16 %v3355_v27, %v3353_v23  ;;  %v2752_v29 = vpop.f32.mrb[33].mxu0 }
 0x7d5   :  { %v991_v30 = vpop.f32.mrb[34].mxu0 }
 0x7d6   :  { %v2753_v31 = vpop.f32.mrb[35].mxu0 }
 0x7de   :  { %v3359_v32 = vpop.f32.mrb[24].mxu1 }
 0x7df   :  { %v2758_v33 = vpop.f32.mrb[25].mxu1 }
 0x7e0   :  { %v1039_v34 = vpop.f32.mrb[26].mxu1 }
 0x7e1   :  { %v2759_v35 = vpop.f32.mrb[27].mxu1 }
 0x7e6   :  { %v1147_v36 = vpop.f32.mrb[28].mxu1 }
 0x7e7   :  { %v1148_v37 = vadd.f32 %v1147_v36, %v3217_v18  ;;  %v2770_v38 = vpop.f32.mrb[29].mxu1 }
 0x7e8   :  { %v1150_v39 = vpop.f32.mrb[30].mxu1 }
 0x7e9   :  { %v2771_v40 = vpop.f32.mrb[31].mxu1  ;;  %v1303_v41 = vsel %vm214_vm2, %v1148_v37, -inf }
 0x7ea   :  { %1304 = vmax.xlane.f32.xlu0 %v1303_v41 }
 0x7ee   :  { %v1247_v42 = vpop.f32.mrb[32].mxu1 }
 0x7ef   :  { %v1248_v43 = vadd.f32 %v1247_v42, %v3217_v18  ;;  %v2782_v44 = vpop.f32.mrb[33].mxu1 }
 0x7f0   :  { %v1250_v45 = vpop.f32.mrb[34].mxu1 }
 0x7f1   :  { %v2783_v46 = vpop.f32.mrb[35].mxu1  ;;  %v1309_v47 = vsel %vm214_vm2, %v1248_v43, -inf }
 0x7f2   :  { %1310 = vmax.xlane.f32.xlu0 %v1309_v47 }
 0x808   :  { %v3365_v48 = vpop.f32.mrb[36].mxu0 }
 0x809   :  { %v1091_v49 = vpack.c.bf16 %v3365_v48, %v3359_v32  ;;  %v2764_v50 = vpop.f32.mrb[37].mxu0 }
 0x80a   :  { %v1087_v51 = vpop.f32.mrb[38].mxu0 }
 0x80b   :  { %v2765_v52 = vpop.f32.mrb[39].mxu0 }
 0x810   :  { %v1197_v53 = vpop.f32.mrb[40].mxu0 }
 0x811   :  { %v1198_v54 = vadd.f32 %v1197_v53, %v3217_v18  ;;  %v2776_v55 = vpop.f32.mrb[41].mxu0 }
 0x812   :  { %v1200_v56 = vpop.f32.mrb[42].mxu0 }
 0x813   :  { %v2777_v57 = vpop.f32.mrb[43].mxu0  ;;  %v1306_v58 = vsel %vm214_vm2, %v1198_v54, -inf }
 0x814   :  { %1307 = vmax.xlane.f32.xlu1 %v1306_v58 }
 0x818   :  { %v1297_v59 = vpop.f32.mrb[44].mxu0 }
 0x819   :  { %v1298_v60 = vadd.f32 %v1297_v59, %v3217_v18  ;;  %v2788_v61 = vpop.f32.mrb[45].mxu0 }
 0x81a   :  { %v1300_v63 = vpop.f32.mrb[46].mxu0 }
 0x81b   :  { %v2789_v0 = vpop.f32.mrb[47].mxu0  ;;  %v1312_v2 = vsel %vm214_vm2, %v1298_v60, -inf }
 0x81c   :  { %1313 = vmax.xlane.f32.xlu0 %v1312_v2 }
 0x825   :  { %1399 = vrot.lane.b32.xlu1 %v3183_v4, %s3066_s23 }
 0x829   :  { %1447 = vrot.lane.b32.xlu1 %v3187_v5, %s3066_s23 }
 0x82d   :  { %1495 = vrot.lane.b32.xlu1 %v3190_v6, %s3066_s23 }
 0x877   :  { %v1305_v3 = vpop.xlane.xlu0 %1304 }
 0x878   :  { %v1315_v7 = vsub.f32 %v1148_v37, %v1305_v3 }
 0x87a   :  { %v1319_v8 = vmul.f32 1.442695, %v1315_v7 }
 0x87c   :  { %2972 = vpow2.f32 %v1319_v8 }
 0x87f   :  { %v1311_v13 = vpop.xlane.xlu0 %1310 }
 0x880   :  { %v1317_v17 = vsub.f32 %v1248_v43, %v1311_v13 }
 0x882   :  { %v1323_v19 = vmul.f32 1.442695, %v1317_v17 }
 0x886   :  { %v2973_v9 = vpop.eup %2972 }
 0x887   :  { %v1327_v10 = vsel %vm214_vm2, %v2973_v9, 0.0 }
 0x888   :  { %1328 = vadd.xlane.f32.xlu0 %v1327_v10 }
 0x89e   :  { %1351 = vrot.lane.b32.xlu0 %v3181_v1, %s3066_s23 }
 0x8a1   :  { %v1308_v11 = vpop.xlane.xlu1 %1307 }
 0x8a2   :  { %v1316_v12 = vsub.f32 %v1198_v54, %v1308_v11 }
 0x8a4   :  { %v1321_v14 = vmul.f32 1.442695, %v1316_v12 }
 0x8a5   :  { %v1400_v15 = vpop.permute.xlu1 %1399 }
 0x8a6   :  { %2974 = vpow2.f32 %v1321_v14  ;;  %v1405_v16 = vsel %vm458_vm4, %v1400_v15, 0 }
 0x8a7   :  { %2797 = vmatpush3.bf16.msra.mxu0 %v1405_v16  ;;  %2976 = vpow2.f32 %v1323_v19 }
 0x8a8   :  { %2808 = vmatprep.subr.bf16.mxu0 %v3056_v62 }
 0x8a9   :  { %v1314_v25 = vpop.xlane.xlu0 %1313  ;;  %v1448_v38 = vpop.permute.xlu1 %1447 }
 0x8aa   :  { %v1318_v26 = vsub.f32 %v1298_v60, %v1314_v25  ;;  %v1453_v40 = vsel %vm458_vm4, %v1448_v38, 0 }
 0x8ac   :  { %v1325_v29 = vmul.f32 1.442695, %v1318_v26 }
 0x8ad   :  { %v1496_v41 = vpop.permute.xlu1 %1495 }
 0x8ae   :  { %2978 = vpow2.f32 %v1325_v29  ;;  %v1501_v47 = vsel %vm458_vm4, %v1496_v41, 0 }
 0x8b0   :  { %v2975_v20 = vpop.eup %2974 }
 0x8b1   :  { %v1330_v21 = vsel %vm214_vm2, %v2975_v20, 0.0  ;;  %v2977_v22 = vpop.eup %2976 }
 0x8b2   :  { %1331 = vadd.xlane.f32.xlu1 %v1330_v21  ;;  %v1333_v24 = vsel %vm214_vm2, %v2977_v22, 0.0 }
 0x8b8   :  { %v2979_v30 = vpop.eup %2978 }
 0x8b9   :  { %v1336_v31 = vsel %vm214_vm2, %v2979_v30, 0.0 }
 0x8bd   :  { %1334 = vadd.xlane.f32.xlu0 %v1333_v24 }
 0x8c3   :  { %1608 = vrot.lane.b32.xlu1 %v3183_v4, %s3067_s24 }
 0x8d3   :  { %1558 = vrot.lane.b32.xlu0 %v3181_v1, %s3067_s24 }
 0x8d7   :  { %1556 = vrot.lane.b32.xlu0 %v3181_v1, %s3068_s25 }
 0x8db   :  { %1658 = vrot.lane.b32.xlu0 %v3187_v5, %s3067_s24 }
 0x8df   :  { %1656 = vrot.lane.b32.xlu0 %v3187_v5, %s3068_s25 }
 0x8e7   :  { %1337 = vadd.xlane.f32.xlu1 %v1336_v31 }
 0x8f8   :  { %1606 = vrot.lane.b32.xlu1 %v3183_v4, %s3068_s25 }
 0x8fc   :  { %1708 = vrot.lane.b32.xlu1 %v3190_v6, %s3067_s24 }
 0x900   :  { %1706 = vrot.lane.b32.xlu1 %v3190_v6, %s3068_s25 }
 0x915   :  { %v1329_v33 = vpop.xlane.xlu0 %1328 }
 0x916   :  { %2980 = vrcp.f32 %v1329_v33 }
 0x919   :  { %v1352_v34 = vpop.permute.xlu0 %1351 }
 0x91a   :  { %v1357_v35 = vsel %vm458_vm4, %v1352_v34, 0 }
 0x91b   :  { %2791 = vmatpush3.bf16.msra.mxu1 %v1357_v35 }
 0x91c   :  { %2802 = vmatprep.subr.bf16.mxu1 %v3056_v62 }
 0x920   :  { %v2981_v36 = vpop.eup %2980 }
 0x921   :  { %v1343_v37 = vmul.f32 %v2981_v36, %v2973_v9 }
 0x923   :  { %v1347_v39 = vpack.c.bf16 %v1343_v37, %v1343_v37 }
 0x925   :  { %2793 = vmatmul.mubr.msk.bf16.vlgmr.msra.gmra.mrb[36].mxu1 %vm214_vm2, %v1347_v39 }
 0x926   :  { %2803 = vmatpush3.bf16.msra.mxu1 %v1453_v40  ;;  %2804 = vmatprep.mubr.msk.bf16.mxu1 %vm3057_vm1, %v3056_v62 }
 0x927   :  { %2814 = vmatprep.subr.bf16.mxu1 %v3056_v62 }
 0x93f   :  { %v1332_v42 = vpop.xlane.xlu1 %1331 }
 0x940   :  { %2982 = vrcp.f32 %v1332_v42 }
 0x943   :  { %v1609_v59 = vpop.permute.xlu1 %1608 }
 0x944   :  { %v1614_v3 = vsel %vm214_vm2, %v1609_v59, 0 }
 0x94a   :  { %v2983_v43 = vpop.eup %2982  ;;  %v1335_v44 = vpop.xlane.xlu0 %1334 }
 0x94b   :  { %v1344_v45 = vmul.f32 %v2983_v43, %v2975_v20  ;;  %2984 = vrcp.f32 %v1335_v44 }
 0x94d   :  { %v1348_v46 = vpack.c.bf16 %v1344_v45, %v1344_v45 }
 0x94e   :  { %v1559_v50 = vpop.permute.xlu0 %1558 }
 0x94f   :  { %2799 = vmatmul.mubr.msk.bf16.vlgmr.msra.gmra.mrb[48].mxu0 %vm214_vm2, %v1348_v46  ;;  %v1564_v55 = vsel %vm214_vm2, %v1559_v50, 0 }
 0x950   :  { %2809 = vmatpush3.bf16.msra.mxu0 %v1501_v47  ;;  %2810 = vmatprep.mubr.msk.bf16.mxu0 %vm3057_vm1, %v3056_v62 }
 0x951   :  { %2820 = vmatprep.subr.bf16.mxu0 %v3056_v62 }
 0x952   :  { %v1557_v54 = vpop.permute.xlu0 %1556 }
 0x955   :  { %v2985_v51 = vpop.eup %2984 }
 0x956   :  { %v1345_v52 = vmul.f32 %v2985_v51, %v2977_v22  ;;  %v1659_v56 = vpop.permute.xlu0 %1658 }
 0x957   :  { %v1664_v57 = vsel %vm214_vm2, %v1659_v56, 0 }
 0x958   :  { %v1349_v53 = vpack.c.bf16 %v1345_v52, %v1345_v52 }
 0x95a   :  { %2805 = vmatmul.mubr.msk.bf16.vlgmr.msra.gmra.mrb[40].mxu1 %vm214_vm2, %v1349_v53  ;;  %v1657_v58 = vpop.permute.xlu0 %1656 }
 0x95b   :  { %2815 = vmatpush3.bf16.xpose.msra.mxu1 %v1564_v55  ;;  %2816 = vmatprep.mubr.msk.bf16.mxu1 %vm3057_vm1, %v3056_v62 }
 0x95c   :  { %2826 = vmatprep.subr.bf16.mxu1 %v3056_v62 }
 0x962   :  { %2817 = vmatmul.mubr.msk.bf16.vlgmr.msra.gmra.mrb[44].mxu1 %vm214_vm2, %v1557_v54 }
 0x963   :  { %2827 = vmatpush3.bf16.xpose.msra.mxu1 %v1664_v57  ;;  %2828 = vmatprep.mubr.msk.bf16.mxu1 %vm3057_vm1, %v3056_v62 }
 0x964   :  { %2838 = vmatprep.subr.bf16.mxu1 %v3056_v62 }
 0x96a   :  { %2829 = vmatmul.mubr.msk.bf16.vlgmr.msra.gmra.mrb[48].mxu1 %vm214_vm2, %v1657_v58 }
 0x96b   :  { %2840 = vmatprep.mubr.msk.bf16.mxu1 %vm3057_vm1, %v3056_v62 }
 0x974   :  { %v1338_v60 = vpop.xlane.xlu1 %1337 }
 0x975   :  { %2986 = vrcp.f32 %v1338_v60 }
 0x978   :  { %v1607_v2 = vpop.permute.xlu1 %1606 }
 0x97c   :  { %v1709_v7 = vpop.permute.xlu1 %1708 }
 0x97d   :  { %v1714_v8 = vsel %vm214_vm2, %v1709_v7, 0 }
 0x97f   :  { %v2987_v61 = vpop.eup %2986 }
 0x980   :  { %v1346_v63 = vmul.f32 %v2987_v61, %v2979_v30  ;;  %v1707_v9 = vpop.permute.xlu1 %1706 }
 0x982   :  { %v1350_v0 = vpack.c.bf16 %v1346_v63, %v1346_v63 }
 0x984   :  { %2811 = vmatmul.mubr.msk.bf16.vlgmr.msra.gmra.mrb[52].mxu0 %vm214_vm2, %v1350_v0 }
 0x985   :  { %2821 = vmatpush3.bf16.xpose.msra.mxu0 %v1614_v3  ;;  %2822 = vmatprep.mubr.msk.bf16.mxu0 %vm3057_vm1, %v3056_v62 }
 0x986   :  { %2832 = vmatprep.subr.bf16.mxu0 %v3056_v62 }
 0x98c   :  { %2823 = vmatmul.mubr.msk.bf16.vlgmr.msra.gmra.mrb[56].mxu0 %vm214_vm2, %v1607_v2 }
 0x98d   :  { %2833 = vmatpush3.bf16.xpose.msra.mxu0 %v1714_v8  ;;  %2834 = vmatprep.mubr.msk.bf16.mxu0 %vm3057_vm1, %v3056_v62 }
 0x98e   :  { %2844 = vmatprep.subr.bf16.mxu0 %v3056_v62 }
 0x994   :  { %2835 = vmatmul.mubr.msk.bf16.vlgmr.msra.gmra.mrb[60].mxu0 %vm214_vm2, %v1707_v9 }
 0x995   :  { %2846 = vmatprep.mubr.msk.bf16.mxu0 %vm3057_vm1, %v3056_v62 }
 0x9f8   :  { %v3429_v10 = vpop.f32.mrb[36].mxu1 }
 0x9f9   :  { %v2794_v11 = vpop.f32.mrb[37].mxu1 }
 0x9fa   :  { %v1396_v12 = vpop.f32.mrb[38].mxu1 }
 0x9fb   :  { %v2795_v13 = vpop.f32.mrb[39].mxu1 }
 0xa22   :  { %v3431_v14 = vpop.f32.mrb[48].mxu0 }
 0xa23   :  { %v1543_v15 = vpack.c.bf16 %v3431_v14, %v3429_v10  ;;  %v2800_v16 = vpop.f32.mrb[49].mxu0 }
 0xa24   :  { %v1444_v17 = vpop.f32.mrb[50].mxu0 }
 0xa25   :  { %v2801_v19 = vpop.f32.mrb[51].mxu0 }
 0xa2d   :  { %v3435_v20 = vpop.f32.mrb[40].mxu1 }
 0xa2e   :  { %v2806_v21 = vpop.f32.mrb[41].mxu1 }
 0xa2f   :  { %v1492_v22 = vpop.f32.mrb[42].mxu1 }
 0xa30   :  { %v2807_v24 = vpop.f32.mrb[43].mxu1 }
 0xa35   :  { %v1600_v25 = vpop.f32.mrb[44].mxu1 }
 0xa36   :  { %v1601_v26 = vadd.f32 %v1600_v25, %v3217_v18  ;;  %v2818_v29 = vpop.f32.mrb[45].mxu1 }
 0xa37   :  { %v1603_v30 = vpop.f32.mrb[46].mxu1 }
 0xa38   :  { %v2819_v31 = vpop.f32.mrb[47].mxu1  ;;  %v1756_v33 = vsel %vm214_vm2, %v1601_v26, -inf }
 0xa39   :  { %1757 = vmax.xlane.f32.xlu0 %v1756_v33 }
 0xa3d   :  { %v1700_v34 = vpop.f32.mrb[48].mxu1 }
 0xa3e   :  { %v1701_v35 = vadd.f32 %v1700_v34, %v3217_v18  ;;  %v2830_v36 = vpop.f32.mrb[49].mxu1 }
 0xa3f   :  { %v1703_v37 = vpop.f32.mrb[50].mxu1 }
 0xa40   :  { %v2831_v38 = vpop.f32.mrb[51].mxu1  ;;  %v1762_v39 = vsel %vm214_vm2, %v1701_v35, -inf }
 0xa41   :  { %1763 = vmax.xlane.f32.xlu0 %v1762_v39 }
 0xa57   :  { %v1537_v40 = vpop.f32.mrb[52].mxu0 }
 0xa58   :  { %v1544_v41 = vpack.c.bf16 %v1537_v40, %v3435_v20  ;;  %v2812_v42 = vpop.f32.mrb[53].mxu0 }
 0xa59   :  { %v1540_v43 = vpop.f32.mrb[54].mxu0 }
 0xa5a   :  { %v2813_v44 = vpop.f32.mrb[55].mxu0 }
 0xa5f   :  { %v1650_v45 = vpop.f32.mrb[56].mxu0 }
 0xa60   :  { %v1651_v46 = vadd.f32 %v1650_v45, %v3217_v18  ;;  %v2824_v47 = vpop.f32.mrb[57].mxu0 }
 0xa61   :  { %v1653_v50 = vpop.f32.mrb[58].mxu0 }
 0xa62   :  { %v2825_v51 = vpop.f32.mrb[59].mxu0  ;;  %v1759_v52 = vsel %vm214_vm2, %v1651_v46, -inf }
 0xa63   :  { %1760 = vmax.xlane.f32.xlu1 %v1759_v52 }
 0xa67   :  { %v1750_v53 = vpop.f32.mrb[60].mxu0 }
 0xa68   :  { %v1751_v54 = vadd.f32 %v1750_v53, %v3217_v18  ;;  %v2836_v55 = vpop.f32.mrb[61].mxu0 }
 0xa69   :  { %v1753_v56 = vpop.f32.mrb[62].mxu0 }
 0xa6a   :  { %v2837_v57 = vpop.f32.mrb[63].mxu0  ;;  %v1765_v58 = vsel %vm214_vm2, %v1751_v54, -inf  ;;  %v2920_v56 = vld [vmem:[%s3631_s4] sm:$0xff]  }
 0xa6b   :  { %1766 = vmax.xlane.f32.xlu0 %v1765_v58  ;;  %v2921_v57 = vld [vmem:[%s3631_s4 + $0x8] sm:$0xff]  }
 0xac6   :  { %v1758_v59 = vpop.xlane.xlu0 %1757 }
 0xac7   :  { %v1768_v60 = vsub.f32 %v1601_v26, %v1758_v59 }
 0xac9   :  { %v1772_v61 = vmul.f32 1.442695, %v1768_v60 }
 0xacb   :  { %2988 = vpow2.f32 %v1772_v61 }
 0xace   :  { %v1764_v63 = vpop.xlane.xlu0 %1763 }
 0xacf   :  { %v1770_v0 = vsub.f32 %v1701_v35, %v1764_v63 }
 0xad1   :  { %v1776_v2 = vmul.f32 1.442695, %v1770_v0 }
 0xad3   :  { %2990 = vpow2.f32 %v1776_v2 }
 0xad5   :  { %v2989_v3 = vpop.eup %2988 }
 0xad6   :  { %v1780_v7 = vsel %vm214_vm2, %v2989_v3, 0.0 }
 0xad7   :  { %1781 = vadd.xlane.f32.xlu0 %v1780_v7 }
 0xadd   :  { %v2991_v8 = vpop.eup %2990 }
 0xade   :  { %v1786_v18 = vsel %vm214_vm2, %v2991_v8, 0.0 }
 0xadf   :  { %1787 = vadd.xlane.f32.xlu0 %v1786_v18  ;;  %v2555_v18 = vld [vmem:[%s3632_s5] ss:$0 sm:$0xff] }
 0xaf0   :  { %v1761_v9 = vpop.xlane.xlu1 %1760 }
 0xaf1   :  { %v1769_v11 = vsub.f32 %v1651_v46, %v1761_v9 }
 0xaf3   :  { %v1774_v12 = vmul.f32 1.442695, %v1769_v11  ;;  %v3028_v11 = vld [vmem:[%s3627_s0 + $0x10] sm:$0xff] }
 0xaf5   :  { %2992 = vpow2.f32 %v1774_v12  ;;  %1804 = vrot.lane.b32.xlu0 %v3181_v1, %s3069_s26 }
 0xaf8   :  { %v1767_v1 = vpop.xlane.xlu0 %1766 }
 0xaf9   :  { %1094 = vrot.lane.b32.xlu0 %v1090_v28, %s3070_s27  ;;  %v1771_v17 = vsub.f32 %v1751_v54, %v1767_v1 }
 0xafb   :  { %v1778_v19 = vmul.f32 1.442695, %v1771_v17 }
 0xafd   :  { %1547 = vrot.lane.b32.xlu0 %v1543_v15, %s3071_s28  ;;  %2994 = vpow2.f32 %v1778_v19 }
 0xaff   :  { %v2993_v13 = vpop.eup %2992 }
 0xb00   :  { %v1783_v16 = vsel %vm214_vm2, %v2993_v13, 0.0 }
 0xb01   :  { %1784 = vadd.xlane.f32.xlu1 %v1783_v16 }
 0xb07   :  { %v2995_v20 = vpop.eup %2994 }
 0xb08   :  { %v1789_v23 = vsel %vm214_vm2, %v2995_v20, 0.0 }
 0xb12   :  { %1852 = vrot.lane.b32.xlu1 %v3183_v4, %s3069_s26 }
 0xb16   :  { %1900 = vrot.lane.b32.xlu1 %v3187_v5, %s3069_s26 }
 0xb3a   :  { %1790 = vadd.xlane.f32.xlu1 %v1789_v23 }
 0xb4b   :  { %1948 = vrot.lane.b32.xlu1 %v3190_v6, %s3069_s26 }
 0xb4f   :  { %1096 = vrot.lane.b32.xlu1 %v1091_v49, %s3070_s27 }
 0xb53   :  { %1549 = vrot.lane.b32.xlu1 %v1544_v41, %s3071_s28 }
 0xb64   :  { %v1782_v27 = vpop.xlane.xlu0 %1781 }
 0xb65   :  { %2996 = vrcp.f32 %v1782_v27 }
 0xb6c   :  { %v1788_v4 = vpop.xlane.xlu0 %1787 }
 0xb6d   :  { %2998 = vrcp.f32 %v1788_v4  ;;  %v3031_v4 = vld [vmem:[%s3627_s0 + $0x18] sm:$0xff] }
 0xb6f   :  { %v2997_v5 = vpop.eup %2996 }
 0xb70   :  { %v1796_v28 = vmul.f32 %v2997_v5, %v2989_v3  ;;  %v1805_v10 = vpop.permute.xlu0 %1804 }
 0xb71   :  { %v1810_v14 = vsel %vm458_vm4, %v1805_v10, 0 }
 0xb72   :  { %2839 = vmatpush3.bf16.msra.mxu1 %v1810_v14  ;;  %v1800_v15 = vpack.c.bf16 %v1796_v28, %v1796_v28 }
 0xb73   :  { %2850 = vmatprep.subr.bf16.mxu1 %v3056_v62 }
 0xb74   :  { %v1095_v6 = vpop.permute.xlu0 %1094 }
 0xb75   :  { %1101 = vst.msk [vmem:[#allocation2] sm:$0xff] %vm1100_vm5, %v1095_v6  ;;  %2841 = vmatmul.mubr.msk.bf16.vlgmr.msra.gmra.mrb[52].mxu1 %vm214_vm2, %v1800_v15 }
 0xb76   :  { %2852 = vmatprep.mubr.msk.bf16.mxu1 %vm3057_vm1, %v3056_v62 }
 0xb77   :  { %v2999_v49 = vpop.eup %2998 }
 0xb78   :  { %v1548_v32 = vpop.permute.xlu0 %1547  ;;  %v1798_v24 = vmul.f32 %v2999_v49, %v2991_v8 }
 0xb79   :  { %1554 = vst.msk [vmem:[#allocation2] sm:$0xff] %vm1553_vm6, %v1548_v32 }
 0xb7a   :  { %v1802_v30 = vpack.c.bf16 %v1798_v24, %v1798_v24 }
 0xb8e   :  { %v1785_v48 = vpop.xlane.xlu1 %1784 }
 0xb8f   :  { %3000 = vrcp.f32 %v1785_v48 }
 0xb92   :  { %v1853_v21 = vpop.permute.xlu1 %1852 }
 0xb93   :  { %v1858_v22 = vsel %vm458_vm4, %v1853_v21, 0 }
 0xb94   :  { %2845 = vmatpush3.bf16.msra.mxu0 %v1858_v22 }
 0xb95   :  { %2856 = vmatprep.subr.bf16.mxu0 %v3056_v62 }
 0xb96   :  { %v1901_v25 = vpop.permute.xlu1 %1900 }
 0xb97   :  { %v1906_v26 = vsel %vm458_vm4, %v1901_v25, 0 }
 0xb98   :  { %2851 = vmatpush3.bf16.msra.mxu1 %v1906_v26 }
 0xb99   :  { %v3001_v29 = vpop.eup %3000  ;;  %2862 = vmatprep.subr.bf16.mxu1 %v2920_v56 }
 0xb9a   :  { %v1797_v31 = vmul.f32 %v3001_v29, %v2993_v13  ;;  %v3029_v13 = vld [vmem:[%s3627_s0] sm:$0xff] }
 0xb9b   :  { %2853 = vmatmul.mubr.msk.bf16.vlgmr.msra.gmra.mrb[56].mxu1 %vm214_vm2, %v1802_v30 }
 0xb9c   :  { %v1801_v33 = vpack.c.bf16 %v1797_v31, %v1797_v31  ;;  %2863 = vmatpush3.bf16.msra.mxu1 %v2920_v56 }
 0xb9d   :  { %2864 = vmatprep.subr.bf16.mxu1 %v2921_v57 }
 0xb9e   :  { %2847 = vmatmul.mubr.msk.bf16.vlgmr.msra.gmra.mrb[64].mxu0 %vm214_vm2, %v1801_v33 }
 0xb9f   :  { %2858 = vmatprep.mubr.msk.bf16.mxu0 %vm3057_vm1, %v3056_v62 }
 0xba0   :  { %2865 = vmatpush3.bf16.msra.mxu1 %v2921_v57 }
 0xbc7   :  { %v1791_v34 = vpop.xlane.xlu1 %1790 }
 0xbc8   :  { %3002 = vrcp.f32 %v1791_v34 }
 0xbcb   :  { %v1949_v35 = vpop.permute.xlu1 %1948 }
 0xbcc   :  { %v1954_v36 = vsel %vm458_vm4, %v1949_v35, 0 }
 0xbcd   :  { %2857 = vmatpush3.bf16.msra.mxu0 %v1954_v36 }
 0xbcf   :  { %v1097_v37 = vpop.permute.xlu1 %1096 }
 0xbd0   :  { %1102 = vst.msk [vmem:[#allocation2 + $0x8] sm:$0xff] %vm1100_vm5, %v1097_v37 }
 0xbd2   :  { %v3003_v38 = vpop.eup %3002 }
 0xbd3   :  { %v1799_v39 = vmul.f32 %v3003_v38, %v2995_v20  ;;  %v1550_v40 = vpop.permute.xlu1 %1549  ;;  %v3030_v20 = vld [vmem:[%s3627_s0 + $0x8] sm:$0xff]  ;;  %s3074_s0 = smov [#allocation3]  }
 0xbd4   :  { %1555 = vst.msk [vmem:[#allocation2 + $0x8] sm:$0xff] %vm1553_vm6, %v1550_v40  ;;  %s2498_s21 = sshll.u32 %s3074_s0, 4  ;;  %s2499_s21 = int_to_ptr.vmem [resolvable:$true] %s2498_s21 }
 0xbd5   :  { %v1803_v41 = vpack.c.bf16 %v1799_v39, %v1799_v39  ;;  %p3037_p1 = scmp.lt.s32.totalorder %s2499_s21, %s2499_s21 }
 0xbd7   :  { %2859 = vmatmul.mubr.msk.bf16.vlgmr.msra.gmra.mrb[68].mxu0 %vm214_vm2, %v1803_v41 }
 0xc48   :  { %v1846_v42 = vpop.f32.mrb[52].mxu1 }
 0xc49   :  { %v2842_v43 = vpop.f32.mrb[53].mxu1 }
 0xc4a   :  { %v1849_v62 = vpop.f32.mrb[54].mxu1  ;;  %v2922_v43 = vld [vmem:[%s3635_s8] sm:$0xff]  }
 0xc4b   :  { %v2843_v44 = vpop.f32.mrb[55].mxu1  ;;  %2870 = vmatprep.subr.bf16.mxu0 %v2922_v43  ;;  %v2923_v62 = vld [vmem:[%s3635_s8 + $0x8] sm:$0xff]  }
 0xc4c   :  { %2871 = vmatpush3.bf16.msra.mxu0 %v2922_v43 }
 0xc4d   :  { %2872 = vmatprep.subr.bf16.mxu0 %v2923_v62 }
 0xc50   :  { %2873 = vmatpush3.bf16.msra.mxu0 %v2923_v62 }
 0xc6e   :  { %v1942_v45 = vpop.f32.mrb[56].mxu1 }
 0xc6f   :  { %v2854_v46 = vpop.f32.mrb[57].mxu1 }
 0xc70   :  { %v1945_v47 = vpop.f32.mrb[58].mxu1 }
 0xc71   :  { %v1894_v50 = vpop.f32.mrb[64].mxu0  ;;  %v2855_v51 = vpop.f32.mrb[59].mxu1 }
 0xc72   :  { %v1996_v52 = vpack.c.bf16 %v1894_v50, %v1846_v42  ;;  %v2848_v53 = vpop.f32.mrb[65].mxu0 }
 0xc73   :  { %v1897_v54 = vpop.f32.mrb[66].mxu0 }
 0xc74   :  { %2000 = vrot.lane.b32.xlu0 %v1996_v52, %s3072_s29  ;;  %v2849_v55 = vpop.f32.mrb[67].mxu0 }
 0xcaa   :  { %v1990_v58 = vpop.f32.mrb[68].mxu0 }
 0xcab   :  { %v1997_v59 = vpack.c.bf16 %v1990_v58, %v1942_v45  ;;  %v2860_v60 = vpop.f32.mrb[69].mxu0 }
 0xcac   :  { %v1993_v61 = vpop.f32.mrb[70].mxu0 }
 0xcad   :  { %2002 = vrot.lane.b32.xlu1 %v1997_v59, %s3072_s29  ;;  %v2861_v63 = vpop.f32.mrb[71].mxu0  ;;  %v2556_v59 = vld [vmem:[%s3633_s6] ss:$0 sm:$0xff] }
 0xce6   :  { %v2001_v0 = vpop.permute.xlu0 %2000 }
 0xce7   :  { %2007 = vst.msk [vmem:[#allocation2] sm:$0xff] %vm2006_vm7, %v2001_v0 }
 0xcee   :  { %v2009_v2 = vld [vmem:[#allocation2] sm:$0xff] }
 0xcef   :  { %2866 = vmatprep.mubr.msk.bf16.mxu1 %vm49_vm0, %v2009_v2 }
 0xd1f   :  { %v2003_v3 = vpop.permute.xlu1 %2002 }
 0xd20   :  { %2008 = vst.msk [vmem:[#allocation2 + $0x8] sm:$0xff] %vm2006_vm7, %v2003_v3  ;;  %v2557_v3 = vld [vmem:[%s3634_s7] ss:$0 sm:$0xff] }
 0xd27   :  { %v2010_v7 = vld [vmem:[#allocation2 + $0x8] sm:$0xff] }
 0xd28   :  { %2867 = vmatmul.mubr.msk.bf16.vlgmr.msra.gmra.mrb[60].mxu1 %vm49_vm0, %v2010_v7 }
 0xdfb   :  { %v2868_v8 = vpop.f32.mrb[60].mxu1 }
 0xdfc   :  { %v2067_v9 = vpop.f32.mrb[61].mxu1  ;;  %v2084_v12 = vadd.f32 %v3028_v11, %v2868_v8 }
 0xdfd   :  { %v2082_v16 = vadd.f32 %v3029_v13, %v2067_v9  ;;  %v2869_v1 = vpop.f32.mrb[62].mxu1 }
 0xdfe   :  { %v2070_v17 = vpop.f32.mrb[63].mxu1  ;;  %v3505_v27 = vadd.f32 %v2555_v18, %v2084_v12  ;;  %v2085_v5 = vadd.f32 %v3031_v4, %v2869_v1  ;;  %v2924_v4 = vld [vmem:[%s3637_s10] sm:$0xff]  }
 0xdff   :  { %v3500_v19 = vadd.f32 %v2555_v18, %v2082_v16  ;;  %v2083_v23 = vadd.f32 %v3030_v20, %v2070_v17  ;;  %2878 = vmatprep.subr.bf16.mxu1 %v2924_v4 }
 0xe00   :  { %v3516_v15 = vadd.f32 %v2555_v18, %v2085_v5  ;;  %v2105_v6 = vsel %vm49_vm0, %v3505_v27, 0.0  ;;  %2879 = vmatpush3.bf16.msra.mxu1 %v2924_v4  ;;  %v2925_v5 = vld [vmem:[%s3637_s10 + $0x8] sm:$0xff]  }
 0xe01   :  { %v3510_v28 = vadd.f32 %v2555_v18, %v2083_v23  ;;  %v2099_v10 = vsel %vm49_vm0, %v3500_v19, 0.0  ;;  %2880 = vmatprep.subr.bf16.mxu1 %v2925_v5 }
 0xe02   :  { %2100 = vadd.xlane.f32.xlu0 %v2099_v10  ;;  %v2108_v32 = vsel %vm49_vm0, %v3516_v15, 0.0  ;;  %v2926_v10 = vld [vmem:[%s3637_s10 + $0x10] sm:$0xff]  }
 0xe03   :  { %v2102_v14 = vsel %vm49_vm0, %v3510_v28, 0.0 }
 0xe04   :  { %2103 = vadd.xlane.f32.xlu1 %v2102_v14  ;;  %2881 = vmatpush3.bf16.msra.mxu1 %v2925_v5  ;;  %v2927_v14 = vld [vmem:[%s3637_s10 + $0x18] sm:$0xff]  }
 0xe05   :  { %2882 = vmatprep.subr.bf16.mxu1 %v2926_v10 }
 0xe06   :  { %2106 = vadd.xlane.f32.xlu0 %v2105_v6  ;;  %v2928_v6 = vld [vmem:[%s3637_s10 + $0x20] sm:$0xff]  }
 0xe08   :  { %2883 = vmatpush3.bf16.msra.mxu1 %v2926_v10 }
 0xe09   :  { %2884 = vmatprep.subr.bf16.mxu1 %v2927_v14 }
 0xe0a   :  { %2109 = vadd.xlane.f32.xlu0 %v2108_v32  ;;  %v2929_v32 = vld [vmem:[%s3637_s10 + $0x28] sm:$0xff]  }
 0xe0c   :  { %2885 = vmatpush3.bf16.msra.mxu1 %v2927_v14 }
 0xe0d   :  { %2886 = vmatprep.subr.bf16.mxu1 %v2928_v6 }
 0xe10   :  { %2887 = vmatpush3.bf16.msra.mxu1 %v2928_v6 }
 0xe11   :  { %2888 = vmatprep.subr.bf16.mxu1 %v2929_v32 }
 0xe14   :  { %2889 = vmatpush3.bf16.msra.mxu1 %v2929_v32 }
 0xe8f   :  { %v2101_v48 = vpop.xlane.xlu0 %2100 }
 0xe90   :  { %v2111_v49 = vmul.f32 0.03125, %v2101_v48  ;;  %v2930_v48 = vld [vmem:[%s3637_s10 + $0x30] sm:$0xff]  }
 0xe91   :  { %v2104_v21 = vpop.xlane.xlu1 %2103  ;;  %2890 = vmatprep.subr.bf16.mxu1 %v2930_v48 }
 0xe92   :  { %v2115_v22 = vsub.f32 %v3500_v19, %v2111_v49  ;;  %v2112_v24 = vmul.f32 0.03125, %v2104_v21  ;;  %2891 = vmatpush3.bf16.msra.mxu1 %v2930_v48  ;;  %v2931_v49 = vld [vmem:[%s3637_s10 + $0x38] sm:$0xff]   ;;  %v2558_v21 = vld [vmem:[%s3636_s9] ss:$0 sm:$0xff] }
 0xe93   :  { %v2107_v25 = vpop.xlane.xlu0 %2106  ;;  %2892 = vmatprep.subr.bf16.mxu1 %v2931_v49 }
 0xe94   :  { %v2116_v26 = vsub.f32 %v3510_v28, %v2112_v24  ;;  %v2113_v29 = vmul.f32 0.03125, %v2107_v25  ;;  %v2119_v30 = vmul.f32 %v2115_v22, %v2115_v22 }
 0xe96   :  { %v2117_v31 = vsub.f32 %v3505_v27, %v2113_v29  ;;  %v2123_v33 = vsel %vm49_vm0, %v2119_v30, 0.0  ;;  %v2120_v34 = vmul.f32 %v2116_v26, %v2116_v26  ;;  %2893 = vmatpush3.bf16.msra.mxu1 %v2931_v49 }
 0xe97   :  { %2124 = vadd.xlane.f32.xlu0 %v2123_v33  ;;  %v2110_v35 = vpop.xlane.xlu0 %2109 }
 0xe98   :  { %v2114_v36 = vmul.f32 0.03125, %v2110_v35  ;;  %v2126_v37 = vsel %vm49_vm0, %v2120_v34, 0.0  ;;  %v2121_v38 = vmul.f32 %v2117_v31, %v2117_v31 }
 0xe99   :  { %2127 = vadd.xlane.f32.xlu1 %v2126_v37 }
 0xe9a   :  { %v2118_v39 = vsub.f32 %v3516_v15, %v2114_v36  ;;  %v2129_v40 = vsel %vm49_vm0, %v2121_v38, 0.0 }
 0xe9b   :  { %2130 = vadd.xlane.f32.xlu0 %v2129_v40 }
 0xe9c   :  { %v2122_v41 = vmul.f32 %v2118_v39, %v2118_v39 }
 0xe9e   :  { %v2132_v42 = vsel %vm49_vm0, %v2122_v41, 0.0 }
 0xe9f   :  { %2133 = vadd.xlane.f32.xlu1 %v2132_v42 }
 0xf24   :  { %v2125_v44 = vpop.xlane.xlu0 %2124 }
 0xf25   :  { %v2135_v45 = vmul.f32 0.03125, %v2125_v44 }
 0xf26   :  { %v2128_v46 = vpop.xlane.xlu1 %2127 }
 0xf27   :  { %v2139_v47 = vadd.f32 1e-05, %v2135_v45  ;;  %v2136_v50 = vmul.f32 0.03125, %v2128_v46 }
 0xf28   :  { %v2131_v51 = vpop.xlane.xlu0 %2130 }
 0xf29   :  { %3004 = vrsqrt.f32 %v2139_v47  ;;  %v2140_v52 = vadd.f32 1e-05, %v2136_v50  ;;  %v2137_v53 = vmul.f32 0.03125, %v2131_v51 }
 0xf2b   :  { %3006 = vrsqrt.f32 %v2140_v52  ;;  %v2141_v54 = vadd.f32 1e-05, %v2137_v53 }
 0xf2c   :  { %v2134_v55 = vpop.xlane.xlu1 %2133 }
 0xf2d   :  { %3008 = vrsqrt.f32 %v2141_v54  ;;  %v2138_v56 = vmul.f32 0.03125, %v2134_v55 }
 0xf2f   :  { %v2142_v57 = vadd.f32 1e-05, %v2138_v56 }
 0xf31   :  { %3010 = vrsqrt.f32 %v2142_v57 }
 0xf33   :  { %v3005_v58 = vpop.eup %3004 }
 0xf34   :  { %v2147_v60 = vmul.f32 %v3005_v58, %v2115_v22 }
 0xf35   :  { %v3007_v61 = vpop.eup %3006 }
 0xf36   :  { %v2148_v63 = vmul.f32 %v3007_v61, %v2116_v26  ;;  %v2157_v0 = vmul.f32 %v2556_v59, %v2147_v60 }
 0xf37   :  { %v3009_v2 = vpop.eup %3008 }
 0xf38   :  { %v2149_v7 = vmul.f32 %v3009_v2, %v2117_v31  ;;  %v2158_v8 = vmul.f32 %v2556_v59, %v2148_v63  ;;  %v2167_v18 = vadd.f32 %v2557_v3, %v2157_v0 }
 0xf3a   :  { %v2168_v9 = vadd.f32 %v2557_v3, %v2158_v8  ;;  %v2159_v12 = vmul.f32 %v2556_v59, %v2149_v7 }
 0xf3b   :  { %v3011_v11 = vpop.eup %3010 }
 0xf3c   :  { %v2150_v13 = vmul.f32 %v3011_v11, %v2118_v39  ;;  %v2171_v16 = vpack.c.bf16 %v2168_v9, %v2167_v18  ;;  %v2169_v17 = vadd.f32 %v2557_v3, %v2159_v12 }
 0xf3e   :  { %v2160_v1 = vmul.f32 %v2556_v59, %v2150_v13  ;;  %2874 = vmatprep.mubr.msk.bf16.mxu0 %vm49_vm0, %v2171_v16 }
 0xf40   :  { %v2170_v20 = vadd.f32 %v2557_v3, %v2160_v1 }
 0xf42   :  { %v2172_v23 = vpack.c.bf16 %v2170_v20, %v2169_v17 }
 0xf44   :  { %2875 = vmatmul.mubr.msk.bf16.vlgmr.msra.gmra.mrb[72].mxu0 %vm49_vm0, %v2172_v23 }
0x1017   :  { %v2876_v22 = vpop.f32.mrb[72].mxu0 }
0x1018   :  { %v3571_v24 = vadd.f32 %v2876_v22, %v2558_v21  ;;  %v2236_v25 = vpop.f32.mrb[73].mxu0 }
0x1019   :  { %v3573_v26 = vadd.f32 %v2558_v21, %v2236_v25  ;;  %v2877_v29 = vpop.f32.mrb[74].mxu0 }
0x101a   :  { %v3576_v30 = vmul.f32 0.70710677, %v3571_v24  ;;  %v3578_v31 = vadd.f32 %v2877_v29, %v2558_v21  ;;  %v2239_v33 = vpop.f32.mrb[75].mxu0 }
0x101b   :  { %v3581_v34 = vmul.f32 0.70710677, %v3573_v26  ;;  %v3587_v37 = vadd.f32 %v2558_v21, %v2239_v33 }
0x101c   :  { %v2269_v35 = vand.u32 2147483647, %v3576_v30  ;;  %v3585_v36 = vmul.f32 0.70710677, %v3578_v31  ;;  %vm2261_vm8 = vcmp.ge.f32.partialorder %v3576_v30, 0.0 }
0x101d   :  { %v2267_v38 = vand.u32 2147483647, %v3581_v34  ;;  %v3592_v43 = vmul.f32 0.70710677, %v3587_v37  ;;  %vm2259_vm9 = vcmp.ge.f32.partialorder %v3581_v34, 0.0 }
0x101e   :  { %v2273_v39 = vmul.f32 0.3275911, %v2269_v35  ;;  %v2270_v41 = vand.u32 2147483647, %v3585_v36  ;;  %v2325_v51 = vsub.f32 0.0, %v2269_v35  ;;  %vm2262_vm10 = vcmp.ge.f32.partialorder %v3585_v36, 0.0 }
0x101f   :  { %v2271_v40 = vmul.f32 0.3275911, %v2267_v38  ;;  %v2268_v45 = vand.u32 2147483647, %v3592_v43  ;;  %v2323_v52 = vsub.f32 0.0, %v2267_v38  ;;  %vm2260_vm11 = vcmp.ge.f32.partialorder %v3592_v43, 0.0 }
0x1020   :  { %v2277_v42 = vadd.f32 1.0, %v2273_v39  ;;  %v2274_v44 = vmul.f32 0.3275911, %v2270_v41  ;;  %v2329_v54 = vmul.f32 %v2325_v51, %v2269_v35  ;;  %v2326_v55 = vsub.f32 0.0, %v2270_v41 }
0x1021   :  { %v2275_v62 = vadd.f32 1.0, %v2271_v40  ;;  %v2272_v47 = vmul.f32 0.3275911, %v2268_v45  ;;  %v2327_v58 = vmul.f32 %v2323_v52, %v2267_v38  ;;  %v2324_v60 = vsub.f32 0.0, %v2268_v45 }
0x1022   :  { %3012 = vrcp.f32 %v2277_v42  ;;  %v2278_v46 = vadd.f32 1.0, %v2274_v44  ;;  %v2335_v0 = vmul.f32 1.442695, %v2329_v54  ;;  %v2330_v3 = vmul.f32 %v2326_v55, %v2270_v41 }
0x1023   :  { %3014 = vrcp.f32 %v2275_v62  ;;  %v2276_v50 = vadd.f32 1.0, %v2272_v47  ;;  %v2331_v8 = vmul.f32 1.442695, %v2327_v58  ;;  %v2328_v12 = vmul.f32 %v2324_v60, %v2268_v45 }
0x1024   :  { %3016 = vrcp.f32 %v2278_v46  ;;  %v2337_v20 = vmul.f32 1.442695, %v2330_v3  ;;  %v3073_v58 = vmov -1.0  }
0x1025   :  { %3018 = vrcp.f32 %v2276_v50  ;;  %v2333_v14 = vmul.f32 1.442695, %v2328_v12  ;;  %v2263_v30 = vsel %vm2259_vm9, 1.0, %v3073_v58  ;;  %v2264_v12 = vsel %vm2260_vm11, 1.0, %v3073_v58 }
0x1026   :  { %3020 = vpow2.f32 %v2335_v0 }
0x1027   :  { %3022 = vpow2.f32 %v2331_v8  ;;  %v2266_v8 = vsel %vm2262_vm10, 1.0, %v3073_v58 }
0x1028   :  { %3024 = vpow2.f32 %v2337_v20 }
0x1029   :  { %3026 = vpow2.f32 %v2333_v14 }
0x102c   :  { %v3013_v53 = vpop.eup %3012 }
0x102d   :  { %v3015_v56 = vpop.eup %3014  ;;  %v2289_v57 = vmul.f32 1.0614054, %v3013_v53 }
0x102e   :  { %v2287_v59 = vmul.f32 1.0614054, %v3015_v56  ;;  %v3017_v63 = vpop.eup %3016 }
0x102f   :  { %v2293_v61 = vadd.f32 -1.4531521, %v2289_v57  ;;  %v2290_v18 = vmul.f32 1.0614054, %v3017_v63  ;;  %v3019_v9 = vpop.eup %3018 }
0x1030   :  { %v2291_v2 = vadd.f32 -1.4531521, %v2287_v59  ;;  %v2288_v1 = vmul.f32 1.0614054, %v3019_v9  ;;  %v3021_v62 = vpop.eup %3020  ;;  %v2265_v59 = vsel %vm2261_vm8, 1.0, %v3073_v58 }
0x1031   :  { %v2297_v7 = vmul.f32 %v3013_v53, %v2293_v61  ;;  %v2294_v16 = vadd.f32 -1.4531521, %v2290_v18  ;;  %v3023_v45 = vpop.eup %3022 }
0x1032   :  { %v2295_v11 = vmul.f32 %v3015_v56, %v2291_v2  ;;  %v2292_v5 = vadd.f32 -1.4531521, %v2288_v1  ;;  %v3025_v57 = vpop.eup %3024 }
0x1033   :  { %v2301_v13 = vadd.f32 1.4214138, %v2297_v7  ;;  %v2298_v4 = vmul.f32 %v3017_v63, %v2294_v16  ;;  %v3027_v0 = vpop.eup %3026  ;;  %v2254_v16 = vmul.f32 0.5, %v3578_v31  ;;  %v2571_v31 = vld [vmem:[%s3638_s11] ss:$0 sm:$0xff]  ;;  %s3032_s11 = scalar_lea.vmem %s2499_s21, 512 }
0x1034   :  { %v2299_v17 = vadd.f32 1.4214138, %v2295_v11  ;;  %v2296_v48 = vmul.f32 %v3019_v9, %v2292_v5  ;;  %v2253_v11 = vmul.f32 0.5, %v3571_v24  ;;  %p3033_p0 = scmp.ne.s32.totalorder %s2499_s21, %s3032_s11  ;;  %p3038_p2 = scmp.lt.s32.totalorder %s3032_s11, %s3032_s11 }
0x1035   :  { %v2305_v23 = vmul.f32 %v3013_v53, %v2301_v13  ;;  %v2302_v32 = vadd.f32 1.4214138, %v2298_v4 }
0x1036   :  { %v2303_v10 = vmul.f32 %v3015_v56, %v2299_v17  ;;  %v2300_v25 = vadd.f32 1.4214138, %v2296_v48  ;;  %p3039_p3 = por %p3038_p2, %p3037_p1 }
0x1037   :  { %v2309_v6 = vadd.f32 -0.28449672, %v2305_v23  ;;  %v2306_v22 = vmul.f32 %v3017_v63, %v2302_v32  ;;  %v2252_v23 = vmul.f32 0.5, %v3587_v37 }
0x1038   :  { %v2307_v49 = vadd.f32 -0.28449672, %v2303_v10  ;;  %v2304_v38 = vmul.f32 %v3019_v9, %v2300_v25  ;;  %p3040_p4 = pnand %p3039_p3, %p3033_p0 }
0x1039   :  { %v2313_v21 = vmul.f32 %v3013_v53, %v2309_v6  ;;  %v2310_v35 = vadd.f32 -0.28449672, %v2306_v22 }
0x103a   :  { %v2311_v29 = vmul.f32 %v3015_v56, %v2307_v49  ;;  %v2308_v42 = vadd.f32 -0.28449672, %v2304_v38 }
0x103b   :  { %v2317_v33 = vadd.f32 0.2548296, %v2313_v21  ;;  %v2314_v41 = vmul.f32 %v3017_v63, %v2310_v35 }
0x103c   :  { %v2315_v39 = vadd.f32 0.2548296, %v2311_v29  ;;  %v2312_v50 = vmul.f32 %v3019_v9, %v2308_v42 }
0x103d   :  { %v2321_v40 = vmul.f32 %v3013_v53, %v2317_v33  ;;  %v2318_v47 = vadd.f32 0.2548296, %v2314_v41 }
0x103e   :  { %v2319_v44 = vmul.f32 %v3015_v56, %v2315_v39  ;;  %v2316_v55 = vadd.f32 0.2548296, %v2312_v50 }
0x103f   :  { %v2341_v46 = vmul.f32 %v3021_v62, %v2321_v40  ;;  %v2322_v54 = vmul.f32 %v3017_v63, %v2318_v47 }
0x1040   :  { %v2339_v51 = vmul.f32 %v3023_v45, %v2319_v44  ;;  %v2320_v61 = vmul.f32 %v3019_v9, %v2316_v55  ;;  %v2251_v9 = vmul.f32 0.5, %v3573_v26 }
0x1041   :  { %v2345_v52 = vsub.f32 1.0, %v2341_v46  ;;  %v2342_v56 = vmul.f32 %v3025_v57, %v2322_v54 }
0x1042   :  { %v2343_v53 = vsub.f32 1.0, %v2339_v51  ;;  %v2340_v7 = vmul.f32 %v3027_v0, %v2320_v61 }
0x1043   :  { %v2349_v60 = vmul.f32 %v2345_v52, %v2265_v59  ;;  %v2346_v3 = vsub.f32 1.0, %v2342_v56 }
0x1044   :  { %v2347_v2 = vmul.f32 %v2343_v53, %v2263_v30  ;;  %v2344_v18 = vsub.f32 1.0, %v2340_v7 }
0x1045   :  { %v2353_v34 = vadd.f32 1.0, %v2349_v60  ;;  %v2350_v63 = vmul.f32 %v2346_v3, %v2266_v8 }
0x1046   :  { %v2351_v13 = vadd.f32 1.0, %v2347_v2  ;;  %v2348_v1 = vmul.f32 %v2344_v18, %v2264_v12 }
0x1047   :  { %v2354_v36 = vadd.f32 1.0, %v2350_v63  ;;  %v2357_v17 = vmul.f32 %v2353_v34, %v2253_v11 }
0x1048   :  { %v2352_v43 = vadd.f32 1.0, %v2348_v1  ;;  %v2355_v4 = vmul.f32 %v2351_v13, %v2251_v9 }
0x1049   :  { %v2358_v20 = vmul.f32 %v2354_v36, %v2254_v16 }
0x104a   :  { %v2356_v10 = vmul.f32 %v2352_v43, %v2252_v23 }
0x104b   :  { %v2360_v5 = vpack.c.bf16 %v2358_v20, %v2357_v17 }
0x104c   :  { %v2359_v14 = vpack.c.bf16 %v2356_v10, %v2355_v4 }
0x104e   :  { %2894 = vmatprep.mubr.bf16.mxu1 %v2359_v14 }
0x104f   :  { %2895 = vmatmul.mubr.bf16.vlgmr.msra.gmra.mrb[64].mxu1 %v2360_v5 }
0x1122   :  { %v2896_v24 = vpop.f32.mrb[64].mxu1 }
0x1123   :  { %v2476_v6 = vadd.f32 %v2896_v24, %v3505_v27  ;;  %v2459_v32 = vpop.f32.mrb[65].mxu1 }
0x1124   :  { %v2474_v26 = vadd.f32 %v2459_v32, %v3500_v19  ;;  %v2897_v48 = vpop.f32.mrb[66].mxu1 }
0x1125   :  { %v2487_v49 = vadd.f32 %v2571_v31, %v2476_v6  ;;  %v2477_v37 = vadd.f32 %v2897_v48, %v3516_v15  ;;  %v2462_v21 = vpop.f32.mrb[67].mxu1 }
0x1126   :  { %v2485_v22 = vadd.f32 %v2571_v31, %v2474_v26  ;;  %v2475_v25 = vadd.f32 %v2462_v21, %v3510_v28 }
0x1127   :  { %2491 = vst.msk [vmem:[#allocation3 + $0x10] sm:$0xff] %vm49_vm0, %v2487_v49  ;;  %v2488_v29 = vadd.f32 %v2571_v31, %v2477_v37 }
0x1128   :  { %2489 = vst.msk [vmem:[#allocation3] sm:$0xff] %vm49_vm0, %v2485_v22  ;;  %v2486_v33 = vadd.f32 %v2571_v31, %v2475_v25 }
0x1129   :  { %2492 = vst.msk [vmem:[#allocation3 + $0x18] sm:$0xff] %vm49_vm0, %v2488_v29 }
0x112a   :  { %2490 = vst.msk [vmem:[#allocation3 + $0x8] sm:$0xff] %vm49_vm0, %v2486_v33 }
0x112b   :  { %3043 = shalt.err (!%p3040_p4)
}
0x112c   :  { %s3044_s8 = scalar_lea.hbm %s3639_s12, 512 }
0x112d   :  { %p3045_p5 = scmp.ne.s32.totalorder %s3639_s12, %s3044_s8  ;;  %p3048_p6 = scmp.lt.u32.totalorder %s3044_s8, %s3639_s12 }
0x112f   :  { %p3050_p7 = pnand %p3048_p6, %p3045_p5 }
0x1131   :  { %3053 = shalt.err (!%p3050_p7)
}
0x1132   :  { %s3075_s28 = smov 128  }
0x1133   :  { %2504 = dma.vmem_to_hbm [thread:$0]  %s2499_s21, 512, %s3639_s12, [#allocation4], %s3075_s28, %s3075_s28, %s3070_s27  }
0x1134   :  { %3054 = dma.done.wait [#allocation4], 512  }
0x1135   :  { %3055 = vsyncadd [#allocation4], 4294966784 }
0x1136   :  { %2508 = vsyncpa [#allocation4], 1 }

</bundles_post_ra>
